<compile_context>
chip_gen: v7x
topology: tpu7x:2x2x1
jax: 0.10.0
libtpu: 0.0.40
codegen_flags: <defaults>
</compile_context>

<pallas_src>
import functools

import jax
import jax.numpy as jnp
from jax import lax
from jax.experimental import pallas as pl
from jax.experimental.pallas import tpu as pltpu


# ==========================================================================
# In-kernel math helpers
# ==========================================================================
def _leaky(y):
    # torch.nn.LeakyReLU default negative_slope = 0.01
    return jnp.where(y >= 0.0, y, 0.01 * y)


def _softplus(x):
    return jnp.maximum(x, 0.0) + jnp.log1p(jnp.exp(-jnp.abs(x)))


def _sigmoid(x):
    return 1.0 / (1.0 + jnp.exp(-x))


def _dot(a, b):
    return jnp.dot(a, b, preferred_element_type=jnp.float32)


def _dot_nt(a, b):
    """a [M, K] contracted with b [N, K] -> [M, N] (no transposed weight copy)."""
    return lax.dot_general(a, b, (((1,), (1,)), ((), ())),
                           preferred_element_type=jnp.float32)


# ==========================================================================
# Kernel 1: the whole encoder in one pallas_call
# ==========================================================================
def _encoder_kernel(*refs, n_blocks, has_shortcut):
    """refs = [x,
               (T1, b1, T2, b2 [, Ts, bs]) for each residual block,
               fc1_w, fc1_b, fc2_w, fc2_b,
               out]

    x and all intermediate activations are flat NHWC rows [B, H*W*C].
    T* are the unrolled (Toeplitz) conv matrices with the BN affine + conv bias
    folded in (bias rows b*), so one residual block is just three matmuls.
    """
    x = refs[0][...]                      # [B, H*W*C]  f32
    out_ref = refs[-1]
    w = refs[1:-1]

    i = 0
    for blk in range(n_blocks):
        t1, b1 = w[i][...], w[i + 1][...]
        t2, b2 = w[i + 2][...], w[i + 3][...]
        i += 4
        if has_shortcut[blk]:
            ts, bs = w[i][...], w[i + 1][...]
            i += 2
            sc = _dot(x.astype(ts.dtype), ts) + bs            # 1x1 projection
        else:
            sc = x                                            # identity shortcut
        h = _leaky(_dot(x.astype(t1.dtype), t1) + b1)         # conv1 + BN + LReLU
        x = _leaky(_dot(h.astype(t2.dtype), t2) + b2 + sc)    # conv2 + BN + add + LReLU

    fc1_w, fc1_b = w[i][...], w[i + 1][...]
    fc2_w, fc2_b = w[i + 2][...], w[i + 3][...]
    h1 = _leaky(_dot(x.astype(fc1_w.dtype), fc1_w) + fc1_b)   # Linear + BN1d + LReLU
    out_ref[...] = _dot(h1.astype(fc2_w.dtype), fc2_w) + fc2_b


# ==========================================================================
# Kernel 2: reparameterisation + both Brenier maps (ICNN gradients)
# ==========================================================================
def _icnn_grad(x, w0, b0, wz1, wx1, b1, wz2r, wx2r, il2, x_rows=None):
    """Analytic gradient wrt x of  f(x) = ICNN(x) + (il2/2) * ||x||^2.

    Assumed 2-hidden-layer ICNN (see TODO at top of file):
        h1 = softplus(x @ W0 + b0)
        h2 = softplus(h1 @ Wz1 + x @ Wx1 + b1)     (Wz1 >= 0)
        f  = h2 @ wz2 + x @ wx2 + b2               (wz2 >= 0)

    If `x_rows` is given, the caller guarantees that only the first `x_rows`
    input features are non-zero and passes that dense slice as `x`; the forward
    contractions then use only W0[:x_rows] / Wx1[:x_rows] (skipping the padded
    rows).  The returned gradient is always full-width (W0.shape[0]).
    """
    if x_rows is None:
        w0_f, wx1_f = w0, wx1
    else:
        w0_f, wx1_f = w0[:x_rows, :], wx1[:x_rows, :]

    pre1 = _dot(x, w0_f) + b0
    s1 = _sigmoid(pre1)                   # softplus'
    h1 = _softplus(pre1)
    pre2 = _dot(h1, wz1) + _dot(x, wx1_f) + b1
    s2 = _sigmoid(pre2)

    gz = s2 * wz2r                        # df/dpre2   [B, H]
    gh1 = _dot_nt(gz, wz1) * s1           # df/dpre1   [B, H]
    grad = wx2r + _dot_nt(gz, wx1) + _dot_nt(gh1, w0)

    if il2 != 0.0:
        if x_rows is None:
            grad = grad + il2 * x
        else:
            pad = jnp.zeros((x.shape[0], w0.shape[0] - x_rows), grad.dtype)
            grad = grad + il2 * jnp.concatenate([x, pad], axis=1)
    return grad


def _decoder_kernel(enc_ref, eps_ref,
                    a_w0, a_b0, a_wz1, a_wx1, a_b1, a_wz2, a_wx2,
                    c_w0, c_b0, c_wz1, c_wx1, c_b1, c_wz2, c_wx2,
                    out_ref, *, latent, il2):
    enc = enc_ref[...]
    mu = enc[:, :latent]
    log_var = enc[:, latent:]
    z = mu + eps_ref[...] * jnp.exp(0.5 * log_var)            # reparameterise

    # Brenier map 1: gradient of ICNN_1 potential, input dim = latent.
    g1 = _icnn_grad(z, a_w0[...], a_b0[...], a_wz1[...], a_wx1[...],
                    a_b1[...], a_wz2[...], a_wx2[...], il2)

    # x = F.linear(g1, B) with B = eye(D2, latent)  ==  zero-pad to D2 columns.
    # Brenier map 2 exploits that structure (x_rows=latent).
    g2 = _icnn_grad(g1, c_w0[...], c_b0[...], c_wz1[...], c_wx1[...],
                    c_b1[...], c_wz2[...], c_wx2[...], il2, x_rows=latent)
    out_ref[...] = g2


# ==========================================================================
# pallas_call wrappers (small model: single full-array block, grid=(1,))
# ==========================================================================
def _full_spec(shape):
    return pl.BlockSpec(shape, lambda i: (0,) * len(shape))


def encode(enc_weights, x_flat, has_shortcut, out_dim):
    args = [x_flat] + list(enc_weights)
    batch = x_flat.shape[0]
    kernel = functools.partial(_encoder_kernel,
                               n_blocks=len(has_shortcut),
                               has_shortcut=tuple(has_shortcut))
    return pl.pallas_call(
        kernel,
        grid=(1,),
        in_specs=[_full_spec(a.shape) for a in args],
        out_specs=_full_spec((batch, out_dim)),
        out_shape=jax.ShapeDtypeStruct((batch, out_dim), jnp.float32),
        compiler_params=pltpu.CompilerParams(dimension_semantics=("arbitrary",)),
    )(*args)


def decode(params, enc, eps, cfg):
    latent = cfg["latent_channel"]
    d2 = cfg["in_channel"] * cfg["input_dim"] ** 2
    batch = enc.shape[0]
    p1, p2 = params["icnn1"], params["icnn2"]
    args = [enc, eps,
            p1["W0"], p1["b0"], p1["Wz1"], p1["Wx1"], p1["b1"], p1["wz2r"], p1["wx2r"],
            p2["W0"], p2["b0"], p2["Wz1"], p2["Wx1"], p2["b1"], p2["wz2r"], p2["wx2r"]]
    kernel = functools.partial(_decoder_kernel, latent=latent,
                               il2=float(cfg["inverse_lipschitz"]))
    return pl.pallas_call(
        kernel,
        grid=(1,),
        in_specs=[_full_spec(a.shape) for a in args],
        out_specs=_full_spec((batch, d2)),
        out_shape=jax.ShapeDtypeStruct((batch, d2), jnp.float32),
        compiler_params=pltpu.CompilerParams(dimension_semantics=("arbitrary",)),
    )(*args)


# ==========================================================================
# Init-time parameter preparation (conv unrolling + BN/bias folding)
# ==========================================================================
def _conv_to_matrix(w_hwio, hin, win, stride, pad):
    """Unroll a conv into its exact Toeplitz matrix (NHWC flat ordering on both
    sides).  Runs once at init, never in the forward path."""
    cin = w_hwio.shape[2]
    basis = jnp.eye(hin * win * cin, dtype=jnp.float32).reshape(-1, hin, win, cin)
    out = lax.conv_general_dilated(
        basis, w_hwio, window_strides=(stride, stride),
        padding=[(pad, pad), (pad, pad)],
        dimension_numbers=("NHWC", "HWIO", "NHWC"))
    hout, wout, cout = out.shape[1], out.shape[2], out.shape[3]
    return out.reshape(hin * win * cin, hout * wout * cout), hout, wout


def _fold_conv(w_hwio, bias, gamma, beta, hin, win, stride, pad, wdtype):
    """conv + bias + BN affine  ->  (weight matrix, bias row)."""
    t, hout, wout = _conv_to_matrix(w_hwio, hin, win, stride, pad)
    scale = jnp.tile(gamma, hout * wout)                 # columns are channel-fastest
    shift = jnp.tile(bias * gamma + beta, hout * wout)
    return ((t * scale[None, :]).astype(wdtype),
            shift[None, :].astype(jnp.float32), hout, wout)


def _init_resblock(key, cin, cout, hin, win, stride, wdtype):
    ks = jax.random.split(key, 3)
    w1 = 0.1 * jax.random.normal(ks[0], (3, 3, cin, cout), jnp.float32)    # HWIO
    w2 = 0.1 * jax.random.normal(ks[1], (3, 3, cout, cout), jnp.float32)
    zeros = jnp.zeros((cout,), jnp.float32)
    ones = jnp.ones((cout,), jnp.float32)

    t1, tb1, hout, wout = _fold_conv(w1, zeros, ones, zeros, hin, win, stride, 1, wdtype)
    t2, tb2, _, _ = _fold_conv(w2, zeros, ones, zeros, hout, wout, 1, 1, wdtype)
    weights = [t1, tb1, t2, tb2]

    has_sc = (stride != 1) or (cin != cout)
    if has_sc:
        ws = 0.1 * jax.random.normal(ks[2], (1, 1, cin, cout), jnp.float32)
        ts, tbs, _, _ = _fold_conv(ws, zeros, ones, zeros, hin, win, stride, 0, wdtype)
        weights += [ts, tbs]
    return weights, hout, wout


def _init_icnn(key, din, dh):
    ks = jax.random.split(key, 5)
    return dict(
        W0=0.1 * jax.random.normal(ks[0], (din, dh), jnp.float32),
        b0=jnp.zeros((1, dh), jnp.float32),
        Wz1=jnp.abs(0.1 * jax.random.normal(ks[1], (dh, dh), jnp.float32)),
        Wx1=0.1 * jax.random.normal(ks[2], (din, dh), jnp.float32),
        b1=jnp.zeros((1, dh), jnp.float32),
        wz2r=jnp.abs(0.1 * jax.random.normal(ks[3], (1, dh), jnp.float32)),
        wx2r=0.1 * jax.random.normal(ks[4], (1, din), jnp.float32),
        # final ICNN bias b2 drops out of the gradient -> not stored.
    )


def _shortcut_flags(cfg):
    # stride-2 block always needs a 1x1 projection shortcut;
    # the following stride-1 block has cin == cout -> identity shortcut.
    return tuple(f for _ in cfg["hidden_channels"] for f in (True, False))


def init_params(key, cfg, conv_dtype=jnp.bfloat16):
    hidden = cfg["hidden_channels"]
    latent = cfg["latent_channel"]
    keys = iter(jax.random.split(key, 4 + 2 * len(hidden)))

    enc_weights = []
    last, hin, win = cfg["in_channel"], cfg["input_dim"], cfg["input_dim"]
    for ch in hidden:
        w_dn, hin, win = _init_resblock(next(keys), last, ch, hin, win, 2, conv_dtype)
        w_kp, hin, win = _init_resblock(next(keys), ch, ch, hin, win, 1, conv_dtype)
        enc_weights += w_dn + w_kp
        last = ch

    flat_dim = last * hin * win
    fc1_w = 0.05 * jax.random.normal(next(keys), (flat_dim, 2 * latent), jnp.float32)
    fc1_b = jnp.zeros((2 * latent,), jnp.float32)
    bn_g = jnp.ones((2 * latent,), jnp.float32)
    bn_b = jnp.zeros((2 * latent,), jnp.float32)
    # Fold the BatchNorm1d affine into fc1:  y = (x @ W + b) * g + beta
    fc1_wf = fc1_w * bn_g[None, :]
    fc1_bf = (fc1_b * bn_g + bn_b)[None, :]
    fc2_w = 0.05 * jax.random.normal(next(keys), (2 * latent, 2 * latent), jnp.float32)
    fc2_b = jnp.zeros((1, 2 * latent), jnp.float32)
    enc_weights += [fc1_wf, fc1_bf, fc2_w, fc2_b]

    return dict(
        enc_weights=enc_weights,
        icnn1=_init_icnn(next(keys), latent, cfg["icnn_channels"][0]),
        icnn2=_init_icnn(next(keys), cfg["in_channel"] * cfg["input_dim"] ** 2,
                         cfg["icnn_channels"][1]),
    )


# ==========================================================================
# LIDVAE forward (exactly two Pallas kernels)
# ==========================================================================
def lidvae_forward(params, x, eps, cfg):
    batch = x.shape[0]
    latent = cfg["latent_channel"]

    # Single boundary transpose to flat NHWC rows; everything downstream is 2-D.
    x_flat = jnp.transpose(jnp.asarray(x, jnp.float32), (0, 2, 3, 1)).reshape(batch, -1)

    enc = encode(params["enc_weights"], x_flat,
                 _shortcut_flags(cfg), 2 * latent)            # Pallas kernel #1
    mu, log_var = enc[:, :latent], enc[:, latent:]

    out_flat = decode(params, enc, eps, cfg)                  # Pallas kernel #2
    out = out_flat.reshape(batch, cfg["in_channel"],
                           cfg["input_dim"], cfg["input_dim"])
    return out, mu, log_var


# ==========================================================================
if __name__ == "__main__":
    cfg = dict(
        in_channel=1,
        latent_channel=8,
        hidden_channels=[8, 16],
        icnn_channels=[32, 32],
        input_dim=16,
        inverse_lipschitz=0.0,
    )
    batch = 2

    k_param, k_x, k_eps = jax.random.split(jax.random.PRNGKey(0), 3)
    params = init_params(k_param, cfg)
    x = jax.random.normal(k_x, (batch, cfg["in_channel"],
                                cfg["input_dim"], cfg["input_dim"]), jnp.float32)
    eps = jax.random.normal(k_eps, (batch, cfg["latent_channel"]), jnp.float32)

    fwd = jax.jit(lambda p, xx, ee: lidvae_forward(p, xx, ee, cfg))
    out, mu, log_var = fwd(params, x, eps)
    jax.block_until_ready((out, mu, log_var))

    assert out.shape == x.shape
    assert mu.shape == (batch, cfg["latent_channel"])
    assert log_var.shape == (batch, cfg["latent_channel"])
    print("KERNEL_OK")
</pallas_src>

<mosaic_0001>
module attributes {stable_mosaic.version = 11 : i64} {
  func.func @_encoder_kernel(%arg0: i32, %arg1: memref<2x256xf32, #tpu.memory_space<vmem>>, %arg2: memref<256x512xbf16, #tpu.memory_space<vmem>>, %arg3: memref<1x512xf32, #tpu.memory_space<vmem>>, %arg4: memref<512x512xbf16, #tpu.memory_space<vmem>>, %arg5: memref<1x512xf32, #tpu.memory_space<vmem>>, %arg6: memref<256x512xbf16, #tpu.memory_space<vmem>>, %arg7: memref<1x512xf32, #tpu.memory_space<vmem>>, %arg8: memref<512x512xbf16, #tpu.memory_space<vmem>>, %arg9: memref<1x512xf32, #tpu.memory_space<vmem>>, %arg10: memref<512x512xbf16, #tpu.memory_space<vmem>>, %arg11: memref<1x512xf32, #tpu.memory_space<vmem>>, %arg12: memref<512x256xbf16, #tpu.memory_space<vmem>>, %arg13: memref<1x256xf32, #tpu.memory_space<vmem>>, %arg14: memref<256x256xbf16, #tpu.memory_space<vmem>>, %arg15: memref<1x256xf32, #tpu.memory_space<vmem>>, %arg16: memref<512x256xbf16, #tpu.memory_space<vmem>>, %arg17: memref<1x256xf32, #tpu.memory_space<vmem>>, %arg18: memref<256x256xbf16, #tpu.memory_space<vmem>>, %arg19: memref<1x256xf32, #tpu.memory_space<vmem>>, %arg20: memref<256x256xbf16, #tpu.memory_space<vmem>>, %arg21: memref<1x256xf32, #tpu.memory_space<vmem>>, %arg22: memref<256x16xf32, #tpu.memory_space<vmem>>, %arg23: memref<1x16xf32, #tpu.memory_space<vmem>>, %arg24: memref<16x16xf32, #tpu.memory_space<vmem>>, %arg25: memref<1x16xf32, #tpu.memory_space<vmem>>, %arg26: memref<2x16xf32, #tpu.memory_space<vmem>>) attributes {dimension_semantics = [#tpu.dimension_semantics<arbitrary>], iteration_bounds = array<i64: 1>, scalar_prefetch = 0 : i64, scratch_operands = 0 : i64, tpu.core_type = #tpu.core_type<tc>, window_params = [{pipeline_mode = #tpu.pipeline_mode<synchronous>, transform_indices = @transform_0, window_bounds = array<i64: 2, 256>}, {pipeline_mode = #tpu.pipeline_mode<synchronous>, transform_indices = @transform_1, window_bounds = array<i64: 256, 512>}, {pipeline_mode = #tpu.pipeline_mode<synchronous>, transform_indices = @transform_2, window_bounds = array<i64: 1, 512>}, {pipeline_mode = #tpu.pipeline_mode<synchronous>, transform_indices = @transform_3, window_bounds = array<i64: 512, 512>}, {pipeline_mode = #tpu.pipeline_mode<synchronous>, transform_indices = @transform_4, window_bounds = array<i64: 1, 512>}, {pipeline_mode = #tpu.pipeline_mode<synchronous>, transform_indices = @transform_5, window_bounds = array<i64: 256, 512>}, {pipeline_mode = #tpu.pipeline_mode<synchronous>, transform_indices = @transform_6, window_bounds = array<i64: 1, 512>}, {pipeline_mode = #tpu.pipeline_mode<synchronous>, transform_indices = @transform_7, window_bounds = array<i64: 512, 512>}, {pipeline_mode = #tpu.pipeline_mode<synchronous>, transform_indices = @transform_8, window_bounds = array<i64: 1, 512>}, {pipeline_mode = #tpu.pipeline_mode<synchronous>, transform_indices = @transform_9, window_bounds = array<i64: 512, 512>}, {pipeline_mode = #tpu.pipeline_mode<synchronous>, transform_indices = @transform_10, window_bounds = array<i64: 1, 512>}, {pipeline_mode = #tpu.pipeline_mode<synchronous>, transform_indices = @transform_11, window_bounds = array<i64: 512, 256>}, {pipeline_mode = #tpu.pipeline_mode<synchronous>, transform_indices = @transform_12, window_bounds = array<i64: 1, 256>}, {pipeline_mode = #tpu.pipeline_mode<synchronous>, transform_indices = @transform_13, window_bounds = array<i64: 256, 256>}, {pipeline_mode = #tpu.pipeline_mode<synchronous>, transform_indices = @transform_14, window_bounds = array<i64: 1, 256>}, {pipeline_mode = #tpu.pipeline_mode<synchronous>, transform_indices = @transform_15, window_bounds = array<i64: 512, 256>}, {pipeline_mode = #tpu.pipeline_mode<synchronous>, transform_indices = @transform_16, window_bounds = array<i64: 1, 256>}, {pipeline_mode = #tpu.pipeline_mode<synchronous>, transform_indices = @transform_17, window_bounds = array<i64: 256, 256>}, {pipeline_mode = #tpu.pipeline_mode<synchronous>, transform_indices = @transform_18, window_bounds = array<i64: 1, 256>}, {pipeline_mode = #tpu.pipeline_mode<synchronous>, transform_indices = @transform_19, window_bounds = array<i64: 256, 256>}, {pipeline_mode = #tpu.pipeline_mode<synchronous>, transform_indices = @transform_20, window_bounds = array<i64: 1, 256>}, {pipeline_mode = #tpu.pipeline_mode<synchronous>, transform_indices = @transform_21, window_bounds = array<i64: 256, 16>}, {pipeline_mode = #tpu.pipeline_mode<synchronous>, transform_indices = @transform_22, window_bounds = array<i64: 1, 16>}, {pipeline_mode = #tpu.pipeline_mode<synchronous>, transform_indices = @transform_23, window_bounds = array<i64: 16, 16>}, {pipeline_mode = #tpu.pipeline_mode<synchronous>, transform_indices = @transform_24, window_bounds = array<i64: 1, 16>}, {pipeline_mode = #tpu.pipeline_mode<synchronous>, transform_indices = @transform_25, window_bounds = array<i64: 2, 16>}]} {
    %c0 = arith.constant 0 : index
    %c0_0 = arith.constant 0 : index
    %0 = vector.load %arg1[%c0, %c0_0] : memref<2x256xf32, #tpu.memory_space<vmem>>, vector<2x256xf32>
    %c0_1 = arith.constant 0 : index
    %c0_2 = arith.constant 0 : index
    %1 = vector.load %arg2[%c0_1, %c0_2] : memref<256x512xbf16, #tpu.memory_space<vmem>>, vector<256x512xbf16>
    %c0_3 = arith.constant 0 : index
    %c0_4 = arith.constant 0 : index
    %2 = vector.load %arg3[%c0_3, %c0_4] : memref<1x512xf32, #tpu.memory_space<vmem>>, vector<1x512xf32>
    %c0_5 = arith.constant 0 : index
    %c0_6 = arith.constant 0 : index
    %3 = vector.load %arg4[%c0_5, %c0_6] : memref<512x512xbf16, #tpu.memory_space<vmem>>, vector<512x512xbf16>
    %c0_7 = arith.constant 0 : index
    %c0_8 = arith.constant 0 : index
    %4 = vector.load %arg5[%c0_7, %c0_8] : memref<1x512xf32, #tpu.memory_space<vmem>>, vector<1x512xf32>
    %c0_9 = arith.constant 0 : index
    %c0_10 = arith.constant 0 : index
    %5 = vector.load %arg6[%c0_9, %c0_10] : memref<256x512xbf16, #tpu.memory_space<vmem>>, vector<256x512xbf16>
    %c0_11 = arith.constant 0 : index
    %c0_12 = arith.constant 0 : index
    %6 = vector.load %arg7[%c0_11, %c0_12] : memref<1x512xf32, #tpu.memory_space<vmem>>, vector<1x512xf32>
    %7 = arith.truncf %0 : vector<2x256xf32> to vector<2x256xbf16>
    %cst = arith.constant dense<0.000000e+00> : vector<2x512xf32>
    %8 = tpu.matmul %7, %5, %cst {dimension_numbers = #tpu.dot_dimension_numbers<[1], [0], [0], [1], [0, 0, 1, 1], [], []>} : vector<2x256xbf16>, vector<256x512xbf16>, vector<2x512xf32> -> vector<2x512xf32>
    %9 = vector.broadcast %6 : vector<1x512xf32> to vector<2x512xf32>
    %10 = arith.addf %8, %9 : vector<2x512xf32>
    %11 = arith.truncf %0 : vector<2x256xf32> to vector<2x256xbf16>
    %cst_13 = arith.constant dense<0.000000e+00> : vector<2x512xf32>
    %12 = tpu.matmul %11, %1, %cst_13 {dimension_numbers = #tpu.dot_dimension_numbers<[1], [0], [0], [1], [0, 0, 1, 1], [], []>} : vector<2x256xbf16>, vector<256x512xbf16>, vector<2x512xf32> -> vector<2x512xf32>
    %13 = vector.broadcast %2 : vector<1x512xf32> to vector<2x512xf32>
    %14 = arith.addf %12, %13 : vector<2x512xf32>
    %cst_14 = arith.constant 0.000000e+00 : f32
    %15 = vector.broadcast %cst_14 : f32 to vector<2x512xf32>
    %16 = arith.cmpf oge, %14, %15 : vector<2x512xf32>
    %cst_15 = arith.constant 0.00999999977 : f32
    %17 = vector.broadcast %cst_15 : f32 to vector<2x512xf32>
    %18 = arith.mulf %17, %14 : vector<2x512xf32>
    %19 = arith.select %16, %14, %18 : vector<2x512xi1>, vector<2x512xf32>
    %20 = arith.truncf %19 : vector<2x512xf32> to vector<2x512xbf16>
    %cst_16 = arith.constant dense<0.000000e+00> : vector<2x512xf32>
    %21 = tpu.matmul %20, %3, %cst_16 {dimension_numbers = #tpu.dot_dimension_numbers<[1], [0], [0], [1], [0, 0, 1, 1], [], []>} : vector<2x512xbf16>, vector<512x512xbf16>, vector<2x512xf32> -> vector<2x512xf32>
    %22 = vector.broadcast %4 : vector<1x512xf32> to vector<2x512xf32>
    %23 = arith.addf %21, %22 : vector<2x512xf32>
    %24 = arith.addf %23, %10 : vector<2x512xf32>
    %cst_17 = arith.constant 0.000000e+00 : f32
    %25 = vector.broadcast %cst_17 : f32 to vector<2x512xf32>
    %26 = arith.cmpf oge, %24, %25 : vector<2x512xf32>
    %cst_18 = arith.constant 0.00999999977 : f32
    %27 = vector.broadcast %cst_18 : f32 to vector<2x512xf32>
    %28 = arith.mulf %27, %24 : vector<2x512xf32>
    %29 = arith.select %26, %24, %28 : vector<2x512xi1>, vector<2x512xf32>
    %c0_19 = arith.constant 0 : index
    %c0_20 = arith.constant 0 : index
    %30 = vector.load %arg8[%c0_19, %c0_20] : memref<512x512xbf16, #tpu.memory_space<vmem>>, vector<512x512xbf16>
    %c0_21 = arith.constant 0 : index
    %c0_22 = arith.constant 0 : index
    %31 = vector.load %arg9[%c0_21, %c0_22] : memref<1x512xf32, #tpu.memory_space<vmem>>, vector<1x512xf32>
    %c0_23 = arith.constant 0 : index
    %c0_24 = arith.constant 0 : index
    %32 = vector.load %arg10[%c0_23, %c0_24] : memref<512x512xbf16, #tpu.memory_space<vmem>>, vector<512x512xbf16>
    %c0_25 = arith.constant 0 : index
    %c0_26 = arith.constant 0 : index
    %33 = vector.load %arg11[%c0_25, %c0_26] : memref<1x512xf32, #tpu.memory_space<vmem>>, vector<1x512xf32>
    %34 = arith.truncf %29 : vector<2x512xf32> to vector<2x512xbf16>
    %cst_27 = arith.constant dense<0.000000e+00> : vector<2x512xf32>
    %35 = tpu.matmul %34, %30, %cst_27 {dimension_numbers = #tpu.dot_dimension_numbers<[1], [0], [0], [1], [0, 0, 1, 1], [], []>} : vector<2x512xbf16>, vector<512x512xbf16>, vector<2x512xf32> -> vector<2x512xf32>
    %36 = vector.broadcast %31 : vector<1x512xf32> to vector<2x512xf32>
    %37 = arith.addf %35, %36 : vector<2x512xf32>
    %cst_28 = arith.constant 0.000000e+00 : f32
    %38 = vector.broadcast %cst_28 : f32 to vector<2x512xf32>
    %39 = arith.cmpf oge, %37, %38 : vector<2x512xf32>
    %cst_29 = arith.constant 0.00999999977 : f32
    %40 = vector.broadcast %cst_29 : f32 to vector<2x512xf32>
    %41 = arith.mulf %40, %37 : vector<2x512xf32>
    %42 = arith.select %39, %37, %41 : vector<2x512xi1>, vector<2x512xf32>
    %43 = arith.truncf %42 : vector<2x512xf32> to vector<2x512xbf16>
    %cst_30 = arith.constant dense<0.000000e+00> : vector<2x512xf32>
    %44 = tpu.matmul %43, %32, %cst_30 {dimension_numbers = #tpu.dot_dimension_numbers<[1], [0], [0], [1], [0, 0, 1, 1], [], []>} : vector<2x512xbf16>, vector<512x512xbf16>, vector<2x512xf32> -> vector<2x512xf32>
    %45 = vector.broadcast %33 : vector<1x512xf32> to vector<2x512xf32>
    %46 = arith.addf %44, %45 : vector<2x512xf32>
    %47 = arith.addf %46, %29 : vector<2x512xf32>
    %cst_31 = arith.constant 0.000000e+00 : f32
    %48 = vector.broadcast %cst_31 : f32 to vector<2x512xf32>
    %49 = arith.cmpf oge, %47, %48 : vector<2x512xf32>
    %cst_32 = arith.constant 0.00999999977 : f32
    %50 = vector.broadcast %cst_32 : f32 to vector<2x512xf32>
    %51 = arith.mulf %50, %47 : vector<2x512xf32>
    %52 = arith.select %49, %47, %51 : vector<2x512xi1>, vector<2x512xf32>
    %c0_33 = arith.constant 0 : index
    %c0_34 = arith.constant 0 : index
    %53 = vector.load %arg12[%c0_33, %c0_34] : memref<512x256xbf16, #tpu.memory_space<vmem>>, vector<512x256xbf16>
    %c0_35 = arith.constant 0 : index
    %c0_36 = arith.constant 0 : index
    %54 = vector.load %arg13[%c0_35, %c0_36] : memref<1x256xf32, #tpu.memory_space<vmem>>, vector<1x256xf32>
    %c0_37 = arith.constant 0 : index
    %c0_38 = arith.constant 0 : index
    %55 = vector.load %arg14[%c0_37, %c0_38] : memref<256x256xbf16, #tpu.memory_space<vmem>>, vector<256x256xbf16>
    %c0_39 = arith.constant 0 : index
    %c0_40 = arith.constant 0 : index
    %56 = vector.load %arg15[%c0_39, %c0_40] : memref<1x256xf32, #tpu.memory_space<vmem>>, vector<1x256xf32>
    %c0_41 = arith.constant 0 : index
    %c0_42 = arith.constant 0 : index
    %57 = vector.load %arg16[%c0_41, %c0_42] : memref<512x256xbf16, #tpu.memory_space<vmem>>, vector<512x256xbf16>
    %c0_43 = arith.constant 0 : index
    %c0_44 = arith.constant 0 : index
    %58 = vector.load %arg17[%c0_43, %c0_44] : memref<1x256xf32, #tpu.memory_space<vmem>>, vector<1x256xf32>
    %59 = arith.truncf %52 : vector<2x512xf32> to vector<2x512xbf16>
    %cst_45 = arith.constant dense<0.000000e+00> : vector<2x256xf32>
    %60 = tpu.matmul %59, %57, %cst_45 {dimension_numbers = #tpu.dot_dimension_numbers<[1], [0], [0], [1], [0, 0, 1, 1], [], []>} : vector<2x512xbf16>, vector<512x256xbf16>, vector<2x256xf32> -> vector<2x256xf32>
    %61 = vector.broadcast %58 : vector<1x256xf32> to vector<2x256xf32>
    %62 = arith.addf %60, %61 : vector<2x256xf32>
    %63 = arith.truncf %52 : vector<2x512xf32> to vector<2x512xbf16>
    %cst_46 = arith.constant dense<0.000000e+00> : vector<2x256xf32>
    %64 = tpu.matmul %63, %53, %cst_46 {dimension_numbers = #tpu.dot_dimension_numbers<[1], [0], [0], [1], [0, 0, 1, 1], [], []>} : vector<2x512xbf16>, vector<512x256xbf16>, vector<2x256xf32> -> vector<2x256xf32>
    %65 = vector.broadcast %54 : vector<1x256xf32> to vector<2x256xf32>
    %66 = arith.addf %64, %65 : vector<2x256xf32>
    %cst_47 = arith.constant 0.000000e+00 : f32
    %67 = vector.broadcast %cst_47 : f32 to vector<2x256xf32>
    %68 = arith.cmpf oge, %66, %67 : vector<2x256xf32>
    %cst_48 = arith.constant 0.00999999977 : f32
    %69 = vector.broadcast %cst_48 : f32 to vector<2x256xf32>
    %70 = arith.mulf %69, %66 : vector<2x256xf32>
    %71 = arith.select %68, %66, %70 : vector<2x256xi1>, vector<2x256xf32>
    %72 = arith.truncf %71 : vector<2x256xf32> to vector<2x256xbf16>
    %cst_49 = arith.constant dense<0.000000e+00> : vector<2x256xf32>
    %73 = tpu.matmul %72, %55, %cst_49 {dimension_numbers = #tpu.dot_dimension_numbers<[1], [0], [0], [1], [0, 0, 1, 1], [], []>} : vector<2x256xbf16>, vector<256x256xbf16>, vector<2x256xf32> -> vector<2x256xf32>
    %74 = vector.broadcast %56 : vector<1x256xf32> to vector<2x256xf32>
    %75 = arith.addf %73, %74 : vector<2x256xf32>
    %76 = arith.addf %75, %62 : vector<2x256xf32>
    %cst_50 = arith.constant 0.000000e+00 : f32
    %77 = vector.broadcast %cst_50 : f32 to vector<2x256xf32>
    %78 = arith.cmpf oge, %76, %77 : vector<2x256xf32>
    %cst_51 = arith.constant 0.00999999977 : f32
    %79 = vector.broadcast %cst_51 : f32 to vector<2x256xf32>
    %80 = arith.mulf %79, %76 : vector<2x256xf32>
    %81 = arith.select %78, %76, %80 : vector<2x256xi1>, vector<2x256xf32>
    %c0_52 = arith.constant 0 : index
    %c0_53 = arith.constant 0 : index
    %82 = vector.load %arg18[%c0_52, %c0_53] : memref<256x256xbf16, #tpu.memory_space<vmem>>, vector<256x256xbf16>
    %c0_54 = arith.constant 0 : index
    %c0_55 = arith.constant 0 : index
    %83 = vector.load %arg19[%c0_54, %c0_55] : memref<1x256xf32, #tpu.memory_space<vmem>>, vector<1x256xf32>
    %c0_56 = arith.constant 0 : index
    %c0_57 = arith.constant 0 : index
    %84 = vector.load %arg20[%c0_56, %c0_57] : memref<256x256xbf16, #tpu.memory_space<vmem>>, vector<256x256xbf16>
    %c0_58 = arith.constant 0 : index
    %c0_59 = arith.constant 0 : index
    %85 = vector.load %arg21[%c0_58, %c0_59] : memref<1x256xf32, #tpu.memory_space<vmem>>, vector<1x256xf32>
    %86 = arith.truncf %81 : vector<2x256xf32> to vector<2x256xbf16>
    %cst_60 = arith.constant dense<0.000000e+00> : vector<2x256xf32>
    %87 = tpu.matmul %86, %82, %cst_60 {dimension_numbers = #tpu.dot_dimension_numbers<[1], [0], [0], [1], [0, 0, 1, 1], [], []>} : vector<2x256xbf16>, vector<256x256xbf16>, vector<2x256xf32> -> vector<2x256xf32>
    %88 = vector.broadcast %83 : vector<1x256xf32> to vector<2x256xf32>
    %89 = arith.addf %87, %88 : vector<2x256xf32>
    %cst_61 = arith.constant 0.000000e+00 : f32
    %90 = vector.broadcast %cst_61 : f32 to vector<2x256xf32>
    %91 = arith.cmpf oge, %89, %90 : vector<2x256xf32>
    %cst_62 = arith.constant 0.00999999977 : f32
    %92 = vector.broadcast %cst_62 : f32 to vector<2x256xf32>
    %93 = arith.mulf %92, %89 : vector<2x256xf32>
    %94 = arith.select %91, %89, %93 : vector<2x256xi1>, vector<2x256xf32>
    %95 = arith.truncf %94 : vector<2x256xf32> to vector<2x256xbf16>
    %cst_63 = arith.constant dense<0.000000e+00> : vector<2x256xf32>
    %96 = tpu.matmul %95, %84, %cst_63 {dimension_numbers = #tpu.dot_dimension_numbers<[1], [0], [0], [1], [0, 0, 1, 1], [], []>} : vector<2x256xbf16>, vector<256x256xbf16>, vector<2x256xf32> -> vector<2x256xf32>
    %97 = vector.broadcast %85 : vector<1x256xf32> to vector<2x256xf32>
    %98 = arith.addf %96, %97 : vector<2x256xf32>
    %99 = arith.addf %98, %81 : vector<2x256xf32>
    %cst_64 = arith.constant 0.000000e+00 : f32
    %100 = vector.broadcast %cst_64 : f32 to vector<2x256xf32>
    %101 = arith.cmpf oge, %99, %100 : vector<2x256xf32>
    %cst_65 = arith.constant 0.00999999977 : f32
    %102 = vector.broadcast %cst_65 : f32 to vector<2x256xf32>
    %103 = arith.mulf %102, %99 : vector<2x256xf32>
    %104 = arith.select %101, %99, %103 : vector<2x256xi1>, vector<2x256xf32>
    %c0_66 = arith.constant 0 : index
    %c0_67 = arith.constant 0 : index
    %105 = vector.load %arg22[%c0_66, %c0_67] : memref<256x16xf32, #tpu.memory_space<vmem>>, vector<256x16xf32>
    %c0_68 = arith.constant 0 : index
    %c0_69 = arith.constant 0 : index
    %106 = vector.load %arg23[%c0_68, %c0_69] : memref<1x16xf32, #tpu.memory_space<vmem>>, vector<1x16xf32>
    %c0_70 = arith.constant 0 : index
    %c0_71 = arith.constant 0 : index
    %107 = vector.load %arg24[%c0_70, %c0_71] : memref<16x16xf32, #tpu.memory_space<vmem>>, vector<16x16xf32>
    %c0_72 = arith.constant 0 : index
    %c0_73 = arith.constant 0 : index
    %108 = vector.load %arg25[%c0_72, %c0_73] : memref<1x16xf32, #tpu.memory_space<vmem>>, vector<1x16xf32>
    %cst_74 = arith.constant dense<0.000000e+00> : vector<2x16xf32>
    %109 = tpu.matmul %104, %105, %cst_74 {dimension_numbers = #tpu.dot_dimension_numbers<[1], [0], [0], [1], [0, 0, 1, 1], [], []>} : vector<2x256xf32>, vector<256x16xf32>, vector<2x16xf32> -> vector<2x16xf32>
    %110 = vector.broadcast %106 : vector<1x16xf32> to vector<2x16xf32>
    %111 = arith.addf %109, %110 : vector<2x16xf32>
    %cst_75 = arith.constant 0.000000e+00 : f32
    %112 = vector.broadcast %cst_75 : f32 to vector<2x16xf32>
    %113 = arith.cmpf oge, %111, %112 : vector<2x16xf32>
    %cst_76 = arith.constant 0.00999999977 : f32
    %114 = vector.broadcast %cst_76 : f32 to vector<2x16xf32>
    %115 = arith.mulf %114, %111 : vector<2x16xf32>
    %116 = arith.select %113, %111, %115 : vector<2x16xi1>, vector<2x16xf32>
    %cst_77 = arith.constant dense<0.000000e+00> : vector<2x16xf32>
    %117 = tpu.matmul %116, %107, %cst_77 {dimension_numbers = #tpu.dot_dimension_numbers<[1], [0], [0], [1], [0, 0, 1, 1], [], []>} : vector<2x16xf32>, vector<16x16xf32>, vector<2x16xf32> -> vector<2x16xf32>
    %118 = vector.broadcast %108 : vector<1x16xf32> to vector<2x16xf32>
    %119 = arith.addf %117, %118 : vector<2x16xf32>
    %c0_78 = arith.constant 0 : index
    %c0_79 = arith.constant 0 : index
    %120 = vector.load %arg26[%c0_78, %c0_79] : memref<2x16xf32, #tpu.memory_space<vmem>>, vector<2x16xf32>
    tpu.vector_store %arg26[%c0_78, %c0_79], %119 {strides = array<i32>} : memref<2x16xf32, #tpu.memory_space<vmem>>, vector<2x16xf32>,
    return
  }
  func.func @transform_0(%arg0: i32) -> (i32, i32) {
    %c0_i32 = arith.constant 0 : i32
    %c0_i32_0 = arith.constant 0 : i32
    %c0_i32_1 = arith.constant 0 : i32
    return %c0_i32, %c0_i32_0 : i32, i32
  }
  func.func @transform_1(%arg0: i32) -> (i32, i32) {
    %c0_i32 = arith.constant 0 : i32
    %c0_i32_0 = arith.constant 0 : i32
    %c0_i32_1 = arith.constant 0 : i32
    return %c0_i32, %c0_i32_0 : i32, i32
  }
  func.func @transform_2(%arg0: i32) -> (i32, i32) {
    %c0_i32 = arith.constant 0 : i32
    %c0_i32_0 = arith.constant 0 : i32
    %c0_i32_1 = arith.constant 0 : i32
    return %c0_i32, %c0_i32_0 : i32, i32
  }
  func.func @transform_3(%arg0: i32) -> (i32, i32) {
    %c0_i32 = arith.constant 0 : i32
    %c0_i32_0 = arith.constant 0 : i32
    %c0_i32_1 = arith.constant 0 : i32
    return %c0_i32, %c0_i32_0 : i32, i32
  }
  func.func @transform_4(%arg0: i32) -> (i32, i32) {
    %c0_i32 = arith.constant 0 : i32
    %c0_i32_0 = arith.constant 0 : i32
    %c0_i32_1 = arith.constant 0 : i32
    return %c0_i32, %c0_i32_0 : i32, i32
  }
  func.func @transform_5(%arg0: i32) -> (i32, i32) {
    %c0_i32 = arith.constant 0 : i32
    %c0_i32_0 = arith.constant 0 : i32
    %c0_i32_1 = arith.constant 0 : i32
    return %c0_i32, %c0_i32_0 : i32, i32
  }
  func.func @transform_6(%arg0: i32) -> (i32, i32) {
    %c0_i32 = arith.constant 0 : i32
    %c0_i32_0 = arith.constant 0 : i32
    %c0_i32_1 = arith.constant 0 : i32
    return %c0_i32, %c0_i32_0 : i32, i32
  }
  func.func @transform_7(%arg0: i32) -> (i32, i32) {
    %c0_i32 = arith.constant 0 : i32
    %c0_i32_0 = arith.constant 0 : i32
    %c0_i32_1 = arith.constant 0 : i32
    return %c0_i32, %c0_i32_0 : i32, i32
  }
  func.func @transform_8(%arg0: i32) -> (i32, i32) {
    %c0_i32 = arith.constant 0 : i32
    %c0_i32_0 = arith.constant 0 : i32
    %c0_i32_1 = arith.constant 0 : i32
    return %c0_i32, %c0_i32_0 : i32, i32
  }
  func.func @transform_9(%arg0: i32) -> (i32, i32) {
    %c0_i32 = arith.constant 0 : i32
    %c0_i32_0 = arith.constant 0 : i32
    %c0_i32_1 = arith.constant 0 : i32
    return %c0_i32, %c0_i32_0 : i32, i32
  }
  func.func @transform_10(%arg0: i32) -> (i32, i32) {
    %c0_i32 = arith.constant 0 : i32
    %c0_i32_0 = arith.constant 0 : i32
    %c0_i32_1 = arith.constant 0 : i32
    return %c0_i32, %c0_i32_0 : i32, i32
  }
  func.func @transform_11(%arg0: i32) -> (i32, i32) {
    %c0_i32 = arith.constant 0 : i32
    %c0_i32_0 = arith.constant 0 : i32
    %c0_i32_1 = arith.constant 0 : i32
    return %c0_i32, %c0_i32_0 : i32, i32
  }
  func.func @transform_12(%arg0: i32) -> (i32, i32) {
    %c0_i32 = arith.constant 0 : i32
    %c0_i32_0 = arith.constant 0 : i32
    %c0_i32_1 = arith.constant 0 : i32
    return %c0_i32, %c0_i32_0 : i32, i32
  }
  func.func @transform_13(%arg0: i32) -> (i32, i32) {
    %c0_i32 = arith.constant 0 : i32
    %c0_i32_0 = arith.constant 0 : i32
    %c0_i32_1 = arith.constant 0 : i32
    return %c0_i32, %c0_i32_0 : i32, i32
  }
  func.func @transform_14(%arg0: i32) -> (i32, i32) {
    %c0_i32 = arith.constant 0 : i32
    %c0_i32_0 = arith.constant 0 : i32
    %c0_i32_1 = arith.constant 0 : i32
    return %c0_i32, %c0_i32_0 : i32, i32
  }
  func.func @transform_15(%arg0: i32) -> (i32, i32) {
    %c0_i32 = arith.constant 0 : i32
    %c0_i32_0 = arith.constant 0 : i32
    %c0_i32_1 = arith.constant 0 : i32
    return %c0_i32, %c0_i32_0 : i32, i32
  }
  func.func @transform_16(%arg0: i32) -> (i32, i32) {
    %c0_i32 = arith.constant 0 : i32
    %c0_i32_0 = arith.constant 0 : i32
    %c0_i32_1 = arith.constant 0 : i32
    return %c0_i32, %c0_i32_0 : i32, i32
  }
  func.func @transform_17(%arg0: i32) -> (i32, i32) {
    %c0_i32 = arith.constant 0 : i32
    %c0_i32_0 = arith.constant 0 : i32
    %c0_i32_1 = arith.constant 0 : i32
    return %c0_i32, %c0_i32_0 : i32, i32
  }
  func.func @transform_18(%arg0: i32) -> (i32, i32) {
    %c0_i32 = arith.constant 0 : i32
    %c0_i32_0 = arith.constant 0 : i32
    %c0_i32_1 = arith.constant 0 : i32
    return %c0_i32, %c0_i32_0 : i32, i32
  }
  func.func @transform_19(%arg0: i32) -> (i32, i32) {
    %c0_i32 = arith.constant 0 : i32
    %c0_i32_0 = arith.constant 0 : i32
    %c0_i32_1 = arith.constant 0 : i32
    return %c0_i32, %c0_i32_0 : i32, i32
  }
  func.func @transform_20(%arg0: i32) -> (i32, i32) {
    %c0_i32 = arith.constant 0 : i32
    %c0_i32_0 = arith.constant 0 : i32
    %c0_i32_1 = arith.constant 0 : i32
    return %c0_i32, %c0_i32_0 : i32, i32
  }
  func.func @transform_21(%arg0: i32) -> (i32, i32) {
    %c0_i32 = arith.constant 0 : i32
    %c0_i32_0 = arith.constant 0 : i32
    %c0_i32_1 = arith.constant 0 : i32
    return %c0_i32, %c0_i32_0 : i32, i32
  }
  func.func @transform_22(%arg0: i32) -> (i32, i32) {
    %c0_i32 = arith.constant 0 : i32
    %c0_i32_0 = arith.constant 0 : i32
    %c0_i32_1 = arith.constant 0 : i32
    return %c0_i32, %c0_i32_0 : i32, i32
  }
  func.func @transform_23(%arg0: i32) -> (i32, i32) {
    %c0_i32 = arith.constant 0 : i32
    %c0_i32_0 = arith.constant 0 : i32
    %c0_i32_1 = arith.constant 0 : i32
    return %c0_i32, %c0_i32_0 : i32, i32
  }
  func.func @transform_24(%arg0: i32) -> (i32, i32) {
    %c0_i32 = arith.constant 0 : i32
    %c0_i32_0 = arith.constant 0 : i32
    %c0_i32_1 = arith.constant 0 : i32
    return %c0_i32, %c0_i32_0 : i32, i32
  }
  func.func @transform_25(%arg0: i32) -> (i32, i32) {
    %c0_i32 = arith.constant 0 : i32
    %c0_i32_0 = arith.constant 0 : i32
    %c0_i32_1 = arith.constant 0 : i32
    return %c0_i32, %c0_i32_0 : i32, i32
  }
}

module attributes {stable_mosaic.version = 11 : i64} {
  func.func @_decoder_kernel(%arg0: i32, %arg1: memref<2x16xf32, #tpu.memory_space<vmem>>, %arg2: memref<2x8xf32, #tpu.memory_space<vmem>>, %arg3: memref<8x32xf32, #tpu.memory_space<vmem>>, %arg4: memref<1x32xf32, #tpu.memory_space<vmem>>, %arg5: memref<32x32xf32, #tpu.memory_space<vmem>>, %arg6: memref<8x32xf32, #tpu.memory_space<vmem>>, %arg7: memref<1x32xf32, #tpu.memory_space<vmem>>, %arg8: memref<1x32xf32, #tpu.memory_space<vmem>>, %arg9: memref<1x8xf32, #tpu.memory_space<vmem>>, %arg10: memref<256x32xf32, #tpu.memory_space<vmem>>, %arg11: memref<1x32xf32, #tpu.memory_space<vmem>>, %arg12: memref<32x32xf32, #tpu.memory_space<vmem>>, %arg13: memref<256x32xf32, #tpu.memory_space<vmem>>, %arg14: memref<1x32xf32, #tpu.memory_space<vmem>>, %arg15: memref<1x32xf32, #tpu.memory_space<vmem>>, %arg16: memref<1x256xf32, #tpu.memory_space<vmem>>, %arg17: memref<2x256xf32, #tpu.memory_space<vmem>>) attributes {dimension_semantics = [#tpu.dimension_semantics<arbitrary>], iteration_bounds = array<i64: 1>, scalar_prefetch = 0 : i64, scratch_operands = 0 : i64, tpu.core_type = #tpu.core_type<tc>, window_params = [{pipeline_mode = #tpu.pipeline_mode<synchronous>, transform_indices = @transform_0, window_bounds = array<i64: 2, 16>}, {pipeline_mode = #tpu.pipeline_mode<synchronous>, transform_indices = @transform_1, window_bounds = array<i64: 2, 8>}, {pipeline_mode = #tpu.pipeline_mode<synchronous>, transform_indices = @transform_2, window_bounds = array<i64: 8, 32>}, {pipeline_mode = #tpu.pipeline_mode<synchronous>, transform_indices = @transform_3, window_bounds = array<i64: 1, 32>}, {pipeline_mode = #tpu.pipeline_mode<synchronous>, transform_indices = @transform_4, window_bounds = array<i64: 32, 32>}, {pipeline_mode = #tpu.pipeline_mode<synchronous>, transform_indices = @transform_5, window_bounds = array<i64: 8, 32>}, {pipeline_mode = #tpu.pipeline_mode<synchronous>, transform_indices = @transform_6, window_bounds = array<i64: 1, 32>}, {pipeline_mode = #tpu.pipeline_mode<synchronous>, transform_indices = @transform_7, window_bounds = array<i64: 1, 32>}, {pipeline_mode = #tpu.pipeline_mode<synchronous>, transform_indices = @transform_8, window_bounds = array<i64: 1, 8>}, {pipeline_mode = #tpu.pipeline_mode<synchronous>, transform_indices = @transform_9, window_bounds = array<i64: 256, 32>}, {pipeline_mode = #tpu.pipeline_mode<synchronous>, transform_indices = @transform_10, window_bounds = array<i64: 1, 32>}, {pipeline_mode = #tpu.pipeline_mode<synchronous>, transform_indices = @transform_11, window_bounds = array<i64: 32, 32>}, {pipeline_mode = #tpu.pipeline_mode<synchronous>, transform_indices = @transform_12, window_bounds = array<i64: 256, 32>}, {pipeline_mode = #tpu.pipeline_mode<synchronous>, transform_indices = @transform_13, window_bounds = array<i64: 1, 32>}, {pipeline_mode = #tpu.pipeline_mode<synchronous>, transform_indices = @transform_14, window_bounds = array<i64: 1, 32>}, {pipeline_mode = #tpu.pipeline_mode<synchronous>, transform_indices = @transform_15, window_bounds = array<i64: 1, 256>}, {pipeline_mode = #tpu.pipeline_mode<synchronous>, transform_indices = @transform_16, window_bounds = array<i64: 2, 256>}]} {
    %c0 = arith.constant 0 : index
    %c0_0 = arith.constant 0 : index
    %0 = vector.load %arg1[%c0, %c0_0] : memref<2x16xf32, #tpu.memory_space<vmem>>, vector<2x16xf32>
    %1 = vector.extract_strided_slice %0 {offsets = [0, 0], sizes = [2, 8], strides = [1, 1]} : vector<2x16xf32> to vector<2x8xf32>
    %2 = vector.extract_strided_slice %0 {offsets = [0, 8], sizes = [2, 8], strides = [1, 1]} : vector<2x16xf32> to vector<2x8xf32>
    %c0_1 = arith.constant 0 : index
    %c0_2 = arith.constant 0 : index
    %3 = vector.load %arg2[%c0_1, %c0_2] : memref<2x8xf32, #tpu.memory_space<vmem>>, vector<2x8xf32>
    %cst = arith.constant 5.000000e-01 : f32
    %4 = vector.broadcast %cst : f32 to vector<2x8xf32>
    %5 = arith.mulf %4, %2 : vector<2x8xf32>
    %6 = math.exp %5 : vector<2x8xf32>
    %7 = arith.mulf %3, %6 : vector<2x8xf32>
    %8 = arith.addf %1, %7 : vector<2x8xf32>
    %c0_3 = arith.constant 0 : index
    %c0_4 = arith.constant 0 : index
    %9 = vector.load %arg3[%c0_3, %c0_4] : memref<8x32xf32, #tpu.memory_space<vmem>>, vector<8x32xf32>
    %c0_5 = arith.constant 0 : index
    %c0_6 = arith.constant 0 : index
    %10 = vector.load %arg4[%c0_5, %c0_6] : memref<1x32xf32, #tpu.memory_space<vmem>>, vector<1x32xf32>
    %c0_7 = arith.constant 0 : index
    %c0_8 = arith.constant 0 : index
    %11 = vector.load %arg5[%c0_7, %c0_8] : memref<32x32xf32, #tpu.memory_space<vmem>>, vector<32x32xf32>
    %c0_9 = arith.constant 0 : index
    %c0_10 = arith.constant 0 : index
    %12 = vector.load %arg6[%c0_9, %c0_10] : memref<8x32xf32, #tpu.memory_space<vmem>>, vector<8x32xf32>
    %c0_11 = arith.constant 0 : index
    %c0_12 = arith.constant 0 : index
    %13 = vector.load %arg7[%c0_11, %c0_12] : memref<1x32xf32, #tpu.memory_space<vmem>>, vector<1x32xf32>
    %c0_13 = arith.constant 0 : index
    %c0_14 = arith.constant 0 : index
    %14 = vector.load %arg8[%c0_13, %c0_14] : memref<1x32xf32, #tpu.memory_space<vmem>>, vector<1x32xf32>
    %c0_15 = arith.constant 0 : index
    %c0_16 = arith.constant 0 : index
    %15 = vector.load %arg9[%c0_15, %c0_16] : memref<1x8xf32, #tpu.memory_space<vmem>>, vector<1x8xf32>
    %cst_17 = arith.constant dense<0.000000e+00> : vector<2x32xf32>
    %16 = tpu.matmul %8, %9, %cst_17 {dimension_numbers = #tpu.dot_dimension_numbers<[1], [0], [0], [1], [0, 0, 1, 1], [], []>} : vector<2x8xf32>, vector<8x32xf32>, vector<2x32xf32> -> vector<2x32xf32>
    %17 = vector.broadcast %10 : vector<1x32xf32> to vector<2x32xf32>
    %18 = arith.addf %16, %17 : vector<2x32xf32>
    %cst_18 = arith.constant 0.000000e+00 : f32
    %19 = vector.broadcast %cst_18 : f32 to vector<2x32xf32>
    %20 = arith.subf %19, %18 : vector<2x32xf32>
    %21 = math.exp %20 : vector<2x32xf32>
    %cst_19 = arith.constant 1.000000e+00 : f32
    %22 = vector.broadcast %cst_19 : f32 to vector<2x32xf32>
    %23 = arith.addf %22, %21 : vector<2x32xf32>
    %cst_20 = arith.constant 1.000000e+00 : f32
    %24 = vector.broadcast %cst_20 : f32 to vector<2x32xf32>
    %25 = arith.divf %24, %23 : vector<2x32xf32>
    %cst_21 = arith.constant 0.000000e+00 : f32
    %26 = vector.broadcast %cst_21 : f32 to vector<2x32xf32>
    %27 = arith.maximumf %18, %26 : vector<2x32xf32>
    %28 = math.absf %18 : vector<2x32xf32>
    %cst_22 = arith.constant 0.000000e+00 : f32
    %29 = vector.broadcast %cst_22 : f32 to vector<2x32xf32>
    %30 = arith.subf %29, %28 : vector<2x32xf32>
    %31 = math.exp %30 : vector<2x32xf32>
    %32 = math.log1p %31 : vector<2x32xf32>
    %33 = arith.addf %27, %32 : vector<2x32xf32>
    %cst_23 = arith.constant dense<0.000000e+00> : vector<2x32xf32>
    %34 = tpu.matmul %33, %11, %cst_23 {dimension_numbers = #tpu.dot_dimension_numbers<[1], [0], [0], [1], [0, 0, 1, 1], [], []>} : vector<2x32xf32>, vector<32x32xf32>, vector<2x32xf32> -> vector<2x32xf32>
    %cst_24 = arith.constant dense<0.000000e+00> : vector<2x32xf32>
    %35 = tpu.matmul %8, %12, %cst_24 {dimension_numbers = #tpu.dot_dimension_numbers<[1], [0], [0], [1], [0, 0, 1, 1], [], []>} : vector<2x8xf32>, vector<8x32xf32>, vector<2x32xf32> -> vector<2x32xf32>
    %36 = arith.addf %34, %35 : vector<2x32xf32>
    %37 = vector.broadcast %13 : vector<1x32xf32> to vector<2x32xf32>
    %38 = arith.addf %36, %37 : vector<2x32xf32>
    %cst_25 = arith.constant 0.000000e+00 : f32
    %39 = vector.broadcast %cst_25 : f32 to vector<2x32xf32>
    %40 = arith.subf %39, %38 : vector<2x32xf32>
    %41 = math.exp %40 : vector<2x32xf32>
    %cst_26 = arith.constant 1.000000e+00 : f32
    %42 = vector.broadcast %cst_26 : f32 to vector<2x32xf32>
    %43 = arith.addf %42, %41 : vector<2x32xf32>
    %cst_27 = arith.constant 1.000000e+00 : f32
    %44 = vector.broadcast %cst_27 : f32 to vector<2x32xf32>
    %45 = arith.divf %44, %43 : vector<2x32xf32>
    %46 = vector.broadcast %14 : vector<1x32xf32> to vector<2x32xf32>
    %47 = arith.mulf %45, %46 : vector<2x32xf32>
    %cst_28 = arith.constant dense<0.000000e+00> : vector<2x32xf32>
    %48 = tpu.matmul %47, %11, %cst_28 {dimension_numbers = #tpu.dot_dimension_numbers<[1], [1], [0], [0], [0, 0, 1, 0], [], []>} : vector<2x32xf32>, vector<32x32xf32>, vector<2x32xf32> -> vector<2x32xf32>
    %49 = arith.mulf %48, %25 : vector<2x32xf32>
    %cst_29 = arith.constant dense<0.000000e+00> : vector<2x8xf32>
    %50 = tpu.matmul %47, %12, %cst_29 {dimension_numbers = #tpu.dot_dimension_numbers<[1], [1], [0], [0], [0, 0, 1, 0], [], []>} : vector<2x32xf32>, vector<8x32xf32>, vector<2x8xf32> -> vector<2x8xf32>
    %51 = vector.broadcast %15 : vector<1x8xf32> to vector<2x8xf32>
    %52 = arith.addf %51, %50 : vector<2x8xf32>
    %cst_30 = arith.constant dense<0.000000e+00> : vector<2x8xf32>
    %53 = tpu.matmul %49, %9, %cst_30 {dimension_numbers = #tpu.dot_dimension_numbers<[1], [1], [0], [0], [0, 0, 1, 0], [], []>} : vector<2x32xf32>, vector<8x32xf32>, vector<2x8xf32> -> vector<2x8xf32>
    %54 = arith.addf %52, %53 : vector<2x8xf32>
    %c0_31 = arith.constant 0 : index
    %c0_32 = arith.constant 0 : index
    %55 = vector.load %arg10[%c0_31, %c0_32] : memref<256x32xf32, #tpu.memory_space<vmem>>, vector<256x32xf32>
    %c0_33 = arith.constant 0 : index
    %c0_34 = arith.constant 0 : index
    %56 = vector.load %arg11[%c0_33, %c0_34] : memref<1x32xf32, #tpu.memory_space<vmem>>, vector<1x32xf32>
    %c0_35 = arith.constant 0 : index
    %c0_36 = arith.constant 0 : index
    %57 = vector.load %arg12[%c0_35, %c0_36] : memref<32x32xf32, #tpu.memory_space<vmem>>, vector<32x32xf32>
    %c0_37 = arith.constant 0 : index
    %c0_38 = arith.constant 0 : index
    %58 = vector.load %arg13[%c0_37, %c0_38] : memref<256x32xf32, #tpu.memory_space<vmem>>, vector<256x32xf32>
    %c0_39 = arith.constant 0 : index
    %c0_40 = arith.constant 0 : index
    %59 = vector.load %arg14[%c0_39, %c0_40] : memref<1x32xf32, #tpu.memory_space<vmem>>, vector<1x32xf32>
    %c0_41 = arith.constant 0 : index
    %c0_42 = arith.constant 0 : index
    %60 = vector.load %arg15[%c0_41, %c0_42] : memref<1x32xf32, #tpu.memory_space<vmem>>, vector<1x32xf32>
    %c0_43 = arith.constant 0 : index
    %c0_44 = arith.constant 0 : index
    %61 = vector.load %arg16[%c0_43, %c0_44] : memref<1x256xf32, #tpu.memory_space<vmem>>, vector<1x256xf32>
    %62 = vector.extract_strided_slice %55 {offsets = [0, 0], sizes = [8, 32], strides = [1, 1]} : vector<256x32xf32> to vector<8x32xf32>
    %63 = vector.extract_strided_slice %58 {offsets = [0, 0], sizes = [8, 32], strides = [1, 1]} : vector<256x32xf32> to vector<8x32xf32>
    %cst_45 = arith.constant dense<0.000000e+00> : vector<2x32xf32>
    %64 = tpu.matmul %54, %62, %cst_45 {dimension_numbers = #tpu.dot_dimension_numbers<[1], [0], [0], [1], [0, 0, 1, 1], [], []>} : vector<2x8xf32>, vector<8x32xf32>, vector<2x32xf32> -> vector<2x32xf32>
    %65 = vector.broadcast %56 : vector<1x32xf32> to vector<2x32xf32>
    %66 = arith.addf %64, %65 : vector<2x32xf32>
    %cst_46 = arith.constant 0.000000e+00 : f32
    %67 = vector.broadcast %cst_46 : f32 to vector<2x32xf32>
    %68 = arith.subf %67, %66 : vector<2x32xf32>
    %69 = math.exp %68 : vector<2x32xf32>
    %cst_47 = arith.constant 1.000000e+00 : f32
    %70 = vector.broadcast %cst_47 : f32 to vector<2x32xf32>
    %71 = arith.addf %70, %69 : vector<2x32xf32>
    %cst_48 = arith.constant 1.000000e+00 : f32
    %72 = vector.broadcast %cst_48 : f32 to vector<2x32xf32>
    %73 = arith.divf %72, %71 : vector<2x32xf32>
    %cst_49 = arith.constant 0.000000e+00 : f32
    %74 = vector.broadcast %cst_49 : f32 to vector<2x32xf32>
    %75 = arith.maximumf %66, %74 : vector<2x32xf32>
    %76 = math.absf %66 : vector<2x32xf32>
    %cst_50 = arith.constant 0.000000e+00 : f32
    %77 = vector.broadcast %cst_50 : f32 to vector<2x32xf32>
    %78 = arith.subf %77, %76 : vector<2x32xf32>
    %79 = math.exp %78 : vector<2x32xf32>
    %80 = math.log1p %79 : vector<2x32xf32>
    %81 = arith.addf %75, %80 : vector<2x32xf32>
    %cst_51 = arith.constant dense<0.000000e+00> : vector<2x32xf32>
    %82 = tpu.matmul %81, %57, %cst_51 {dimension_numbers = #tpu.dot_dimension_numbers<[1], [0], [0], [1], [0, 0, 1, 1], [], []>} : vector<2x32xf32>, vector<32x32xf32>, vector<2x32xf32> -> vector<2x32xf32>
    %cst_52 = arith.constant dense<0.000000e+00> : vector<2x32xf32>
    %83 = tpu.matmul %54, %63, %cst_52 {dimension_numbers = #tpu.dot_dimension_numbers<[1], [0], [0], [1], [0, 0, 1, 1], [], []>} : vector<2x8xf32>, vector<8x32xf32>, vector<2x32xf32> -> vector<2x32xf32>
    %84 = arith.addf %82, %83 : vector<2x32xf32>
    %85 = vector.broadcast %59 : vector<1x32xf32> to vector<2x32xf32>
    %86 = arith.addf %84, %85 : vector<2x32xf32>
    %cst_53 = arith.constant 0.000000e+00 : f32
    %87 = vector.broadcast %cst_53 : f32 to vector<2x32xf32>
    %88 = arith.subf %87, %86 : vector<2x32xf32>
    %89 = math.exp %88 : vector<2x32xf32>
    %cst_54 = arith.constant 1.000000e+00 : f32
    %90 = vector.broadcast %cst_54 : f32 to vector<2x32xf32>
    %91 = arith.addf %90, %89 : vector<2x32xf32>
    %cst_55 = arith.constant 1.000000e+00 : f32
    %92 = vector.broadcast %cst_55 : f32 to vector<2x32xf32>
    %93 = arith.divf %92, %91 : vector<2x32xf32>
    %94 = vector.broadcast %60 : vector<1x32xf32> to vector<2x32xf32>
    %95 = arith.mulf %93, %94 : vector<2x32xf32>
    %cst_56 = arith.constant dense<0.000000e+00> : vector<2x32xf32>
    %96 = tpu.matmul %95, %57, %cst_56 {dimension_numbers = #tpu.dot_dimension_numbers<[1], [1], [0], [0], [0, 0, 1, 0], [], []>} : vector<2x32xf32>, vector<32x32xf32>, vector<2x32xf32> -> vector<2x32xf32>
    %97 = arith.mulf %96, %73 : vector<2x32xf32>
    %cst_57 = arith.constant dense<0.000000e+00> : vector<2x256xf32>
    %98 = tpu.matmul %95, %58, %cst_57 {dimension_numbers = #tpu.dot_dimension_numbers<[1], [1], [0], [0], [0, 0, 1, 0], [], []>} : vector<2x32xf32>, vector<256x32xf32>, vector<2x256xf32> -> vector<2x256xf32>
    %99 = vector.broadcast %61 : vector<1x256xf32> to vector<2x256xf32>
    %100 = arith.addf %99, %98 : vector<2x256xf32>
    %cst_58 = arith.constant dense<0.000000e+00> : vector<2x256xf32>
    %101 = tpu.matmul %97, %55, %cst_58 {dimension_numbers = #tpu.dot_dimension_numbers<[1], [1], [0], [0], [0, 0, 1, 0], [], []>} : vector<2x32xf32>, vector<256x32xf32>, vector<2x256xf32> -> vector<2x256xf32>
    %102 = arith.addf %100, %101 : vector<2x256xf32>
    %c0_59 = arith.constant 0 : index
    %c0_60 = arith.constant 0 : index
    %103 = vector.load %arg17[%c0_59, %c0_60] : memref<2x256xf32, #tpu.memory_space<vmem>>, vector<2x256xf32>
    tpu.vector_store %arg17[%c0_59, %c0_60], %102 {strides = array<i32>} : memref<2x256xf32, #tpu.memory_space<vmem>>, vector<2x256xf32>,
    return
  }
  func.func @transform_0(%arg0: i32) -> (i32, i32) {
    %c0_i32 = arith.constant 0 : i32
    %c0_i32_0 = arith.constant 0 : i32
    %c0_i32_1 = arith.constant 0 : i32
    return %c0_i32, %c0_i32_0 : i32, i32
  }
  func.func @transform_1(%arg0: i32) -> (i32, i32) {
    %c0_i32 = arith.constant 0 : i32
    %c0_i32_0 = arith.constant 0 : i32
    %c0_i32_1 = arith.constant 0 : i32
    return %c0_i32, %c0_i32_0 : i32, i32
  }
  func.func @transform_2(%arg0: i32) -> (i32, i32) {
    %c0_i32 = arith.constant 0 : i32
    %c0_i32_0 = arith.constant 0 : i32
    %c0_i32_1 = arith.constant 0 : i32
    return %c0_i32, %c0_i32_0 : i32, i32
  }
  func.func @transform_3(%arg0: i32) -> (i32, i32) {
    %c0_i32 = arith.constant 0 : i32
    %c0_i32_0 = arith.constant 0 : i32
    %c0_i32_1 = arith.constant 0 : i32
    return %c0_i32, %c0_i32_0 : i32, i32
  }
  func.func @transform_4(%arg0: i32) -> (i32, i32) {
    %c0_i32 = arith.constant 0 : i32
    %c0_i32_0 = arith.constant 0 : i32
    %c0_i32_1 = arith.constant 0 : i32
    return %c0_i32, %c0_i32_0 : i32, i32
  }
  func.func @transform_5(%arg0: i32) -> (i32, i32) {
    %c0_i32 = arith.constant 0 : i32
    %c0_i32_0 = arith.constant 0 : i32
    %c0_i32_1 = arith.constant 0 : i32
    return %c0_i32, %c0_i32_0 : i32, i32
  }
  func.func @transform_6(%arg0: i32) -> (i32, i32) {
    %c0_i32 = arith.constant 0 : i32
    %c0_i32_0 = arith.constant 0 : i32
    %c0_i32_1 = arith.constant 0 : i32
    return %c0_i32, %c0_i32_0 : i32, i32
  }
  func.func @transform_7(%arg0: i32) -> (i32, i32) {
    %c0_i32 = arith.constant 0 : i32
    %c0_i32_0 = arith.constant 0 : i32
    %c0_i32_1 = arith.constant 0 : i32
    return %c0_i32, %c0_i32_0 : i32, i32
  }
  func.func @transform_8(%arg0: i32) -> (i32, i32) {
    %c0_i32 = arith.constant 0 : i32
    %c0_i32_0 = arith.constant 0 : i32
    %c0_i32_1 = arith.constant 0 : i32
    return %c0_i32, %c0_i32_0 : i32, i32
  }
  func.func @transform_9(%arg0: i32) -> (i32, i32) {
    %c0_i32 = arith.constant 0 : i32
    %c0_i32_0 = arith.constant 0 : i32
    %c0_i32_1 = arith.constant 0 : i32
    return %c0_i32, %c0_i32_0 : i32, i32
  }
  func.func @transform_10(%arg0: i32) -> (i32, i32) {
    %c0_i32 = arith.constant 0 : i32
    %c0_i32_0 = arith.constant 0 : i32
    %c0_i32_1 = arith.constant 0 : i32
    return %c0_i32, %c0_i32_0 : i32, i32
  }
  func.func @transform_11(%arg0: i32) -> (i32, i32) {
    %c0_i32 = arith.constant 0 : i32
    %c0_i32_0 = arith.constant 0 : i32
    %c0_i32_1 = arith.constant 0 : i32
    return %c0_i32, %c0_i32_0 : i32, i32
  }
  func.func @transform_12(%arg0: i32) -> (i32, i32) {
    %c0_i32 = arith.constant 0 : i32
    %c0_i32_0 = arith.constant 0 : i32
    %c0_i32_1 = arith.constant 0 : i32
    return %c0_i32, %c0_i32_0 : i32, i32
  }
  func.func @transform_13(%arg0: i32) -> (i32, i32) {
    %c0_i32 = arith.constant 0 : i32
    %c0_i32_0 = arith.constant 0 : i32
    %c0_i32_1 = arith.constant 0 : i32
    return %c0_i32, %c0_i32_0 : i32, i32
  }
  func.func @transform_14(%arg0: i32) -> (i32, i32) {
    %c0_i32 = arith.constant 0 : i32
    %c0_i32_0 = arith.constant 0 : i32
    %c0_i32_1 = arith.constant 0 : i32
    return %c0_i32, %c0_i32_0 : i32, i32
  }
  func.func @transform_15(%arg0: i32) -> (i32, i32) {
    %c0_i32 = arith.constant 0 : i32
    %c0_i32_0 = arith.constant 0 : i32
    %c0_i32_1 = arith.constant 0 : i32
    return %c0_i32, %c0_i32_0 : i32, i32
  }
  func.func @transform_16(%arg0: i32) -> (i32, i32) {
    %c0_i32 = arith.constant 0 : i32
    %c0_i32_0 = arith.constant 0 : i32
    %c0_i32_1 = arith.constant 0 : i32
    return %c0_i32, %c0_i32_0 : i32, i32
  }
}

</mosaic_0001>

<bundles_post_ra>
// kernel: _lambda_.3
= control target key start
LH: loop header
LB: loop body
LE: loop exit
PB: predicated region body
PF: predicated region fallthrough
CT: control target
= control target key end

     0   :  { %v1800_v3 = vmov 0.0   ;;  %vm1801_vm0 = vmmov 0   ;;  %s1802_s28 = smov 120   ;;  %vm80_vm1 = vcmask 64512   ;;  %v1803_v14 = vmov 0.0|0.0   ;;  %s2296_s0 = inlined_call_operand.vmem [shape: f32[2,16], index: 0, kind: input, shape index: {}]   ;;  %s2297_s2 = inlined_call_operand.vmem [shape: f32[8,32], index: 2, kind: input, shape index: {}]   ;;  %s2298_s5 = inlined_call_operand.vmem [shape: f32[8,32], index: 5, kind: input, shape index: {}]   ;;  %s2299_s1 = inlined_call_operand.vmem [shape: f32[2,8], index: 1, kind: input, shape index: {}]   ;;  %s2300_s4 = inlined_call_operand.vmem [shape: f32[32,32], index: 4, kind: input, shape index: {}]   ;;  %s2301_s3 = inlined_call_operand.vmem [shape: f32[1,32], index: 3, kind: input, shape index: {}]   ;;  %s2302_s6 = inlined_call_operand.vmem [shape: f32[1,32], index: 6, kind: input, shape index: {}]   ;;  %s2303_s7 = inlined_call_operand.vmem [shape: f32[1,32], index: 7, kind: input, shape index: {}]   ;;  %s2304_s9 = inlined_call_operand.vmem [shape: f32[256,32], index: 9, kind: input, shape index: {}]   ;;  %s2305_s8 = inlined_call_operand.vmem [shape: f32[1,8], index: 8, kind: input, shape index: {}]   ;;  %s2306_s12 = inlined_call_operand.vmem [shape: f32[256,32], index: 12, kind: input, shape index: {}]   ;;  %s2307_s11 = inlined_call_operand.vmem [shape: f32[32,32], index: 11, kind: input, shape index: {}]   ;;  %s2308_s10 = inlined_call_operand.vmem [shape: f32[1,32], index: 10, kind: input, shape index: {}]   ;;  %s2309_s13 = inlined_call_operand.vmem [shape: f32[1,32], index: 13, kind: input, shape index: {}]   ;;  %s2310_s14 = inlined_call_operand.vmem [shape: f32[1,32], index: 14, kind: input, shape index: {}]   ;;  %s2311_s15 = inlined_call_operand.vmem [shape: f32[1,256], index: 15, kind: input, shape index: {}]   ;;  %s2312_s16 = inlined_call_operand.vmem [shape: f32[2,256], index: 16, kind: output, shape index: {}]  }
   0x1   :  { %2313 = sst [smem:[#allocation2_spill]] %s2296_s0  ;;  %1565 = vmatprep.subr.mxu0 %v1800_v3  ;;  %1570 = vmatprep.subr.mxu1 %v1800_v3  ;;  %v1897_v4 = vld [vmem:[%s2297_s2] sm:$0xff]  ;;  %v67_v12 = vld [vmem:[%s2300_s4 + $0x8] sm:$0xff]  ;;  %v68_v15 = vld [vmem:[%s2300_s4 + $0x10] sm:$0xff]  ;;  %vm245_vm2 = vcmask 261120  }
   0x2   :  { %s2314_s23 = sld [smem:[#allocation2_spill]]  ;;  %v1902_v5 = vld [vmem:[%s2298_s5] sm:$0xff]  ;;  %1566 = vmatpush3.msra.mxu0 %v1897_v4  ;;  %1567 = vmatprep.mubr.msk.f32.mxu0 %vm1801_vm0, %v1800_v3  ;;  %v69_v16 = vld [vmem:[%s2300_s4 + $0x18] sm:$0xff]  ;;  %vm1937_vm3 = vmpackc.low %vm245_vm2, %vm245_vm2 }
   0x3   :  { %1571 = vmatpush3.msra.mxu1 %v1902_v5  ;;  %1572 = vmatprep.mubr.msk.f32.mxu1 %vm1801_vm0, %v1800_v3  ;;  %v54_v7 = vld [vmem:[%s2299_s1] sm:$0x3]  ;;  %v1643_v17 = vpack.c.bf16 %v69_v16, %v68_v15 }
   0x4   :  { %v66_v11 = vld [vmem:[%s2300_s4] sm:$0xff]  ;;  %1639 = vmatprep.subr.bf16.mxu0 %v1803_v14  ;;  %1645 = vmatprep.subr.bf16.mxu1 %v1803_v14 }
   0x5   :  { %v1640_v13 = vpack.c.bf16 %v67_v12, %v66_v11  ;;  %v1371_v19 = vld [vmem:[%s2301_s3] ss:$0 sm:$0xff] }
   0x6   :  { %v1375_v39 = vld [vmem:[%s2302_s6] ss:$0 sm:$0xff] }
   0x7   :  { %v1376_v48 = vld [vmem:[%s2303_s7] ss:$0 sm:$0xff] }
   0x8   :  { %v53_v0 = vld [vmem:[%s2314_s23] sm:$0x3] }
   0x9   :  { %v55_v1 = vmul.f32 0.5, %v53_v0  ;;  %v1974_v59 = vld [vmem:[%s2304_s9] sm:$0xff] }
   0xa   :  { %v1384_v60 = vld [vmem:[%s2305_s8] ss:$0 sm:$0xff] }
   0xb   :  { %v56_v2 = vmul.f32 1.442695, %v55_v1  ;;  %v615_v1 = vld [vmem:[%s2307_s11] sm:$0xff] }
   0xd   :  { %1774 = vpow2.f32 %v56_v2  ;;  %v616_v2 = vld [vmem:[%s2307_s11 + $0x8] sm:$0xff] }
  0x17   :  { %v1775_v6 = vpop.eup %1774 }
  0x18   :  { %59 = vrot.lane.b32.xlu0 %v1775_v6, %s1802_s28 }
  0x8a   :  { %v60_v8 = vpop.permute.xlu0 %59 }
  0x8b   :  { %v62_v9 = vmul.f32 %v60_v8, %v54_v7  ;;  %v1387_v7 = vld [vmem:[%s2308_s10] ss:$0 sm:$0xff] }
  0x8d   :  { %v63_v10 = vadd.f32 %v62_v9, %v53_v0  ;;  %v1987_v0 = vld [vmem:[%s2306_s12] sm:$0xff] }
  0x8f   :  { %1568 = vmatmul.mubr.msk.f32.vlgmr.msra.gmra.mrb[0].mxu0 %vm80_vm1, %v63_v10  ;;  %1573 = vmatmul.mubr.msk.f32.vlgmr.msra.gmra.mrb[0].mxu1 %vm80_vm1, %v63_v10 }
  0x90   :  { %1583 = vmatprep.mubr.msk.f32.mxu0 %vm1801_vm0, %v1800_v3  ;;  %1594 = vmatprep.mubr.msk.f32.mxu1 %vm1801_vm0, %v1800_v3 }
  0x91   :  { %1641 = vmatpush3.bf16.msra.mxu0 %v1640_v13  ;;  %1648 = vmatpush3.bf16.xpose.msk.msra.mxu1 %vm1937_vm3, %v1640_v13 }
  0x92   :  { %1642 = vmatprep.subr.bf16.mxu0 %v1803_v14  ;;  %1649 = vmatprep.subr.bf16.mxu1 %v1803_v14 }
  0x95   :  { %1644 = vmatpush3.bf16.msra.mxu0 %v1643_v17 }
  0x96   :  { %1597 = vmatprep.subr.mxu0 %v1800_v3 }
  0x99   :  { %1652 = vmatpush3.bf16.xpose.msk.msra.mxu1 %vm1937_vm3, %v1643_v17 }
  0x9a   :  { %1659 = vmatprep.subr.bf16.mxu1 %v1803_v14 }
 0x162   :  { %v150_v20 = vpop.f32.mrb[0].mxu0  ;;  %v241_v21 = vpop.f32.mrb[0].mxu1 }
 0x163   :  { %v151_v22 = vadd.f32 %v1371_v19, %v150_v20  ;;  %v1569_v23 = vpop.f32.mrb[1].mxu0  ;;  %v1574_v24 = vpop.f32.mrb[1].mxu1 }
 0x165   :  { %v161_v25 = vand.u32 2147483647, %v151_v22  ;;  %v160_v36 = vmax.f32 %v151_v22, 0.0  ;;  %v154_v51 = vsub.f32 0.0, %v151_v22 }
 0x167   :  { %v162_v26 = vsub.f32 0.0, %v161_v25  ;;  %v155_v52 = vmul.f32 1.442695, %v154_v51  ;;  %v588_v51 = vld [vmem:[%s2304_s9 + $0x30] sm:$0xff] }
 0x169   :  { %v163_v27 = vmul.f32 1.442695, %v162_v26 }
 0x16b   :  { %1776 = vpow2.f32 %v163_v27 }
 0x175   :  { %v1777_v28 = vpop.eup %1776 }
 0x176   :  { %v165_v29 = vadd.f32 1.0, %v1777_v28  ;;  %v168_v30 = vmul.f32 -0.5, %v1777_v28  ;;  %v171_v32 = vand.u32 2147483647, %v1777_v28 }
 0x178   :  { %1778 = vlog2.f32 %v165_v29  ;;  %v169_v31 = vadd.f32 1.0, %v168_v30  ;;  %vm172_vm4 = vcmp.lt.f32.partialorder %v171_v32, 0.0004427343  ;;  %v636_v29 = vld [vmem:[%s2306_s12 + $0x88] sm:$0xff] }
 0x17a   :  { %v170_v35 = vmul.f32 %v1777_v28, %v169_v31  ;;  %v635_v28 = vld [vmem:[%s2306_s12 + $0x80] sm:$0xff]  ;;  %v583_v31 = vld [vmem:[%s2304_s9 + $0x8] sm:$0xff] }
 0x17b   :  { %v1667_v30 = vpack.c.bf16 %v636_v29, %v635_v28  ;;  %v1718_v32 = vpack.c.bf16 %v583_v31, %v1974_v59  ;;  %v637_v28 = vld [vmem:[%s2306_s12 + $0x90] sm:$0xff]  ;;  %v638_v29 = vld [vmem:[%s2306_s12 + $0x98] sm:$0xff] }
 0x182   :  { %v1779_v33 = vpop.eup %1778 }
 0x183   :  { %v167_v34 = vmul.f32 0.6931472, %v1779_v33  ;;  %v598_v33 = vld [vmem:[%s2304_s9 + $0x80] sm:$0xff] }
 0x185   :  { %v173_v37 = vsel %vm172_vm4, %v170_v35, %v167_v34  ;;  %v599_v34 = vld [vmem:[%s2304_s9 + $0x88] sm:$0xff]  ;;  %v600_v35 = vld [vmem:[%s2304_s9 + $0x90] sm:$0xff] }
 0x186   :  { %v174_v38 = vadd.f32 %v173_v37, %v160_v36  ;;  %v1715_v36 = vpack.c.bf16 %v599_v34, %v598_v33  ;;  %v601_v37 = vld [vmem:[%s2304_s9 + $0x98] sm:$0xff]  ;;  %v1673_v33 = vpack.c.bf16 %v638_v29, %v637_v28  ;;  %v621_v34 = vld [vmem:[%s2306_s12 + $0x10] sm:$0xff] }
 0x188   :  { %1584 = vmatmul.mubr.msk.f32.vlgmr.msra.gmra.mrb[2].mxu0 %vm245_vm2, %v174_v38  ;;  %v1721_v38 = vpack.c.bf16 %v601_v37, %v600_v35  ;;  %v639_v35 = vld [vmem:[%s2306_s12 + $0xa0] sm:$0xff] }
 0x189   :  { %1598 = vmatpush3.xpose.msk.msra.mxu0 %vm245_vm2, %v1902_v5  ;;  %1599 = vmatprep.mubr.msk.f32.mxu0 %vm1801_vm0, %v1800_v3  ;;  %v617_v5 = vld [vmem:[%s2307_s11 + $0x10] sm:$0xff] }
 0x18a   :  { %1602 = vmatprep.subr.mxu0 %v1800_v3 }
 0x25b   :  { %v315_v40 = vpop.f32.mrb[2].mxu0 }
 0x25c   :  { %v316_v41 = vadd.f32 %v315_v40, %v241_v21  ;;  %v1585_v42 = vpop.f32.mrb[3].mxu0  ;;  %v585_v40 = vld [vmem:[%s2304_s9 + $0x18] sm:$0xff] }
 0x25d   :  { %v603_v42 = vld [vmem:[%s2304_s9 + $0xa8] sm:$0xff] }
 0x25e   :  { %v325_v43 = vadd.f32 %v1375_v39, %v316_v41  ;;  %v584_v39 = vld [vmem:[%s2304_s9 + $0x10] sm:$0xff]  ;;  %v602_v41 = vld [vmem:[%s2304_s9 + $0xa0] sm:$0xff] }
 0x260   :  { %v326_v44 = vsub.f32 0.0, %v325_v43  ;;  %v1724_v43 = vpack.c.bf16 %v585_v40, %v584_v39  ;;  %v623_v39 = vld [vmem:[%s2306_s12 + $0x20] sm:$0xff]  ;;  %v624_v40 = vld [vmem:[%s2306_s12 + $0x28] sm:$0xff] }
 0x262   :  { %v327_v45 = vmul.f32 1.442695, %v326_v44  ;;  %v1727_v44 = vpack.c.bf16 %v603_v42, %v602_v41  ;;  %v641_v41 = vld [vmem:[%s2306_s12 + $0xb0] sm:$0xff]  ;;  %v642_v42 = vld [vmem:[%s2306_s12 + $0xb8] sm:$0xff] }
 0x264   :  { %1780 = vpow2.f32 %v327_v45  ;;  %v586_v45 = vld [vmem:[%s2304_s9 + $0x20] sm:$0xff] }
 0x26e   :  { %v1781_v46 = vpop.eup %1780 }
 0x26f   :  { %v329_v47 = vadd.f32 1.0, %v1781_v46  ;;  %v587_v46 = vld [vmem:[%s2304_s9 + $0x28] sm:$0xff] }
 0x271   :  { %1782 = vrcp.f32 %v329_v47  ;;  %v604_v47 = vld [vmem:[%s2304_s9 + $0xb0] sm:$0xff] }
 0x272   :  { %1784 = vpow2.f32 %v155_v52  ;;  %v589_v52 = vld [vmem:[%s2304_s9 + $0x38] sm:$0xff] }
 0x27b   :  { %v1783_v49 = vpop.eup %1782 }
 0x27c   :  { %v338_v50 = vmul.f32 %v1783_v49, %v1376_v48  ;;  %v1785_v53 = vpop.eup %1784  ;;  %v605_v48 = vld [vmem:[%s2304_s9 + $0xb8] sm:$0xff]  ;;  %v1730_v49 = vpack.c.bf16 %v587_v46, %v586_v45  ;;  %v625_v45 = vld [vmem:[%s2306_s12 + $0x30] sm:$0xff] }
 0x27d   :  { %v157_v54 = vadd.f32 1.0, %v1785_v53  ;;  %v606_v53 = vld [vmem:[%s2304_s9 + $0xc0] sm:$0xff]  ;;  %v626_v46 = vld [vmem:[%s2306_s12 + $0x38] sm:$0xff] }
 0x27e   :  { %1595 = vmatmul.mubr.msk.f32.vlgmr.msra.gmra.mrb[2].mxu1 %vm245_vm2, %v338_v50  ;;  %1600 = vmatmul.mubr.msk.f32.vlgmr.msra.gmra.mrb[4].mxu0 %vm245_vm2, %v338_v50  ;;  %v1733_v50 = vpack.c.bf16 %v605_v48, %v604_v47  ;;  %v643_v47 = vld [vmem:[%s2306_s12 + $0xc0] sm:$0xff]  ;;  %v644_v48 = vld [vmem:[%s2306_s12 + $0xc8] sm:$0xff] }
 0x27f   :  { %1603 = vmatpush3.xpose.msk.msra.mxu0 %vm245_vm2, %v1897_v4  ;;  %1604 = vmatprep.mubr.msk.f32.mxu0 %vm1801_vm0, %v1800_v3  ;;  %1786 = vrcp.f32 %v157_v54  ;;  %v1654_v4 = vpack.c.bf16 %v616_v2, %v615_v1  ;;  %v607_v54 = vld [vmem:[%s2304_s9 + $0xc8] sm:$0xff]  ;;  %v609_v1 = vld [vmem:[%s2304_s9 + $0xd8] sm:$0xff] }
 0x280   :  { %1607 = vmatprep.subr.mxu0 %v1800_v3  ;;  %1636 = vmatprep.mubr.msk.f32.mxu1 %vm1801_vm0, %v1800_v3 }
 0x281   :  { %1662 = vmatpush3.bf16.xpose.msk.msra.mxu1 %vm1937_vm3, %v1654_v4 }
 0x282   :  { %1663 = vmatprep.subr.bf16.mxu1 %v1803_v14 }
 0x289   :  { %v1787_v55 = vpop.eup %1786 }
 0x351   :  { %v420_v56 = vpop.f32.mrb[2].mxu1 }
 0x352   :  { %v424_v57 = vmul.f32 %v1787_v55, %v420_v56  ;;  %v1596_v58 = vpop.f32.mrb[3].mxu1  ;;  %v1736_v55 = vpack.c.bf16 %v589_v52, %v588_v51  ;;  %v1739_v56 = vpack.c.bf16 %v607_v54, %v606_v53  ;;  %v627_v51 = vld [vmem:[%s2306_s12 + $0x40] sm:$0xff]  ;;  %v628_v52 = vld [vmem:[%s2306_s12 + $0x48] sm:$0xff]  ;;  %v645_v53 = vld [vmem:[%s2306_s12 + $0xd0] sm:$0xff] }
 0x353   :  { %v646_v54 = vld [vmem:[%s2306_s12 + $0xd8] sm:$0xff] }
 0x354   :  { %1605 = vmatmul.mubr.msk.f32.vlgmr.msra.gmra.mrb[4].mxu0 %vm245_vm2, %v424_v57  ;;  %v1391_v57 = vld [vmem:[%s2309_s13] ss:$0 sm:$0xff] }
 0x355   :  { %1608 = vmatpush3.msra.mxu0 %v1974_v59  ;;  %1609 = vmatprep.mubr.msk.f32.mxu0 %vm1801_vm0, %v1800_v3  ;;  %v590_v59 = vld [vmem:[%s2304_s9 + $0x40] sm:$0xff] }
 0x356   :  { %1612 = vmatprep.subr.mxu0 %v1800_v3 }
 0x427   :  { %v577_v61 = vpop.f32.mrb[4].mxu0 }
 0x428   :  { %v1763_v62 = vadd.f32 %v1384_v60, %v577_v61  ;;  %v1606_v63 = vpop.f32.mrb[5].mxu0  ;;  %v591_v60 = vld [vmem:[%s2304_s9 + $0x48] sm:$0xff] }
 0x429   :  { %v608_v63 = vld [vmem:[%s2304_s9 + $0xd0] sm:$0xff] }
 0x42a   :  { %1610 = vmatmul.mubr.msk.f32.vlgmr.msra.gmra.mrb[6].mxu0 %vm80_vm1, %v1763_v62 }
 0x42b   :  { %1613 = vmatpush3.msra.mxu0 %v1987_v0  ;;  %1614 = vmatprep.mubr.msk.f32.mxu0 %vm1801_vm0, %v1800_v3 }
 0x42c   :  { %1653 = vmatprep.subr.bf16.mxu0 %v1803_v14 }
 0x42e   :  { %1615 = vmatmul.mubr.msk.f32.vlgmr.msra.gmra.mrb[8].mxu0 %vm80_vm1, %v1763_v62 }
 0x42f   :  { %1625 = vmatprep.mubr.msk.f32.mxu0 %vm1801_vm0, %v1800_v3  ;;  %1655 = vmatpush3.bf16.msra.mxu0 %v1654_v4  ;;  %v618_v3 = vld [vmem:[%s2307_s11 + $0x18] sm:$0xff]  ;;  %v1742_v4 = vpack.c.bf16 %v591_v60, %v590_v59  ;;  %v647_v59 = vld [vmem:[%s2306_s12 + $0xe0] sm:$0xff]  ;;  %v648_v60 = vld [vmem:[%s2306_s12 + $0xe8] sm:$0xff] }
 0x430   :  { %1656 = vmatprep.subr.bf16.mxu0 %v1803_v14  ;;  %v1657_v6 = vpack.c.bf16 %v618_v3, %v617_v5  ;;  %v1745_v5 = vpack.c.bf16 %v609_v1, %v608_v63  ;;  %v631_v63 = vld [vmem:[%s2306_s12 + $0x60] sm:$0xff]  ;;  %v632_v1 = vld [vmem:[%s2306_s12 + $0x68] sm:$0xff] }
 0x432   :  { %1666 = vmatpush3.bf16.xpose.msk.msra.mxu1 %vm1937_vm3, %v1657_v6 }
 0x433   :  { %1658 = vmatpush3.bf16.msra.mxu0 %v1657_v6  ;;  %1669 = vmatprep.subr.msk.bf16.mxu1 %vm1937_vm3, %v1667_v30 }
 0x434   :  { %1717 = vmatprep.subr.msk.bf16.mxu0 %vm1937_vm3, %v1715_v36  ;;  %v640_v36 = vld [vmem:[%s2306_s12 + $0xa8] sm:$0xff] }
 0x4fd   :  { %v729_v8 = vpop.f32.mrb[6].mxu0 }
 0x4fe   :  { %v2018_v9 = vadd.f32 %v1387_v7, %v729_v8  ;;  %v1611_v10 = vpop.f32.mrb[7].mxu0  ;;  %v592_v7 = vld [vmem:[%s2304_s9 + $0x50] sm:$0xff]  ;;  %v593_v8 = vld [vmem:[%s2304_s9 + $0x58] sm:$0xff] }
 0x4ff   :  { %v610_v10 = vld [vmem:[%s2304_s9 + $0xe0] sm:$0xff] }
 0x500   :  { %v740_v11 = vand.u32 2147483647, %v2018_v9  ;;  %v739_v25 = vmax.f32 %v2018_v9, 0.0 }
 0x501   :  { %v2021_v12 = vpop.f32.mrb[8].mxu0 }
 0x502   :  { %v741_v13 = vsub.f32 0.0, %v740_v11  ;;  %v1616_v15 = vpop.f32.mrb[9].mxu0  ;;  %v611_v11 = vld [vmem:[%s2304_s9 + $0xe8] sm:$0xff] }
 0x503   :  { %v594_v15 = vld [vmem:[%s2304_s9 + $0x60] sm:$0xff] }
 0x504   :  { %v742_v14 = vmul.f32 1.442695, %v741_v13  ;;  %v1751_v13 = vpack.c.bf16 %v611_v11, %v610_v10  ;;  %v733_v10 = vsub.f32 0.0, %v2018_v9  ;;  %v653_v9 = vld [vmem:[%s2311_s15] sm:$0x3] }
 0x506   :  { %1788 = vpow2.f32 %v742_v14  ;;  %v595_v14 = vld [vmem:[%s2304_s9 + $0x68] sm:$0xff]  ;;  %v734_v11 = vmul.f32 1.442695, %v733_v10 }
 0x510   :  { %v1789_v16 = vpop.eup %1788 }
 0x511   :  { %v744_v17 = vadd.f32 1.0, %v1789_v16  ;;  %v747_v19 = vmul.f32 -0.5, %v1789_v16  ;;  %v750_v21 = vand.u32 2147483647, %v1789_v16 }
 0x513   :  { %1790 = vlog2.f32 %v744_v17  ;;  %v748_v20 = vadd.f32 1.0, %v747_v19  ;;  %vm751_vm5 = vcmp.lt.f32.partialorder %v750_v21, 0.0004427343  ;;  %v613_v17 = vld [vmem:[%s2304_s9 + $0xf8] sm:$0xff] }
 0x515   :  { %v749_v24 = vmul.f32 %v1789_v16, %v748_v20  ;;  %v612_v16 = vld [vmem:[%s2304_s9 + $0xf0] sm:$0xff]  ;;  %v1754_v20 = vpack.c.bf16 %v595_v14, %v594_v15 }
 0x51d   :  { %v1791_v22 = vpop.eup %1790 }
 0x51e   :  { %v746_v23 = vmul.f32 0.6931472, %v1791_v22  ;;  %v1757_v22 = vpack.c.bf16 %v613_v17, %v612_v16 }
 0x520   :  { %v752_v26 = vsel %vm751_vm5, %v749_v24, %v746_v23  ;;  %v596_v23 = vld [vmem:[%s2304_s9 + $0x70] sm:$0xff]  ;;  %v597_v24 = vld [vmem:[%s2304_s9 + $0x78] sm:$0xff] }
 0x521   :  { %v753_v27 = vadd.f32 %v752_v26, %v739_v25  ;;  %v1760_v25 = vpack.c.bf16 %v597_v24, %v596_v23  ;;  %v620_v26 = vld [vmem:[%s2306_s12 + $0x8] sm:$0xff] }
 0x522   :  { %v1670_v31 = vpack.c.bf16 %v620_v26, %v1987_v0  ;;  %v622_v0 = vld [vmem:[%s2306_s12 + $0x18] sm:$0xff] }
 0x523   :  { %1626 = vmatmul.mubr.msk.f32.vlgmr.msra.gmra.mrb[10].mxu0 %vm245_vm2, %v753_v27  ;;  %v1392_v27 = vld [vmem:[%s2310_s14] ss:$0 sm:$0xff]  ;;  %v1676_v37 = vpack.c.bf16 %v622_v0, %v621_v34 }
 0x524   :  { %1720 = vmatpush3.bf16.xpose.msk.msra.mxu0 %vm1937_vm3, %v1718_v32 }
 0x525   :  { %1723 = vmatprep.subr.msk.bf16.mxu0 %vm1937_vm3, %v1721_v38  ;;  %v1679_v38 = vpack.c.bf16 %v640_v36, %v639_v35 }
 0x52c   :  { %1726 = vmatpush3.bf16.xpose.msk.msra.mxu0 %vm1937_vm3, %v1724_v43  ;;  %v1682_v43 = vpack.c.bf16 %v624_v40, %v623_v39 }
 0x52d   :  { %1729 = vmatprep.subr.msk.bf16.mxu0 %vm1937_vm3, %v1727_v44  ;;  %v1685_v44 = vpack.c.bf16 %v642_v42, %v641_v41 }
 0x534   :  { %1732 = vmatpush3.bf16.xpose.msk.msra.mxu0 %vm1937_vm3, %v1730_v49  ;;  %v1688_v49 = vpack.c.bf16 %v626_v46, %v625_v45 }
 0x535   :  { %1735 = vmatprep.subr.msk.bf16.mxu0 %vm1937_vm3, %v1733_v50  ;;  %v1691_v50 = vpack.c.bf16 %v644_v48, %v643_v47 }
 0x53c   :  { %1738 = vmatpush3.bf16.xpose.msk.msra.mxu0 %vm1937_vm3, %v1736_v55  ;;  %v1694_v55 = vpack.c.bf16 %v628_v52, %v627_v51 }
 0x53d   :  { %1741 = vmatprep.subr.msk.bf16.mxu0 %vm1937_vm3, %v1739_v56  ;;  %v1697_v56 = vpack.c.bf16 %v646_v54, %v645_v53 }
 0x544   :  { %1744 = vmatpush3.bf16.xpose.msk.msra.mxu0 %vm1937_vm3, %v1742_v4  ;;  %v650_v4 = vld [vmem:[%s2306_s12 + $0xf8] sm:$0xff] }
 0x545   :  { %1747 = vmatprep.subr.msk.bf16.mxu0 %vm1937_vm3, %v1745_v5  ;;  %v1706_v5 = vpack.c.bf16 %v632_v1, %v631_v63 }
 0x5f6   :  { %v893_v58 = vpop.f32.mrb[10].mxu0 }
 0x5f7   :  { %v894_v61 = vadd.f32 %v893_v58, %v2021_v12  ;;  %v1627_v62 = vpop.f32.mrb[11].mxu0  ;;  %v1748_v12 = vpack.c.bf16 %v593_v8, %v592_v7  ;;  %v630_v58 = vld [vmem:[%s2306_s12 + $0x58] sm:$0xff] }
 0x5f8   :  { %v1703_v62 = vpack.c.bf16 %v648_v60, %v647_v59  ;;  %v634_v7 = vld [vmem:[%s2306_s12 + $0x78] sm:$0xff] }
 0x5f9   :  { %v903_v2 = vadd.f32 %v1391_v57, %v894_v61  ;;  %1750 = vmatpush3.bf16.xpose.msk.msra.mxu0 %vm1937_vm3, %v1748_v12  ;;  %v629_v57 = vld [vmem:[%s2306_s12 + $0x50] sm:$0xff] }
 0x5fa   :  { %1753 = vmatprep.subr.msk.bf16.mxu0 %vm1937_vm3, %v1751_v13  ;;  %v1700_v61 = vpack.c.bf16 %v630_v58, %v629_v57 }
 0x5fb   :  { %v904_v3 = vsub.f32 0.0, %v903_v2  ;;  %v649_v2 = vld [vmem:[%s2306_s12 + $0xf0] sm:$0xff] }
 0x5fd   :  { %v905_v6 = vmul.f32 1.442695, %v904_v3  ;;  %v1709_v3 = vpack.c.bf16 %v650_v4, %v649_v2 }
 0x5ff   :  { %1792 = vpow2.f32 %v905_v6  ;;  %v633_v6 = vld [vmem:[%s2306_s12 + $0x70] sm:$0xff] }
 0x600   :  { %v1712_v8 = vpack.c.bf16 %v634_v7, %v633_v6 }
 0x601   :  { %1756 = vmatpush3.bf16.xpose.msk.msra.mxu0 %vm1937_vm3, %v1754_v20  ;;  %v1171_v20 = vlaneseq }
 0x602   :  { %1759 = vmatprep.subr.msk.bf16.mxu0 %vm1937_vm3, %v1757_v22 }
 0x609   :  { %v1793_v19 = vpop.eup %1792  ;;  %1762 = vmatpush3.bf16.xpose.msk.msra.mxu0 %vm1937_vm3, %v1760_v25 }
 0x60a   :  { %v907_v21 = vadd.f32 1.0, %v1793_v19 }
 0x60c   :  { %1794 = vrcp.f32 %v907_v21  ;;  %v1172_v21 = vshrl.u32 %v1171_v20, 7 }
 0x60d   :  { %1796 = vpow2.f32 %v734_v11 }
 0x60e   :  { %v1173_v22 = vsub.s32 0, %v1172_v21  ;;  %v1177_v23 = vsub.s32 1, %v1172_v21 }
 0x610   :  { %v1174_v24 = vrot.slane %v653_v9, %v1173_v22  ;;  %v1178_v25 = vrot.slane %v653_v9, %v1177_v23 }
 0x616   :  { %v1795_v30 = vpop.eup %1794 }
 0x617   :  { %v916_v32 = vmul.f32 %v1795_v30, %v1392_v27  ;;  %v1797_v12 = vpop.eup %1796 }
 0x618   :  { %v736_v13 = vadd.f32 1.0, %v1797_v12 }
 0x619   :  { %1637 = vmatmul.mubr.msk.f32.vlgmr.msra.gmra.mrb[4].mxu1 %vm245_vm2, %v916_v32 }
 0x61a   :  { %1672 = vmatpush3.bf16.xpose.msk.msra.mxu1 %vm1937_vm3, %v1670_v31  ;;  %1529 = vmatprep.mubr.msk.f32.mxu1 %vm245_vm2, %v916_v32  ;;  %1798 = vrcp.f32 %v736_v13 }
 0x61b   :  { %1675 = vmatprep.subr.msk.bf16.mxu1 %vm1937_vm3, %v1673_v33 }
 0x622   :  { %1678 = vmatpush3.bf16.xpose.msk.msra.mxu1 %vm1937_vm3, %v1676_v37 }
 0x623   :  { %1681 = vmatprep.subr.msk.bf16.mxu1 %vm1937_vm3, %v1679_v38 }
 0x624   :  { %v1799_v15 = vpop.eup %1798 }
 0x62a   :  { %1684 = vmatpush3.bf16.xpose.msk.msra.mxu1 %vm1937_vm3, %v1682_v43 }
 0x62b   :  { %1687 = vmatprep.subr.msk.bf16.mxu1 %vm1937_vm3, %v1685_v44 }
 0x632   :  { %1690 = vmatpush3.bf16.xpose.msk.msra.mxu1 %vm1937_vm3, %v1688_v49 }
 0x633   :  { %1693 = vmatprep.subr.msk.bf16.mxu1 %vm1937_vm3, %v1691_v50 }
 0x63a   :  { %1696 = vmatpush3.bf16.xpose.msk.msra.mxu1 %vm1937_vm3, %v1694_v55 }
 0x63b   :  { %1699 = vmatprep.subr.msk.bf16.mxu1 %vm1937_vm3, %v1697_v56 }
 0x642   :  { %1702 = vmatpush3.bf16.xpose.msk.msra.mxu1 %vm1937_vm3, %v1700_v61 }
 0x643   :  { %1705 = vmatprep.subr.msk.bf16.mxu1 %vm1937_vm3, %v1703_v62 }
 0x64a   :  { %1708 = vmatpush3.bf16.xpose.msk.msra.mxu1 %vm1937_vm3, %v1706_v5 }
 0x64b   :  { %1711 = vmatprep.subr.msk.bf16.mxu1 %vm1937_vm3, %v1709_v3 }
 0x652   :  { %1714 = vmatpush3.bf16.xpose.msk.msra.mxu1 %vm1937_vm3, %v1712_v8 }
 0x659   :  { %1530 = vmatmul.mubr.msk.f32.vlgmr.msra.gmra.mrb[6].mxu1 %vm245_vm2, %v916_v32 }
 0x6ec   :  { %v998_v14 = vpop.f32.mrb[4].mxu1 }
 0x6ed   :  { %v1002_v16 = vmul.f32 %v1799_v15, %v998_v14  ;;  %v1638_v17 = vpop.f32.mrb[5].mxu1 }
 0x6ef   :  { %1563 = vmatprep.mubr.msk.f32.mxu0 %vm245_vm2, %v1002_v16 }
 0x6f0   :  { %1564 = vmatmul.mubr.msk.f32.vlgmr.msra.gmra.mrb[12].mxu0 %vm245_vm2, %v1002_v16 }
 0x72c   :  { %v1165_v19 = vpop.f32.mrb[6].mxu1 }
 0x72d   :  { %v1167_v18 = vpop.f32.mrb[7].mxu1  ;;  %v1181_v26 = vadd.f32 %v1174_v24, %v1165_v19 }
 0x72e   :  { %v1182_v27 = vadd.f32 %v1178_v25, %v1167_v18 }
 0x7c3   :  { %v1348_v28 = vpop.f32.mrb[12].mxu0 }
 0x7c4   :  { %v1353_v29 = vadd.f32 %v1348_v28, %v1181_v26  ;;  %v1350_v30 = vpop.f32.mrb[13].mxu0 }
 0x7c5   :  { %v1354_v31 = vadd.f32 %v1350_v30, %v1182_v27 }
 0x7c7   :  { %v1357_v32 = vcombine.low %v1353_v29, %v1354_v31 }
 0x7c9   :  { %1464 = vst.sshfl [vmem:[%s2312_s16] sm:$0x33 pattern:$0x76325410] %v1357_v32 }

// kernel: _lambda_.2
= control target key start
LH: loop header
LB: loop body
LE: loop exit
PB: predicated region body
PF: predicated region fallthrough
CT: control target
= control target key end

     0   :  { %s8917_s0 = inlined_call_operand.vmem [shape: f32[2,256], index: 0, kind: input, shape index: {}]   ;;  %s8918_s1 = inlined_call_operand.hbm [shape: bf16[256,512], index: 1, kind: input, shape index: {}]   ;;  %s8919_s2 = inlined_call_operand.vmem [shape: f32[1,512], index: 2, kind: input, shape index: {}]   ;;  %s8920_s3 = inlined_call_operand.hbm [shape: bf16[512,512], index: 3, kind: input, shape index: {}]   ;;  %s8921_s4 = inlined_call_operand.vmem [shape: f32[1,512], index: 4, kind: input, shape index: {}]   ;;  %s8922_s5 = inlined_call_operand.hbm [shape: bf16[256,512], index: 5, kind: input, shape index: {}]   ;;  %s8923_s6 = inlined_call_operand.vmem [shape: f32[1,512], index: 6, kind: input, shape index: {}]   ;;  %s8924_s7 = inlined_call_operand.hbm [shape: bf16[512,512], index: 7, kind: input, shape index: {}]   ;;  %s8925_s8 = inlined_call_operand.vmem [shape: f32[1,512], index: 8, kind: input, shape index: {}]   ;;  %s8926_s9 = inlined_call_operand.hbm [shape: bf16[512,512], index: 9, kind: input, shape index: {}]   ;;  %s8927_s10 = inlined_call_operand.vmem [shape: f32[1,512], index: 10, kind: input, shape index: {}]   ;;  %s8928_s11 = inlined_call_operand.hbm [shape: bf16[512,256], index: 11, kind: input, shape index: {}]   ;;  %s8929_s12 = inlined_call_operand.vmem [shape: f32[1,256], index: 12, kind: input, shape index: {}]   ;;  %s8930_s13 = inlined_call_operand.vmem [shape: bf16[256,256], index: 13, kind: input, shape index: {}]   ;;  %s8931_s14 = inlined_call_operand.vmem [shape: f32[1,256], index: 14, kind: input, shape index: {}]   ;;  %s8932_s15 = inlined_call_operand.hbm [shape: bf16[512,256], index: 15, kind: input, shape index: {}]   ;;  %s8933_s16 = inlined_call_operand.vmem [shape: f32[1,256], index: 16, kind: input, shape index: {}]   ;;  %s8934_s17 = inlined_call_operand.hbm [shape: bf16[256,256], index: 17, kind: input, shape index: {}]   ;;  %s8935_s18 = inlined_call_operand.vmem [shape: f32[1,256], index: 18, kind: input, shape index: {}]   ;;  %s8936_s19 = inlined_call_operand.hbm [shape: bf16[256,256], index: 19, kind: input, shape index: {}]   ;;  %s8937_s20 = inlined_call_operand.vmem [shape: f32[1,256], index: 20, kind: input, shape index: {}]   ;;  %s8938_s21 = inlined_call_operand.vmem [shape: f32[256,16], index: 21, kind: input, shape index: {}]   ;;  %s8939_s22 = inlined_call_operand.vmem [shape: f32[1,16], index: 22, kind: input, shape index: {}]   ;;  %s8940_s23 = inlined_call_operand.vmem [shape: f32[16,16], index: 23, kind: input, shape index: {}]   ;;  %s8941_s24 = inlined_call_operand.vmem [shape: f32[1,16], index: 24, kind: input, shape index: {}]   ;;  %s8942_s25 = inlined_call_operand.vmem [shape: f32[2,16], index: 25, kind: output, shape index: {}]  }
   0x1   :  { %8956 = sst [smem:[#allocation21_spill]] %s8917_s0 }
   0x2   :  { %8957 = sst [smem:[#allocation22_spill]] %s8918_s1 }
   0x3   :  { %8958 = sst [smem:[#allocation23_spill]] %s8919_s2 }
   0x4   :  { %8959 = sst [smem:[#allocation24_spill]] %s8920_s3 }
   0x5   :  { %8960 = sst [smem:[#allocation25_spill]] %s8921_s4 }
   0x6   :  { %8961 = sst [smem:[#allocation26_spill]] %s8922_s5 }
   0x7   :  { %8962 = sst [smem:[#allocation27_spill]] %s8923_s6 }
   0x8   :  { %8963 = sst [smem:[#allocation28_spill]] %s8924_s7 }
   0x9   :  { %8964 = sst [smem:[#allocation29_spill]] %s8925_s8 }
   0xa   :  { %8965 = sst [smem:[#allocation30_spill]] %s8926_s9 }
   0xb   :  { %8966 = sst [smem:[#allocation31_spill]] %s8942_s25 }
   0xc   :  { %30 = vsyncpa [#allocation3], 0 }
   0xd   :  { %31 = vsyncpa [#allocation5], 0 }
   0xe   :  { %32 = vsyncpa [#allocation8], 0 }
   0xf   :  { %33 = vsyncpa [#allocation11], 0 }
  0x10   :  { %34 = vsyncpa [#allocation14], 0  ;;  %s8259_s29 = smov [#allocation4]   ;;  %s8260_s6 = smov [#allocation7]  }
  0x11   :  { %s56_s2 = sshll.u32 %s8259_s29, 4  ;;  %s84_s30 = sshll.u32 %s8260_s6, 4  ;;  %s57_s2 = int_to_ptr.vmem [resolvable:$true] %s56_s2  ;;  %s8405_s30 = int_to_ptr.vmem [resolvable:$true] %s84_s30 }
  0x12   :  { %s8967_s26 = sld [smem:[#allocation24_spill]] }
  0x18   :  { %s8051_s1 = scalar_lea.hbm %s8967_s26, 16384 }
  0x19   :  { %p8052_p0 = scmp.ne.s32.totalorder %s8967_s26, %s8051_s1  ;;  %p8055_p1 = scmp.lt.u32.totalorder %s8051_s1, %s8967_s26 }
  0x1b   :  { %p8057_p2 = pnand %p8055_p1, %p8052_p0 }
  0x1d   :  { %8060 = shalt.err (!%p8057_p2)
}
  0x1e   :  { %s8061_s9 = scalar_lea.vmem %s57_s2, 16384  ;;  %p8066_p4 = scmp.lt.s32.totalorder %s57_s2, %s57_s2 }
  0x1f   :  { %p8062_p3 = scmp.ne.s32.totalorder %s57_s2, %s8061_s9  ;;  %p8067_p5 = scmp.lt.s32.totalorder %s8061_s9, %s8061_s9 }
  0x21   :  { %p8068_p6 = por %p8067_p5, %p8066_p4 }
  0x23   :  { %p8069_p7 = pnand %p8068_p6, %p8062_p3 }
  0x25   :  { %8072 = shalt.err (!%p8069_p7)
}
  0x26   :  { %s8948_s5 = smov 256   ;;  %s8950_s0 = smov 16  }
  0x27   :  { %62 = dma.hbm_to_vmem [thread:$0]  %s8967_s26, 16384, %s57_s2, [#allocation5], %s8948_s5, %s8948_s5, %s8950_s0  }
  0x28   :  { %s8968_s1 = sld [smem:[#allocation28_spill]] }
  0x2e   :  { %s8073_s8 = scalar_lea.hbm %s8968_s1, 16384 }
  0x2f   :  { %p8074_p8 = scmp.ne.s32.totalorder %s8968_s1, %s8073_s8  ;;  %p8077_p9 = scmp.lt.u32.totalorder %s8073_s8, %s8968_s1 }
  0x31   :  { %p8079_p10 = pnand %p8077_p9, %p8074_p8 }
  0x33   :  { %8082 = shalt.err (!%p8079_p10)
}
  0x34   :  { %s8083_s25 = scalar_lea.vmem %s8405_s30, 16384  ;;  %p8088_p12 = scmp.lt.s32.totalorder %s8405_s30, %s8405_s30 }
  0x35   :  { %p8084_p11 = scmp.ne.s32.totalorder %s8405_s30, %s8083_s25  ;;  %p8089_p13 = scmp.lt.s32.totalorder %s8083_s25, %s8083_s25 }
  0x37   :  { %p8090_p0 = por %p8089_p13, %p8088_p12 }
  0x39   :  { %p8091_p1 = pnand %p8090_p0, %p8084_p11 }
  0x3b   :  { %8094 = shalt.err (!%p8091_p1)
}
  0x3c   :  { %90 = dma.hbm_to_vmem [thread:$0]  %s8968_s1, 16384, %s8405_s30, [#allocation8], %s8948_s5, %s8948_s5, %s8950_s0  }
  0x3d   :  { %s8263_s29 = smov [#allocation10]   ;;  %s8095_s8 = scalar_lea.hbm %s8928_s11, 8192 }
  0x3e   :  { %s112_s6 = sshll.u32 %s8263_s29, 4  ;;  %p8096_p2 = scmp.ne.s32.totalorder %s8928_s11, %s8095_s8  ;;  %s113_s6 = int_to_ptr.vmem [resolvable:$true] %s112_s6 }
  0x3f   :  { %p8099_p3 = scmp.lt.u32.totalorder %s8095_s8, %s8928_s11 }
  0x41   :  { %p8101_p4 = pnand %p8099_p3, %p8096_p2 }
  0x43   :  { %8104 = shalt.err (!%p8101_p4)
}
  0x44   :  { %s8105_s9 = scalar_lea.vmem %s113_s6, 8192  ;;  %p8110_p6 = scmp.lt.s32.totalorder %s113_s6, %s113_s6 }
  0x45   :  { %p8106_p5 = scmp.ne.s32.totalorder %s113_s6, %s8105_s9  ;;  %p8111_p7 = scmp.lt.s32.totalorder %s8105_s9, %s8105_s9 }
  0x47   :  { %p8112_p8 = por %p8111_p7, %p8110_p6 }
  0x49   :  { %p8113_p9 = pnand %p8112_p8, %p8106_p5 }
  0x4b   :  { %8116 = shalt.err (!%p8113_p9)
}
  0x4c   :  { %s8952_s30 = smov 128   ;;  %s8954_s1 = smov 8  }
  0x4d   :  { %118 = dma.hbm_to_vmem [thread:$0]  %s8928_s11, 8192, %s113_s6, [#allocation11], %s8952_s30, %s8952_s30, %s8954_s1  }
  0x4e   :  { %s8266_s29 = smov [#allocation13]   ;;  %s8267_s3 = smov [#allocation2]  }
  0x4f   :  { %s144_s7 = sshll.u32 %s8266_s29, 4  ;;  %s42_s8 = sshll.u32 %s8267_s3, 4  ;;  %s145_s7 = int_to_ptr.vmem [resolvable:$true] %s144_s7  ;;  %s43_s8 = int_to_ptr.vmem [resolvable:$true] %s42_s8 }
  0x50   :  { %s8117_s4 = scalar_lea.hbm %s8934_s17, 4096 }
  0x51   :  { %p8118_p10 = scmp.ne.s32.totalorder %s8934_s17, %s8117_s4  ;;  %p8121_p11 = scmp.lt.u32.totalorder %s8117_s4, %s8934_s17 }
  0x53   :  { %p8123_p12 = pnand %p8121_p11, %p8118_p10 }
  0x55   :  { %8126 = shalt.err (!%p8123_p12)
}
  0x56   :  { %s8127_s11 = scalar_lea.vmem %s145_s7, 4096  ;;  %p8132_p0 = scmp.lt.s32.totalorder %s145_s7, %s145_s7 }
  0x57   :  { %p8128_p13 = scmp.ne.s32.totalorder %s145_s7, %s8127_s11  ;;  %p8133_p1 = scmp.lt.s32.totalorder %s8127_s11, %s8127_s11 }
  0x59   :  { %p8134_p2 = por %p8133_p1, %p8132_p0 }
  0x5b   :  { %p8135_p3 = pnand %p8134_p2, %p8128_p13 }
  0x5d   :  { %8138 = shalt.err (!%p8135_p3)
}
  0x5e   :  { %150 = dma.hbm_to_vmem [thread:$0]  %s8934_s17, 4096, %s145_s7, [#allocation14], %s8952_s30, %s8952_s30, %s8954_s1  }
  0x5f   :  { %s8969_s0 = sld [smem:[#allocation22_spill]] }
  0x65   :  { %s8139_s29 = scalar_lea.hbm %s8969_s0, 8192 }
  0x66   :  { %p8140_p4 = scmp.ne.s32.totalorder %s8969_s0, %s8139_s29  ;;  %p8143_p5 = scmp.lt.u32.totalorder %s8139_s29, %s8969_s0 }
  0x68   :  { %p8145_p6 = pnand %p8143_p5, %p8140_p4 }
  0x6a   :  { %8148 = shalt.err (!%p8145_p6)
}
  0x6b   :  { %s8149_s28 = scalar_lea.vmem %s43_s8, 8192  ;;  %p8154_p8 = scmp.lt.s32.totalorder %s43_s8, %s43_s8 }
  0x6c   :  { %p8150_p7 = scmp.ne.s32.totalorder %s43_s8, %s8149_s28  ;;  %p8155_p9 = scmp.lt.s32.totalorder %s8149_s28, %s8149_s28 }
  0x6e   :  { %p8156_p10 = por %p8155_p9, %p8154_p8 }
  0x70   :  { %p8157_p11 = pnand %p8156_p10, %p8150_p7 }
  0x72   :  { %8160 = shalt.err (!%p8157_p11)
}
  0x73   :  { %s8970_s17 = smov 16   ;;  %s8971_s7 = smov 256  }
  0x74   :  { %48 = dma.hbm_to_vmem [thread:$0]  %s8969_s0, 8192, %s43_s8, [#allocation3], %s8971_s7, %s8971_s7, %s8970_s17  }
  0x75   :  { %s8268_s6 = smov [#allocation6]   ;;  %s8269_s26 = smov [#allocation9]  }
  0x76   :  { %s70_s2 = sshll.u32 %s8268_s6, 4  ;;  %s98_s5 = sshll.u32 %s8269_s26, 4  ;;  %s71_s2 = int_to_ptr.vmem [resolvable:$true] %s70_s2  ;;  %s99_s5 = int_to_ptr.vmem [resolvable:$true] %s98_s5 }
  0x77   :  { %s8972_s27 = sld [smem:[#allocation26_spill]] }
  0x7d   :  { %s8161_s25 = scalar_lea.hbm %s8972_s27, 8192 }
  0x7e   :  { %p8162_p12 = scmp.ne.s32.totalorder %s8972_s27, %s8161_s25  ;;  %p8165_p13 = scmp.lt.u32.totalorder %s8161_s25, %s8972_s27 }
  0x80   :  { %p8167_p0 = pnand %p8165_p13, %p8162_p12 }
  0x82   :  { %8170 = shalt.err (!%p8167_p0)
}
  0x83   :  { %s8171_s8 = scalar_lea.vmem %s71_s2, 8192  ;;  %p8176_p2 = scmp.lt.s32.totalorder %s71_s2, %s71_s2 }
  0x84   :  { %p8172_p1 = scmp.ne.s32.totalorder %s71_s2, %s8171_s8  ;;  %p8177_p3 = scmp.lt.s32.totalorder %s8171_s8, %s8171_s8 }
  0x86   :  { %p8178_p4 = por %p8177_p3, %p8176_p2 }
  0x88   :  { %p8179_p5 = pnand %p8178_p4, %p8172_p1 }
  0x8a   :  { %8182 = shalt.err (!%p8179_p5)
}
  0x8b   :  { %76 = dma.hbm_to_vmem [thread:$0]  %s8972_s27, 8192, %s71_s2, [#allocation5], %s8971_s7, %s8971_s7, %s8970_s17  }
  0x8c   :  { %s8973_s1 = sld [smem:[#allocation30_spill]] }
  0x92   :  { %s8183_s6 = scalar_lea.hbm %s8973_s1, 16384 }
  0x93   :  { %p8184_p6 = scmp.ne.s32.totalorder %s8973_s1, %s8183_s6  ;;  %p8187_p7 = scmp.lt.u32.totalorder %s8183_s6, %s8973_s1 }
  0x95   :  { %p8189_p8 = pnand %p8187_p7, %p8184_p6 }
  0x97   :  { %8192 = shalt.err (!%p8189_p8)
}
  0x98   :  { %s8193_s4 = scalar_lea.vmem %s99_s5, 16384  ;;  %p8198_p10 = scmp.lt.s32.totalorder %s99_s5, %s99_s5 }
  0x99   :  { %p8194_p9 = scmp.ne.s32.totalorder %s99_s5, %s8193_s4  ;;  %p8199_p11 = scmp.lt.s32.totalorder %s8193_s4, %s8193_s4 }
  0x9b   :  { %p8200_p12 = por %p8199_p11, %p8198_p10 }
  0x9d   :  { %p8201_p13 = pnand %p8200_p12, %p8194_p9 }
  0x9f   :  { %8204 = shalt.err (!%p8201_p13)
}
  0xa0   :  { %104 = dma.hbm_to_vmem [thread:$0]  %s8973_s1, 16384, %s99_s5, [#allocation8], %s8971_s7, %s8971_s7, %s8970_s17  }
  0xa1   :  { %s8270_s28 = smov [#allocation12]   ;;  %s8271_s0 = smov [#allocation15]  }
  0xa2   :  { %s130_s8 = sshll.u32 %s8270_s28, 4  ;;  %s158_s9 = sshll.u32 %s8271_s0, 4  ;;  %s131_s8 = int_to_ptr.vmem [resolvable:$true] %s130_s8  ;;  %s159_s9 = int_to_ptr.vmem [resolvable:$true] %s158_s9 }
  0xa3   :  { %s8205_s6 = scalar_lea.hbm %s8932_s15, 8192 }
  0xa4   :  { %p8206_p0 = scmp.ne.s32.totalorder %s8932_s15, %s8205_s6  ;;  %p8209_p1 = scmp.lt.u32.totalorder %s8205_s6, %s8932_s15 }
  0xa6   :  { %p8211_p2 = pnand %p8209_p1, %p8206_p0 }
  0xa8   :  { %8214 = shalt.err (!%p8211_p2)
}
  0xa9   :  { %s8215_s17 = scalar_lea.vmem %s131_s8, 8192  ;;  %p8220_p4 = scmp.lt.s32.totalorder %s131_s8, %s131_s8 }
  0xaa   :  { %p8216_p3 = scmp.ne.s32.totalorder %s131_s8, %s8215_s17  ;;  %p8221_p5 = scmp.lt.s32.totalorder %s8215_s17, %s8215_s17 }
  0xac   :  { %p8222_p6 = por %p8221_p5, %p8220_p4 }
  0xae   :  { %p8223_p7 = pnand %p8222_p6, %p8216_p3 }
  0xb0   :  { %8226 = shalt.err (!%p8223_p7)
}
  0xb1   :  { %s8974_s7 = smov 8   ;;  %s8975_s5 = smov 128  }
  0xb2   :  { %136 = dma.hbm_to_vmem [thread:$0]  %s8932_s15, 8192, %s131_s8, [#allocation11], %s8975_s5, %s8975_s5, %s8974_s7  }
  0xb3   :  { %s8227_s28 = scalar_lea.hbm %s8936_s19, 4096 }
  0xb4   :  { %p8228_p8 = scmp.ne.s32.totalorder %s8936_s19, %s8227_s28  ;;  %p8231_p9 = scmp.lt.u32.totalorder %s8227_s28, %s8936_s19 }
  0xb6   :  { %p8233_p10 = pnand %p8231_p9, %p8228_p8 }
  0xb8   :  { %8236 = shalt.err (!%p8233_p10)
}
  0xb9   :  { %s8237_s26 = scalar_lea.vmem %s159_s9, 4096  ;;  %p8242_p12 = scmp.lt.s32.totalorder %s159_s9, %s159_s9 }
  0xba   :  { %p8238_p11 = scmp.ne.s32.totalorder %s159_s9, %s8237_s26  ;;  %p8243_p13 = scmp.lt.s32.totalorder %s8237_s26, %s8237_s26 }
  0xbc   :  { %p8244_p0 = por %p8243_p13, %p8242_p12 }
  0xbe   :  { %p8245_p1 = pnand %p8244_p0, %p8238_p11 }
  0xc0   :  { %8248 = shalt.err (!%p8245_p1)
}
  0xc1   :  { %164 = dma.hbm_to_vmem [thread:$0]  %s8936_s19, 4096, %s159_s9, [#allocation14], %s8975_s5, %s8975_s5, %s8974_s7  }
  0xc2   :  { %8249 = dma.done.wait [#allocation3], 8192  }
  0xc3   :  { %8250 = vsyncadd [#allocation3], 4294959104 }
  0xc4   :  { %8251 = dma.done.wait [#allocation5], 24576  }
  0xc5   :  { %8252 = vsyncadd [#allocation5], 4294942720 }
  0xc6   :  { %8253 = dma.done.wait [#allocation8], 32768  }
  0xc7   :  { %8254 = vsyncadd [#allocation8], 4294934528 }
  0xc8   :  { %8255 = dma.done.wait [#allocation11], 16384  }
  0xc9   :  { %8256 = vsyncadd [#allocation11], 4294950912 }
  0xca   :  { %8257 = dma.done.wait [#allocation14], 8192  }
  0xcb   :  { %8258 = vsyncadd [#allocation14], 4294959104  ;;  %v6947_v0 = vld [vmem:[#allocation6 + $0x4] ss:$16 sps:$4 sm:$0xff]   ;;  %v6949_v1 = vld [vmem:[#allocation6] ss:$16 sps:$4 sm:$0xff]  }
  0xcc   :  { %816 = vmatprep.subr.bf16.mxu0 %v6947_v0  ;;  %v6950_v2 = vld [vmem:[#allocation6 + $0x24] ss:$16 sps:$4 sm:$0xff]   ;;  %v6952_v3 = vld [vmem:[#allocation6 + $0x20] ss:$16 sps:$4 sm:$0xff]   ;;  %v6994_v13 = vld [vmem:[#allocation6 + $0xc] ss:$16 sps:$4 sm:$0xff]  }
  0xcd   :  { %817 = vmatpush1.bf16.msra.mxu0 %v6949_v1  ;;  %v6953_v4 = vld [vmem:[#allocation6 + $0x44] ss:$16 sps:$4 sm:$0xff]   ;;  %v6955_v5 = vld [vmem:[#allocation6 + $0x40] ss:$16 sps:$4 sm:$0xff]   ;;  %v6997_v15 = vld [vmem:[#allocation6 + $0x8] ss:$16 sps:$4 sm:$0xff]   ;;  %857 = vmatprep.subr.bf16.mxu1 %v6994_v13 }
  0xce   :  { %818 = vmatprep.subr.bf16.mxu0 %v6950_v2  ;;  %v6956_v6 = vld [vmem:[#allocation6 + $0x64] ss:$16 sps:$4 sm:$0xff]   ;;  %v6958_v7 = vld [vmem:[#allocation6 + $0x60] ss:$16 sps:$4 sm:$0xff]   ;;  %s8976_s29 = sld [smem:[#allocation21_spill]]  ;;  %858 = vmatpush1.bf16.msra.mxu1 %v6997_v15  ;;  %s8977_s17 = sld [smem:[#allocation23_spill]] }
  0xcf   :  { %v6959_v8 = vld [vmem:[#allocation6 + $0x84] ss:$16 sps:$4 sm:$0xff]   ;;  %v6961_v9 = vld [vmem:[#allocation6 + $0x80] ss:$16 sps:$4 sm:$0xff]   ;;  %v6998_v19 = vld [vmem:[#allocation6 + $0x2c] ss:$16 sps:$4 sm:$0xff]  }
  0xd0   :  { %v6962_v10 = vld [vmem:[#allocation6 + $0xa4] ss:$16 sps:$4 sm:$0xff]   ;;  %v6964_v11 = vld [vmem:[#allocation6 + $0xa0] ss:$16 sps:$4 sm:$0xff]   ;;  %v7003_v20 = vld [vmem:[#allocation6 + $0x28] ss:$16 sps:$4 sm:$0xff]   ;;  %859 = vmatprep.subr.bf16.mxu1 %v6998_v19 }
  0xd1   :  { %819 = vmatpush1.bf16.msra.mxu0 %v6952_v3  ;;  %v6965_v12 = vld [vmem:[#allocation6 + $0xc4] ss:$16 sps:$4 sm:$0xff]   ;;  %v6967_v14 = vld [vmem:[#allocation6 + $0xc0] ss:$16 sps:$4 sm:$0xff]   ;;  %v7004_v22 = vld [vmem:[#allocation6 + $0x4c] ss:$16 sps:$4 sm:$0xff]  }
  0xd2   :  { %820 = vmatprep.subr.bf16.mxu0 %v6953_v4  ;;  %v6968_v17 = vld [vmem:[#allocation6 + $0xe4] ss:$16 sps:$4 sm:$0xff]   ;;  %v6970_v23 = vld [vmem:[#allocation6 + $0xe0] ss:$16 sps:$4 sm:$0xff]   ;;  %860 = vmatpush1.bf16.msra.mxu1 %v7003_v20  ;;  %v7009_v25 = vld [vmem:[#allocation6 + $0x48] ss:$16 sps:$4 sm:$0xff]  }
  0xd3   :  { %v6971_v24 = vld [vmem:[#allocation6 + $0x104] ss:$16 sps:$4 sm:$0xff]   ;;  %861 = vmatprep.subr.bf16.mxu1 %v7004_v22  ;;  %v7010_v26 = vld [vmem:[#allocation6 + $0x6c] ss:$16 sps:$4 sm:$0xff]   ;;  %v6973_v27 = vld [vmem:[#allocation6 + $0x100] ss:$16 sps:$4 sm:$0xff]  }
  0xd4   :  { %v8550_v16 = vld.sshfl [vmem:[%s8976_s29] sm:$0x33 pattern:$0x76325410]  ;;  %v6974_v28 = vld [vmem:[#allocation6 + $0x124] ss:$16 sps:$4 sm:$0xff]  }
  0xd5   :  { %821 = vmatpush1.bf16.msra.mxu0 %v6955_v5  ;;  %v470_v18 = vcombine.high %v8550_v16, %v8550_v16  ;;  %v7015_v29 = vld [vmem:[#allocation6 + $0x68] ss:$16 sps:$4 sm:$0xff]   ;;  %v7016_v30 = vld [vmem:[#allocation6 + $0x8c] ss:$16 sps:$4 sm:$0xff]   ;;  %v6976_v31 = vld [vmem:[#allocation6 + $0x120] ss:$16 sps:$4 sm:$0xff]   ;;  %v8560_v58 = vpack.c.bf16 %v8550_v16, %v8550_v16 }
  0xd6   :  { %822 = vmatprep.subr.bf16.mxu0 %v6956_v6  ;;  %862 = vmatpush1.bf16.msra.mxu1 %v7009_v25  ;;  %v6977_v32 = vld [vmem:[#allocation6 + $0x144] ss:$16 sps:$4 sm:$0xff]   ;;  %v7021_v33 = vld [vmem:[#allocation6 + $0x88] ss:$16 sps:$4 sm:$0xff]   ;;  %v7022_v34 = vld [vmem:[#allocation6 + $0xac] ss:$16 sps:$4 sm:$0xff]  }
  0xd7   :  { %v8554_v21 = vpack.c.bf16 %v470_v18, %v470_v18  ;;  %863 = vmatprep.subr.bf16.mxu1 %v7010_v26  ;;  %v6979_v35 = vld [vmem:[#allocation6 + $0x140] ss:$16 sps:$4 sm:$0xff]   ;;  %v6980_v36 = vld [vmem:[#allocation6 + $0x164] ss:$16 sps:$4 sm:$0xff]   ;;  %v7027_v37 = vld [vmem:[#allocation6 + $0xa8] ss:$16 sps:$4 sm:$0xff]  }
  0xd8   :  { %v7028_v38 = vld [vmem:[#allocation6 + $0xcc] ss:$16 sps:$4 sm:$0xff]   ;;  %v6982_v39 = vld [vmem:[#allocation6 + $0x160] ss:$16 sps:$4 sm:$0xff]   ;;  %v6983_v40 = vld [vmem:[#allocation6 + $0x184] ss:$16 sps:$4 sm:$0xff]  }
  0xd9   :  { %823 = vmatpush1.bf16.msra.mxu0 %v6958_v7  ;;  %848 = vmatprep.mubr.bf16.mxu0 %v8554_v21  ;;  %v7033_v41 = vld [vmem:[#allocation6 + $0xc8] ss:$16 sps:$4 sm:$0xff]   ;;  %v7034_v42 = vld [vmem:[#allocation6 + $0xec] ss:$16 sps:$4 sm:$0xff]   ;;  %v6985_v43 = vld [vmem:[#allocation6 + $0x180] ss:$16 sps:$4 sm:$0xff]  }
  0xda   :  { %824 = vmatprep.subr.bf16.mxu0 %v6959_v8  ;;  %889 = vmatprep.mubr.bf16.mxu1 %v8554_v21  ;;  %v6986_v44 = vld [vmem:[#allocation6 + $0x1a4] ss:$16 sps:$4 sm:$0xff]   ;;  %v7039_v45 = vld [vmem:[#allocation6 + $0xe8] ss:$16 sps:$4 sm:$0xff]   ;;  %v7040_v46 = vld [vmem:[#allocation6 + $0x10c] ss:$16 sps:$4 sm:$0xff]  }
  0xdb   :  { %864 = vmatpush1.bf16.msra.mxu1 %v7015_v29  ;;  %v6988_v47 = vld [vmem:[#allocation6 + $0x1a0] ss:$16 sps:$4 sm:$0xff]   ;;  %v6989_v48 = vld [vmem:[#allocation6 + $0x1c4] ss:$16 sps:$4 sm:$0xff]   ;;  %v7045_v49 = vld [vmem:[#allocation6 + $0x108] ss:$16 sps:$4 sm:$0xff]  }
  0xdc   :  { %865 = vmatprep.subr.bf16.mxu1 %v7016_v30  ;;  %v7046_v50 = vld [vmem:[#allocation6 + $0x12c] ss:$16 sps:$4 sm:$0xff]   ;;  %v6991_v51 = vld [vmem:[#allocation6 + $0x1c0] ss:$16 sps:$4 sm:$0xff]   ;;  %v6992_v52 = vld [vmem:[#allocation6 + $0x1e4] ss:$16 sps:$4 sm:$0xff]  }
  0xdd   :  { %825 = vmatpush1.bf16.msra.mxu0 %v6961_v9  ;;  %v7051_v53 = vld [vmem:[#allocation6 + $0x128] ss:$16 sps:$4 sm:$0xff]   ;;  %v7052_v54 = vld [vmem:[#allocation6 + $0x14c] ss:$16 sps:$4 sm:$0xff]   ;;  %v6996_v55 = vld [vmem:[#allocation6 + $0x1e0] ss:$16 sps:$4 sm:$0xff]  }
  0xde   :  { %826 = vmatprep.subr.bf16.mxu0 %v6962_v10  ;;  %v7002_v56 = vld [vmem:[#allocation2 + $0x4] ss:$16 sps:$4 sm:$0xff]   ;;  %v7057_v57 = vld [vmem:[#allocation6 + $0x148] ss:$16 sps:$4 sm:$0xff]   ;;  %v7058_v59 = vld [vmem:[#allocation6 + $0x16c] ss:$16 sps:$4 sm:$0xff]  }
  0xdf   :  { %866 = vmatpush1.bf16.msra.mxu1 %v7021_v33  ;;  %v7000_v60 = vld [vmem:[#allocation2] ss:$16 sps:$4 sm:$0xff]   ;;  %v7008_v61 = vld [vmem:[#allocation2 + $0x24] ss:$16 sps:$4 sm:$0xff]   ;;  %v7063_v62 = vld [vmem:[#allocation6 + $0x168] ss:$16 sps:$4 sm:$0xff]  }
  0xe0   :  { %867 = vmatprep.subr.bf16.mxu1 %v7022_v34  ;;  %v7064_v63 = vld [vmem:[#allocation6 + $0x18c] ss:$16 sps:$4 sm:$0xff]   ;;  %v7006_v0 = vld [vmem:[#allocation2 + $0x20] ss:$16 sps:$4 sm:$0xff]   ;;  %v7014_v1 = vld [vmem:[#allocation2 + $0x44] ss:$16 sps:$4 sm:$0xff]  }
  0xe1   :  { %827 = vmatpush1.bf16.msra.mxu0 %v6964_v11  ;;  %v7069_v2 = vld [vmem:[#allocation6 + $0x188] ss:$16 sps:$4 sm:$0xff]   ;;  %v7070_v3 = vld [vmem:[#allocation6 + $0x1ac] ss:$16 sps:$4 sm:$0xff]   ;;  %v7012_v4 = vld [vmem:[#allocation2 + $0x40] ss:$16 sps:$4 sm:$0xff]  }
  0xe2   :  { %828 = vmatprep.subr.bf16.mxu0 %v6965_v12  ;;  %v7020_v5 = vld [vmem:[#allocation2 + $0x64] ss:$16 sps:$4 sm:$0xff]   ;;  %v7075_v6 = vld [vmem:[#allocation6 + $0x1a8] ss:$16 sps:$4 sm:$0xff]   ;;  %v7076_v7 = vld [vmem:[#allocation6 + $0x1cc] ss:$16 sps:$4 sm:$0xff]  }
  0xe3   :  { %868 = vmatpush1.bf16.msra.mxu1 %v7027_v37  ;;  %v7018_v8 = vld [vmem:[#allocation2 + $0x60] ss:$16 sps:$4 sm:$0xff]   ;;  %v7026_v9 = vld [vmem:[#allocation2 + $0x84] ss:$16 sps:$4 sm:$0xff]   ;;  %v7081_v10 = vld [vmem:[#allocation6 + $0x1c8] ss:$16 sps:$4 sm:$0xff]  }
  0xe4   :  { %869 = vmatprep.subr.bf16.mxu1 %v7028_v38  ;;  %v7082_v11 = vld [vmem:[#allocation6 + $0x1ec] ss:$16 sps:$4 sm:$0xff]   ;;  %v7024_v12 = vld [vmem:[#allocation2 + $0x80] ss:$16 sps:$4 sm:$0xff]   ;;  %v7032_v13 = vld [vmem:[#allocation2 + $0xa4] ss:$16 sps:$4 sm:$0xff]  }
  0xe5   :  { %829 = vmatpush1.bf16.msra.mxu0 %v6967_v14  ;;  %v7087_v14 = vld [vmem:[#allocation6 + $0x1e8] ss:$16 sps:$4 sm:$0xff]   ;;  %v7093_v15 = vld [vmem:[#allocation2 + $0xc] ss:$16 sps:$4 sm:$0xff]   ;;  %v7030_v16 = vld [vmem:[#allocation2 + $0xa0] ss:$16 sps:$4 sm:$0xff]  }
  0xe6   :  { %830 = vmatprep.subr.bf16.mxu0 %v6968_v17  ;;  %v7038_v17 = vld [vmem:[#allocation2 + $0xc4] ss:$16 sps:$4 sm:$0xff]   ;;  %v7091_v18 = vld [vmem:[#allocation2 + $0x8] ss:$16 sps:$4 sm:$0xff]   ;;  %v7096_v19 = vld [vmem:[#allocation2 + $0x2c] ss:$16 sps:$4 sm:$0xff]  }
  0xe7   :  { %870 = vmatpush1.bf16.msra.mxu1 %v7033_v41  ;;  %v7036_v20 = vld [vmem:[#allocation2 + $0xc0] ss:$16 sps:$4 sm:$0xff]   ;;  %v7044_v22 = vld [vmem:[#allocation2 + $0xe4] ss:$16 sps:$4 sm:$0xff]   ;;  %v7103_v34 = vld [vmem:[#allocation2 + $0x88] ss:$16 sps:$4 sm:$0xff]  }
  0xe8   :  { %871 = vmatprep.subr.bf16.mxu1 %v7034_v42  ;;  %v7042_v25 = vld [vmem:[#allocation2 + $0xe0] ss:$16 sps:$4 sm:$0xff]   ;;  %v7050_v26 = vld [vmem:[#allocation2 + $0x104] ss:$16 sps:$4 sm:$0xff]   ;;  %v7106_v38 = vld [vmem:[#allocation2 + $0xa8] ss:$16 sps:$4 sm:$0xff]  }
  0xe9   :  { %831 = vmatpush1.bf16.msra.mxu0 %v6970_v23  ;;  %v7094_v23 = vld [vmem:[#allocation2 + $0x28] ss:$16 sps:$4 sm:$0xff]   ;;  %v7048_v29 = vld [vmem:[#allocation2 + $0x100] ss:$16 sps:$4 sm:$0xff]   ;;  %v7056_v30 = vld [vmem:[#allocation2 + $0x124] ss:$16 sps:$4 sm:$0xff]  }
  0xea   :  { %832 = vmatprep.subr.bf16.mxu0 %v6971_v24  ;;  %v7099_v24 = vld [vmem:[#allocation2 + $0x4c] ss:$16 sps:$4 sm:$0xff]   ;;  %v7062_v33 = vld [vmem:[#allocation2 + $0x144] ss:$16 sps:$4 sm:$0xff]   ;;  %v7109_v42 = vld [vmem:[#allocation2 + $0xc8] ss:$16 sps:$4 sm:$0xff]  }
  0xeb   :  { %872 = vmatpush1.bf16.msra.mxu1 %v7039_v45  ;;  %v7068_v37 = vld [vmem:[#allocation2 + $0x164] ss:$16 sps:$4 sm:$0xff]   ;;  %s8978_s1 = sld [smem:[#allocation25_spill]]  ;;  %s8979_s27 = sld [smem:[#allocation27_spill]] }
  0xec   :  { %873 = vmatprep.subr.bf16.mxu1 %v7040_v46  ;;  %v7074_v41 = vld [vmem:[#allocation2 + $0x184] ss:$16 sps:$4 sm:$0xff]   ;;  %v7112_v46 = vld [vmem:[#allocation2 + $0xe8] ss:$16 sps:$4 sm:$0xff]   ;;  %s8980_s11 = sld [smem:[#allocation29_spill]]  ;;  %s8981_s19 = sld [smem:[#allocation31_spill]] }
  0xed   :  { %833 = vmatpush1.bf16.msra.mxu0 %v6973_v27  ;;  %v7097_v27 = vld [vmem:[#allocation2 + $0x48] ss:$16 sps:$4 sm:$0xff]   ;;  %v7080_v45 = vld [vmem:[#allocation2 + $0x1a4] ss:$16 sps:$4 sm:$0xff]  }
  0xee   :  { %834 = vmatprep.subr.bf16.mxu0 %v6974_v28  ;;  %v7102_v28 = vld [vmem:[#allocation2 + $0x6c] ss:$16 sps:$4 sm:$0xff]  }
  0xef   :  { %874 = vmatpush1.bf16.msra.mxu1 %v7045_v49  ;;  %v7086_v49 = vld [vmem:[#allocation2 + $0x1c4] ss:$16 sps:$4 sm:$0xff]  }
  0xf0   :  { %875 = vmatprep.subr.bf16.mxu1 %v7046_v50  ;;  %v7115_v50 = vld [vmem:[#allocation2 + $0x108] ss:$16 sps:$4 sm:$0xff]  }
  0xf1   :  { %835 = vmatpush1.bf16.msra.mxu0 %v6976_v31  ;;  %v7100_v31 = vld [vmem:[#allocation2 + $0x68] ss:$16 sps:$4 sm:$0xff]  }
  0xf2   :  { %836 = vmatprep.subr.bf16.mxu0 %v6977_v32  ;;  %v7105_v32 = vld [vmem:[#allocation2 + $0x8c] ss:$16 sps:$4 sm:$0xff]  }
  0xf3   :  { %876 = vmatpush1.bf16.msra.mxu1 %v7051_v53  ;;  %v7090_v53 = vld [vmem:[#allocation2 + $0x1e4] ss:$16 sps:$4 sm:$0xff]  }
  0xf4   :  { %877 = vmatprep.subr.bf16.mxu1 %v7052_v54  ;;  %v7118_v54 = vld [vmem:[#allocation2 + $0x128] ss:$16 sps:$4 sm:$0xff]  }
  0xf5   :  { %837 = vmatpush1.bf16.msra.mxu0 %v6979_v35  ;;  %v7108_v35 = vld [vmem:[#allocation2 + $0xac] ss:$16 sps:$4 sm:$0xff]  }
  0xf6   :  { %838 = vmatprep.subr.bf16.mxu0 %v6980_v36  ;;  %v7060_v36 = vld [vmem:[#allocation2 + $0x140] ss:$16 sps:$4 sm:$0xff]  }
  0xf7   :  { %878 = vmatpush1.bf16.msra.mxu1 %v7057_v57  ;;  %v7121_v57 = vld [vmem:[#allocation2 + $0x148] ss:$16 sps:$4 sm:$0xff]  }
  0xf8   :  { %879 = vmatprep.subr.bf16.mxu1 %v7058_v59  ;;  %v7141_v59 = vld [vmem:[#allocation4 + $0x4] ss:$16 sps:$4 sm:$0xff]  }
  0xf9   :  { %839 = vmatpush1.bf16.msra.mxu0 %v6982_v39  ;;  %v7111_v39 = vld [vmem:[#allocation2 + $0xcc] ss:$16 sps:$4 sm:$0xff]  }
  0xfa   :  { %840 = vmatprep.subr.bf16.mxu0 %v6983_v40  ;;  %v7066_v40 = vld [vmem:[#allocation2 + $0x160] ss:$16 sps:$4 sm:$0xff]  }
  0xfb   :  { %880 = vmatpush1.bf16.msra.mxu1 %v7063_v62  ;;  %v7147_v62 = vld [vmem:[#allocation4 + $0x24] ss:$16 sps:$4 sm:$0xff]  }
  0xfc   :  { %881 = vmatprep.subr.bf16.mxu1 %v7064_v63  ;;  %v7124_v63 = vld [vmem:[#allocation2 + $0x168] ss:$16 sps:$4 sm:$0xff]  }
  0xfd   :  { %841 = vmatpush1.bf16.msra.mxu0 %v6985_v43  ;;  %v7114_v43 = vld [vmem:[#allocation2 + $0xec] ss:$16 sps:$4 sm:$0xff]  }
  0xfe   :  { %842 = vmatprep.subr.bf16.mxu0 %v6986_v44  ;;  %v7072_v44 = vld [vmem:[#allocation2 + $0x180] ss:$16 sps:$4 sm:$0xff]  }
  0xff   :  { %882 = vmatpush1.bf16.msra.mxu1 %v7069_v2  ;;  %v7153_v2 = vld [vmem:[#allocation4 + $0x44] ss:$16 sps:$4 sm:$0xff]  }
 0x100   :  { %883 = vmatprep.subr.bf16.mxu1 %v7070_v3  ;;  %v7127_v3 = vld [vmem:[#allocation2 + $0x188] ss:$16 sps:$4 sm:$0xff]  }
 0x101   :  { %843 = vmatpush1.bf16.msra.mxu0 %v6988_v47  ;;  %v7117_v47 = vld [vmem:[#allocation2 + $0x10c] ss:$16 sps:$4 sm:$0xff]  }
 0x102   :  { %844 = vmatprep.subr.bf16.mxu0 %v6989_v48  ;;  %v7078_v48 = vld [vmem:[#allocation2 + $0x1a0] ss:$16 sps:$4 sm:$0xff]  }
 0x103   :  { %884 = vmatpush1.bf16.msra.mxu1 %v7075_v6  ;;  %v7159_v6 = vld [vmem:[#allocation4 + $0x64] ss:$16 sps:$4 sm:$0xff]  }
 0x104   :  { %885 = vmatprep.subr.bf16.mxu1 %v7076_v7  ;;  %v7130_v7 = vld [vmem:[#allocation2 + $0x1a8] ss:$16 sps:$4 sm:$0xff]  }
 0x105   :  { %845 = vmatpush1.bf16.msra.mxu0 %v6991_v51  ;;  %v7120_v51 = vld [vmem:[#allocation2 + $0x12c] ss:$16 sps:$4 sm:$0xff]  }
 0x106   :  { %846 = vmatprep.subr.bf16.mxu0 %v6992_v52  ;;  %v7084_v52 = vld [vmem:[#allocation2 + $0x1c0] ss:$16 sps:$4 sm:$0xff]  }
 0x107   :  { %886 = vmatpush1.bf16.msra.mxu1 %v7081_v10  ;;  %v7165_v10 = vld [vmem:[#allocation4 + $0x84] ss:$16 sps:$4 sm:$0xff]  }
 0x108   :  { %887 = vmatprep.subr.bf16.mxu1 %v7082_v11  ;;  %v7133_v11 = vld [vmem:[#allocation2 + $0x1c8] ss:$16 sps:$4 sm:$0xff]  }
 0x109   :  { %847 = vmatpush1.bf16.msra.mxu0 %v6996_v55  ;;  %v7088_v55 = vld [vmem:[#allocation2 + $0x1e0] ss:$16 sps:$4 sm:$0xff]  }
 0x10a   :  { %1239 = vmatprep.subr.bf16.mxu0 %v7002_v56  ;;  %v7123_v56 = vld [vmem:[#allocation2 + $0x14c] ss:$16 sps:$4 sm:$0xff]  }
 0x10b   :  { %888 = vmatpush1.bf16.msra.mxu1 %v7087_v14  ;;  %v7171_v14 = vld [vmem:[#allocation4 + $0xa4] ss:$16 sps:$4 sm:$0xff]  }
 0x10c   :  { %849 = vmatmul.mubr.bf16.vlgmr.msra.gmra.mrb[0].mxu0 %v8560_v58  ;;  %1280 = vmatprep.subr.bf16.mxu1 %v7093_v15  ;;  %v7136_v15 = vld [vmem:[#allocation2 + $0x1e8] ss:$16 sps:$4 sm:$0xff]  }
 0x10d   :  { %1240 = vmatpush1.bf16.msra.mxu0 %v7000_v60  ;;  %1271 = vmatprep.mubr.bf16.mxu0 %v8554_v21  ;;  %v7126_v60 = vld [vmem:[#allocation2 + $0x16c] ss:$16 sps:$4 sm:$0xff]  }
 0x10e   :  { %1241 = vmatprep.subr.bf16.mxu0 %v7008_v61  ;;  %890 = vmatmul.mubr.bf16.vlgmr.msra.gmra.mrb[0].mxu1 %v8560_v58  ;;  %v7139_v61 = vld [vmem:[#allocation4] ss:$16 sps:$4 sm:$0xff]  }
 0x10f   :  { %1281 = vmatpush1.bf16.msra.mxu1 %v7091_v18  ;;  %1312 = vmatprep.mubr.bf16.mxu1 %v8554_v21  ;;  %v7054_v21 = vld [vmem:[#allocation2 + $0x120] ss:$16 sps:$4 sm:$0xff]   ;;  %v7177_v18 = vld [vmem:[#allocation4 + $0xc4] ss:$16 sps:$4 sm:$0xff]  }
 0x110   :  { %1282 = vmatprep.subr.bf16.mxu1 %v7096_v19  ;;  %v7142_v19 = vld [vmem:[#allocation4 + $0x8] ss:$16 sps:$4 sm:$0xff]  }
 0x111   :  { %1242 = vmatpush1.bf16.msra.mxu0 %v7006_v0  ;;  %v7129_v0 = vld [vmem:[#allocation2 + $0x18c] ss:$16 sps:$4 sm:$0xff]  }
 0x112   :  { %1243 = vmatprep.subr.bf16.mxu0 %v7014_v1  ;;  %v7145_v1 = vld [vmem:[#allocation4 + $0x20] ss:$16 sps:$4 sm:$0xff]  }
 0x113   :  { %1283 = vmatpush1.bf16.msra.mxu1 %v7094_v23  ;;  %v7183_v23 = vld [vmem:[#allocation4 + $0xe4] ss:$16 sps:$4 sm:$0xff]  }
 0x114   :  { %1284 = vmatprep.subr.bf16.mxu1 %v7099_v24  ;;  %v7148_v24 = vld [vmem:[#allocation4 + $0x28] ss:$16 sps:$4 sm:$0xff]  }
 0x115   :  { %1244 = vmatpush1.bf16.msra.mxu0 %v7012_v4  ;;  %v7132_v4 = vld [vmem:[#allocation2 + $0x1ac] ss:$16 sps:$4 sm:$0xff]  }
 0x116   :  { %1245 = vmatprep.subr.bf16.mxu0 %v7020_v5  ;;  %v7151_v5 = vld [vmem:[#allocation4 + $0x40] ss:$16 sps:$4 sm:$0xff]  }
 0x117   :  { %1285 = vmatpush1.bf16.msra.mxu1 %v7097_v27  ;;  %v7189_v27 = vld [vmem:[#allocation4 + $0x104] ss:$16 sps:$4 sm:$0xff]  }
 0x118   :  { %1286 = vmatprep.subr.bf16.mxu1 %v7102_v28  ;;  %v7154_v28 = vld [vmem:[#allocation4 + $0x48] ss:$16 sps:$4 sm:$0xff]  }
 0x119   :  { %1246 = vmatpush1.bf16.msra.mxu0 %v7018_v8  ;;  %v7135_v8 = vld [vmem:[#allocation2 + $0x1cc] ss:$16 sps:$4 sm:$0xff]  }
 0x11a   :  { %1247 = vmatprep.subr.bf16.mxu0 %v7026_v9  ;;  %v7157_v9 = vld [vmem:[#allocation4 + $0x60] ss:$16 sps:$4 sm:$0xff]  }
 0x11b   :  { %1287 = vmatpush1.bf16.msra.mxu1 %v7100_v31  ;;  %v7195_v31 = vld [vmem:[#allocation4 + $0x124] ss:$16 sps:$4 sm:$0xff]  }
 0x11c   :  { %1288 = vmatprep.subr.bf16.mxu1 %v7105_v32  ;;  %v7160_v32 = vld [vmem:[#allocation4 + $0x68] ss:$16 sps:$4 sm:$0xff]  }
 0x11d   :  { %1248 = vmatpush1.bf16.msra.mxu0 %v7024_v12  ;;  %v7138_v12 = vld [vmem:[#allocation2 + $0x1ec] ss:$16 sps:$4 sm:$0xff]  }
 0x11e   :  { %1249 = vmatprep.subr.bf16.mxu0 %v7032_v13  ;;  %v7163_v13 = vld [vmem:[#allocation4 + $0x80] ss:$16 sps:$4 sm:$0xff]  }
 0x11f   :  { %1289 = vmatpush1.bf16.msra.mxu1 %v7103_v34  ;;  %v7166_v34 = vld [vmem:[#allocation4 + $0x88] ss:$16 sps:$4 sm:$0xff]  }
 0x120   :  { %1290 = vmatprep.subr.bf16.mxu1 %v7108_v35  ;;  %v7174_v35 = vld [vmem:[#allocation4 + $0xac] ss:$16 sps:$4 sm:$0xff]  }
 0x121   :  { %1250 = vmatpush1.bf16.msra.mxu0 %v7030_v16  ;;  %v7144_v16 = vld [vmem:[#allocation4 + $0xc] ss:$16 sps:$4 sm:$0xff]  }
 0x122   :  { %1251 = vmatprep.subr.bf16.mxu0 %v7038_v17  ;;  %v7169_v17 = vld [vmem:[#allocation4 + $0xa0] ss:$16 sps:$4 sm:$0xff]  }
 0x123   :  { %1291 = vmatpush1.bf16.msra.mxu1 %v7106_v38  ;;  %v7172_v38 = vld [vmem:[#allocation4 + $0xa8] ss:$16 sps:$4 sm:$0xff]  }
 0x124   :  { %1292 = vmatprep.subr.bf16.mxu1 %v7111_v39  ;;  %v7180_v39 = vld [vmem:[#allocation4 + $0xcc] ss:$16 sps:$4 sm:$0xff]  }
 0x125   :  { %1252 = vmatpush1.bf16.msra.mxu0 %v7036_v20  ;;  %v7150_v20 = vld [vmem:[#allocation4 + $0x2c] ss:$16 sps:$4 sm:$0xff]  }
 0x126   :  { %1253 = vmatprep.subr.bf16.mxu0 %v7044_v22  ;;  %v7175_v22 = vld [vmem:[#allocation4 + $0xc0] ss:$16 sps:$4 sm:$0xff]  }
 0x127   :  { %1293 = vmatpush1.bf16.msra.mxu1 %v7109_v42  ;;  %v7178_v42 = vld [vmem:[#allocation4 + $0xc8] ss:$16 sps:$4 sm:$0xff]  }
 0x128   :  { %1294 = vmatprep.subr.bf16.mxu1 %v7114_v43  ;;  %v7186_v43 = vld [vmem:[#allocation4 + $0xec] ss:$16 sps:$4 sm:$0xff]  }
 0x129   :  { %1254 = vmatpush1.bf16.msra.mxu0 %v7042_v25  ;;  %v7156_v25 = vld [vmem:[#allocation4 + $0x4c] ss:$16 sps:$4 sm:$0xff]  }
 0x12a   :  { %1255 = vmatprep.subr.bf16.mxu0 %v7050_v26  ;;  %v7181_v26 = vld [vmem:[#allocation4 + $0xe0] ss:$16 sps:$4 sm:$0xff]  }
 0x12b   :  { %1295 = vmatpush1.bf16.msra.mxu1 %v7112_v46  ;;  %v7184_v46 = vld [vmem:[#allocation4 + $0xe8] ss:$16 sps:$4 sm:$0xff]  }
 0x12c   :  { %1296 = vmatprep.subr.bf16.mxu1 %v7117_v47  ;;  %v7192_v47 = vld [vmem:[#allocation4 + $0x10c] ss:$16 sps:$4 sm:$0xff]  }
 0x12d   :  { %1256 = vmatpush1.bf16.msra.mxu0 %v7048_v29  ;;  %v7162_v29 = vld [vmem:[#allocation4 + $0x6c] ss:$16 sps:$4 sm:$0xff]  }
 0x12e   :  { %1257 = vmatprep.subr.bf16.mxu0 %v7056_v30  ;;  %v7187_v30 = vld [vmem:[#allocation4 + $0x100] ss:$16 sps:$4 sm:$0xff]  }
 0x12f   :  { %1297 = vmatpush1.bf16.msra.mxu1 %v7115_v50  ;;  %v7198_v50 = vld [vmem:[#allocation4 + $0x12c] ss:$16 sps:$4 sm:$0xff]  }
 0x130   :  { %1298 = vmatprep.subr.bf16.mxu1 %v7120_v51  ;;  %v7196_v51 = vld [vmem:[#allocation4 + $0x128] ss:$16 sps:$4 sm:$0xff]  }
 0x131   :  { %1258 = vmatpush1.bf16.msra.mxu0 %v7054_v21  ;;  %v7168_v21 = vld [vmem:[#allocation4 + $0x8c] ss:$16 sps:$4 sm:$0xff]  }
 0x132   :  { %1259 = vmatprep.subr.bf16.mxu0 %v7062_v33  ;;  %v7201_v33 = vld [vmem:[#allocation4 + $0x144] ss:$16 sps:$4 sm:$0xff]  }
 0x133   :  { %1299 = vmatpush1.bf16.msra.mxu1 %v7118_v54  ;;  %v7210_v54 = vld [vmem:[#allocation4 + $0x16c] ss:$16 sps:$4 sm:$0xff]  }
 0x134   :  { %1300 = vmatprep.subr.bf16.mxu1 %v7123_v56  ;;  %v7216_v56 = vld [vmem:[#allocation4 + $0x18c] ss:$16 sps:$4 sm:$0xff]  }
 0x135   :  { %1260 = vmatpush1.bf16.msra.mxu0 %v7060_v36  ;;  %v7199_v36 = vld [vmem:[#allocation4 + $0x140] ss:$16 sps:$4 sm:$0xff]  }
 0x136   :  { %1261 = vmatprep.subr.bf16.mxu0 %v7068_v37  ;;  %v7207_v37 = vld [vmem:[#allocation4 + $0x164] ss:$16 sps:$4 sm:$0xff]  }
 0x137   :  { %1301 = vmatpush1.bf16.msra.mxu1 %v7121_v57  ;;  %v7214_v57 = vld [vmem:[#allocation4 + $0x188] ss:$16 sps:$4 sm:$0xff]  }
 0x138   :  { %1302 = vmatprep.subr.bf16.mxu1 %v7126_v60  ;;  %v7220_v60 = vld [vmem:[#allocation4 + $0x1a8] ss:$16 sps:$4 sm:$0xff]  }
 0x139   :  { %1262 = vmatpush1.bf16.msra.mxu0 %v7066_v40  ;;  %v7205_v40 = vld [vmem:[#allocation4 + $0x160] ss:$16 sps:$4 sm:$0xff]  }
 0x13a   :  { %1263 = vmatprep.subr.bf16.mxu0 %v7074_v41  ;;  %v7213_v41 = vld [vmem:[#allocation4 + $0x184] ss:$16 sps:$4 sm:$0xff]  }
 0x13b   :  { %1303 = vmatpush1.bf16.msra.mxu1 %v7124_v63  ;;  %v7223_v63 = vld [vmem:[#allocation4 + $0x1c0] ss:$16 sps:$4 sm:$0xff]  }
 0x13c   :  { %1304 = vmatprep.subr.bf16.mxu1 %v7129_v0  ;;  %v7226_v0 = vld [vmem:[#allocation4 + $0x1c8] ss:$16 sps:$4 sm:$0xff]  }
 0x13d   :  { %1264 = vmatpush1.bf16.msra.mxu0 %v7072_v44  ;;  %v7211_v44 = vld [vmem:[#allocation4 + $0x180] ss:$16 sps:$4 sm:$0xff]  }
 0x13e   :  { %1265 = vmatprep.subr.bf16.mxu0 %v7080_v45  ;;  %v7219_v45 = vld [vmem:[#allocation4 + $0x1a4] ss:$16 sps:$4 sm:$0xff]  }
 0x13f   :  { %1305 = vmatpush1.bf16.msra.mxu1 %v7127_v3  ;;  %v7229_v3 = vld [vmem:[#allocation4 + $0x1e0] ss:$16 sps:$4 sm:$0xff]  }
 0x140   :  { %1306 = vmatprep.subr.bf16.mxu1 %v7132_v4  ;;  %v7232_v4 = vld [vmem:[#allocation4 + $0x1e8] ss:$16 sps:$4 sm:$0xff]  }
 0x141   :  { %1266 = vmatpush1.bf16.msra.mxu0 %v7078_v48  ;;  %v7217_v48 = vld [vmem:[#allocation4 + $0x1a0] ss:$16 sps:$4 sm:$0xff]  }
 0x142   :  { %1267 = vmatprep.subr.bf16.mxu0 %v7086_v49  ;;  %v7190_v49 = vld [vmem:[#allocation4 + $0x108] ss:$16 sps:$4 sm:$0xff]  }
 0x143   :  { %1307 = vmatpush1.bf16.msra.mxu1 %v7130_v7  ;;  %v476_v7 = vlaneseq }
 0x144   :  { %1308 = vmatprep.subr.bf16.mxu1 %v7135_v8 }
 0x145   :  { %1268 = vmatpush1.bf16.msra.mxu0 %v7084_v52  ;;  %v7204_v52 = vld [vmem:[#allocation4 + $0x14c] ss:$16 sps:$4 sm:$0xff]   ;;  %v8568_v8 = vshrl.u32 %v476_v7, 7 }
 0x146   :  { %1269 = vmatprep.subr.bf16.mxu0 %v7090_v53  ;;  %v7202_v53 = vld [vmem:[#allocation4 + $0x148] ss:$16 sps:$4 sm:$0xff]   ;;  %v7294_v7 = vld [vmem:[#allocation4 + $0x32c] ss:$16 sps:$4 sm:$0xff]  }
 0x147   :  { %1309 = vmatpush1.bf16.msra.mxu1 %v7133_v11  ;;  %v8579_v11 = vsub.s32 1, %v8568_v8 }
 0x148   :  { %1310 = vmatprep.subr.bf16.mxu1 %v7138_v12 }
 0x149   :  { %1270 = vmatpush1.bf16.msra.mxu0 %v7088_v55  ;;  %v7208_v55 = vld [vmem:[#allocation4 + $0x168] ss:$16 sps:$4 sm:$0xff]  }
 0x14a   :  { %1998 = vmatprep.subr.bf16.mxu0 %v7141_v59  ;;  %v7222_v59 = vld [vmem:[#allocation4 + $0x1ac] ss:$16 sps:$4 sm:$0xff]  }
 0x14b   :  { %1311 = vmatpush1.bf16.msra.mxu1 %v7136_v15 }
 0x14c   :  { %1272 = vmatmul.mubr.bf16.vlgmr.msra.gmra.mrb[4].mxu0 %v8560_v58  ;;  %2080 = vmatprep.subr.bf16.mxu1 %v7144_v16 }
 0x14d   :  { %1999 = vmatpush1.bf16.msra.mxu0 %v7139_v61  ;;  %v7225_v61 = vld [vmem:[#allocation4 + $0x1c4] ss:$16 sps:$4 sm:$0xff]  }
 0x14e   :  { %2000 = vmatprep.subr.bf16.mxu0 %v7147_v62  ;;  %1313 = vmatmul.mubr.bf16.vlgmr.msra.gmra.mrb[4].mxu1 %v8560_v58  ;;  %v7193_v58 = vld [vmem:[#allocation4 + $0x120] ss:$16 sps:$4 sm:$0xff]   ;;  %v7228_v62 = vld [vmem:[#allocation4 + $0x1cc] ss:$16 sps:$4 sm:$0xff]  }
 0x14f   :  { %2081 = vmatpush1.bf16.msra.mxu1 %v7142_v19 }
 0x150   :  { %2082 = vmatprep.subr.bf16.mxu1 %v7150_v20 }
 0x151   :  { %2001 = vmatpush1.bf16.msra.mxu0 %v7145_v1  ;;  %v7231_v1 = vld [vmem:[#allocation4 + $0x1e4] ss:$16 sps:$4 sm:$0xff]  }
 0x152   :  { %2002 = vmatprep.subr.bf16.mxu0 %v7153_v2  ;;  %v7234_v2 = vld [vmem:[#allocation4 + $0x1ec] ss:$16 sps:$4 sm:$0xff]  }
 0x153   :  { %2083 = vmatpush1.bf16.msra.mxu1 %v7148_v24  ;;  %v7235_v24 = vld [vmem:[#allocation4 + $0x200] ss:$16 sps:$4 sm:$0xff]  }
 0x154   :  { %2084 = vmatprep.subr.bf16.mxu1 %v7156_v25  ;;  %v7238_v25 = vld [vmem:[#allocation4 + $0x208] ss:$16 sps:$4 sm:$0xff]  }
 0x155   :  { %2003 = vmatpush1.bf16.msra.mxu0 %v7151_v5  ;;  %v7237_v5 = vld [vmem:[#allocation4 + $0x204] ss:$16 sps:$4 sm:$0xff]  }
 0x156   :  { %2004 = vmatprep.subr.bf16.mxu0 %v7159_v6  ;;  %v7240_v6 = vld [vmem:[#allocation4 + $0x20c] ss:$16 sps:$4 sm:$0xff]  }
 0x157   :  { %2085 = vmatpush1.bf16.msra.mxu1 %v7154_v28  ;;  %v7246_v28 = vld [vmem:[#allocation4 + $0x22c] ss:$16 sps:$4 sm:$0xff]  }
 0x158   :  { %2086 = vmatprep.subr.bf16.mxu1 %v7162_v29 }
 0x159   :  { %2005 = vmatpush1.bf16.msra.mxu0 %v7157_v9  ;;  %v8573_v9 = vld [vmem:[%s8977_s17] sm:$0xf] }
 0x15a   :  { %2006 = vmatprep.subr.bf16.mxu0 %v7165_v10  ;;  %v8576_v10 = vsub.s32 0, %v8568_v8 }
 0x15b   :  { %2087 = vmatpush1.bf16.msra.mxu1 %v7160_v32  ;;  %v7244_v32 = vld [vmem:[#allocation4 + $0x228] ss:$16 sps:$4 sm:$0xff]  }
 0x15c   :  { %2088 = vmatprep.subr.bf16.mxu1 %v7168_v21  ;;  %v902_v12 = vrot.slane %v8573_v9, %v8576_v10  ;;  %v7249_v21 = vld [vmem:[#allocation4 + $0x244] ss:$16 sps:$4 sm:$0xff]  }
 0x15d   :  { %2007 = vmatpush1.bf16.msra.mxu0 %v7163_v13  ;;  %v906_v13 = vrot.slane %v8573_v9, %v8579_v11 }
 0x15e   :  { %2008 = vmatprep.subr.bf16.mxu0 %v7171_v14 }
 0x15f   :  { %2089 = vmatpush1.bf16.msra.mxu1 %v7166_v34  ;;  %v7250_v34 = vld [vmem:[#allocation4 + $0x248] ss:$16 sps:$4 sm:$0xff]  }
 0x160   :  { %2090 = vmatprep.subr.bf16.mxu1 %v7174_v35  ;;  %v7255_v35 = vld [vmem:[#allocation4 + $0x264] ss:$16 sps:$4 sm:$0xff]  }
 0x161   :  { %2009 = vmatpush1.bf16.msra.mxu0 %v7169_v17 }
 0x162   :  { %2010 = vmatprep.subr.bf16.mxu0 %v7177_v18 }
 0x163   :  { %2091 = vmatpush1.bf16.msra.mxu1 %v7172_v38  ;;  %v7253_v38 = vld [vmem:[#allocation4 + $0x260] ss:$16 sps:$4 sm:$0xff]  }
 0x164   :  { %2092 = vmatprep.subr.bf16.mxu1 %v7180_v39  ;;  %v7256_v39 = vld [vmem:[#allocation4 + $0x268] ss:$16 sps:$4 sm:$0xff]  }
 0x165   :  { %2011 = vmatpush1.bf16.msra.mxu0 %v7175_v22 }
 0x166   :  { %2012 = vmatprep.subr.bf16.mxu0 %v7183_v23 }
 0x167   :  { %2093 = vmatpush1.bf16.msra.mxu1 %v7178_v42 }
 0x168   :  { %2094 = vmatprep.subr.bf16.mxu1 %v7186_v43 }
 0x169   :  { %2013 = vmatpush1.bf16.msra.mxu0 %v7181_v26 }
 0x16a   :  { %2014 = vmatprep.subr.bf16.mxu0 %v7189_v27  ;;  %v7243_v27 = vld [vmem:[#allocation4 + $0x224] ss:$16 sps:$4 sm:$0xff]  }
 0x16b   :  { %2095 = vmatpush1.bf16.msra.mxu1 %v7184_v46 }
 0x16c   :  { %2096 = vmatprep.subr.bf16.mxu1 %v7192_v47  ;;  %v7267_v47 = vld [vmem:[#allocation4 + $0x2a4] ss:$16 sps:$4 sm:$0xff]  }
 0x16d   :  { %2015 = vmatpush1.bf16.msra.mxu0 %v7187_v30 }
 0x16e   :  { %2016 = vmatprep.subr.bf16.mxu0 %v7195_v31  ;;  %v7241_v31 = vld [vmem:[#allocation4 + $0x220] ss:$16 sps:$4 sm:$0xff]  }
 0x16f   :  { %2097 = vmatpush1.bf16.msra.mxu1 %v7190_v49 }
 0x170   :  { %2098 = vmatprep.subr.bf16.mxu1 %v7198_v50 }
 0x171   :  { %2017 = vmatpush1.bf16.msra.mxu0 %v7193_v58  ;;  %v7252_v58 = vld [vmem:[#allocation4 + $0x24c] ss:$16 sps:$4 sm:$0xff]  }
 0x172   :  { %2018 = vmatprep.subr.bf16.mxu0 %v7201_v33  ;;  %v7247_v33 = vld [vmem:[#allocation4 + $0x240] ss:$16 sps:$4 sm:$0xff]  }
 0x173   :  { %2099 = vmatpush1.bf16.msra.mxu1 %v7196_v51 }
 0x174   :  { %2100 = vmatprep.subr.bf16.mxu1 %v7204_v52 }
 0x175   :  { %2019 = vmatpush1.bf16.msra.mxu0 %v7199_v36  ;;  %v7258_v36 = vld [vmem:[#allocation4 + $0x26c] ss:$16 sps:$4 sm:$0xff]  }
 0x176   :  { %2020 = vmatprep.subr.bf16.mxu0 %v7207_v37  ;;  %v8586_v37 = vsub.s32 3, %v8568_v8 }
 0x177   :  { %2101 = vmatpush1.bf16.msra.mxu1 %v7202_v53  ;;  %v7265_v53 = vld [vmem:[#allocation4 + $0x2a0] ss:$16 sps:$4 sm:$0xff]  }
 0x178   :  { %2102 = vmatprep.subr.bf16.mxu1 %v7210_v54  ;;  %v914_v42 = vrot.slane %v8573_v9, %v8586_v37  ;;  %v7268_v54 = vld [vmem:[#allocation4 + $0x2a8] ss:$16 sps:$4 sm:$0xff]  }
 0x179   :  { %2021 = vmatpush1.bf16.msra.mxu0 %v7205_v40  ;;  %v7261_v40 = vld [vmem:[#allocation4 + $0x284] ss:$16 sps:$4 sm:$0xff]  }
 0x17a   :  { %2022 = vmatprep.subr.bf16.mxu0 %v7213_v41  ;;  %v7264_v41 = vld [vmem:[#allocation4 + $0x28c] ss:$16 sps:$4 sm:$0xff]  }
 0x17b   :  { %2103 = vmatpush1.bf16.msra.mxu1 %v7208_v55  ;;  %v7273_v55 = vld [vmem:[#allocation4 + $0x2c4] ss:$16 sps:$4 sm:$0xff]  }
 0x17c   :  { %2104 = vmatprep.subr.bf16.mxu1 %v7216_v56  ;;  %v7276_v56 = vld [vmem:[#allocation4 + $0x2cc] ss:$16 sps:$4 sm:$0xff]  }
 0x17d   :  { %2023 = vmatpush1.bf16.msra.mxu0 %v7211_v44  ;;  %v7259_v44 = vld [vmem:[#allocation4 + $0x280] ss:$16 sps:$4 sm:$0xff]  }
 0x17e   :  { %2024 = vmatprep.subr.bf16.mxu0 %v7219_v45  ;;  %v7262_v45 = vld [vmem:[#allocation4 + $0x288] ss:$16 sps:$4 sm:$0xff]  }
 0x17f   :  { %2105 = vmatpush1.bf16.msra.mxu1 %v7214_v57 }
 0x180   :  { %2106 = vmatprep.subr.bf16.mxu1 %v7222_v59 }
 0x181   :  { %2025 = vmatpush1.bf16.msra.mxu0 %v7217_v48  ;;  %v7270_v48 = vld [vmem:[#allocation4 + $0x2ac] ss:$16 sps:$4 sm:$0xff]  }
 0x182   :  { %2026 = vmatprep.subr.bf16.mxu0 %v7225_v61  ;;  %v7274_v61 = vld [vmem:[#allocation4 + $0x2c8] ss:$16 sps:$4 sm:$0xff]  }
 0x183   :  { %2107 = vmatpush1.bf16.msra.mxu1 %v7220_v60  ;;  %v7271_v60 = vld [vmem:[#allocation4 + $0x2c0] ss:$16 sps:$4 sm:$0xff]  }
 0x184   :  { %2108 = vmatprep.subr.bf16.mxu1 %v7228_v62  ;;  %v7279_v62 = vld [vmem:[#allocation4 + $0x2e4] ss:$16 sps:$4 sm:$0xff]  }
 0x185   :  { %2027 = vmatpush1.bf16.msra.mxu0 %v7223_v63  ;;  %v7282_v63 = vld [vmem:[#allocation4 + $0x2ec] ss:$16 sps:$4 sm:$0xff]  }
 0x186   :  { %2028 = vmatprep.subr.bf16.mxu0 %v7231_v1  ;;  %v7280_v1 = vld [vmem:[#allocation4 + $0x2e8] ss:$16 sps:$4 sm:$0xff]  }
 0x187   :  { %2109 = vmatpush1.bf16.msra.mxu1 %v7226_v0  ;;  %v7277_v0 = vld [vmem:[#allocation4 + $0x2e0] ss:$16 sps:$4 sm:$0xff]  }
 0x188   :  { %2110 = vmatprep.subr.bf16.mxu1 %v7234_v2  ;;  %v7285_v2 = vld [vmem:[#allocation4 + $0x304] ss:$16 sps:$4 sm:$0xff]  }
 0x189   :  { %2029 = vmatpush1.bf16.msra.mxu0 %v7229_v3  ;;  %v7288_v3 = vld [vmem:[#allocation4 + $0x30c] ss:$16 sps:$4 sm:$0xff]  }
 0x18a   :  { %2039 = vmatprep.subr.bf16.mxu0 %v7237_v5  ;;  %v7286_v5 = vld [vmem:[#allocation4 + $0x308] ss:$16 sps:$4 sm:$0xff]  }
 0x18b   :  { %2111 = vmatpush1.bf16.msra.mxu1 %v7232_v4  ;;  %v7283_v4 = vld [vmem:[#allocation4 + $0x300] ss:$16 sps:$4 sm:$0xff]  }
 0x18c   :  { %2121 = vmatprep.subr.bf16.mxu1 %v7240_v6  ;;  %v7291_v6 = vld [vmem:[#allocation4 + $0x324] ss:$16 sps:$4 sm:$0xff]  }
 0x21f   :  { %v1273_v14 = vpop.f32.mrb[4].mxu0 }
 0x220   :  { %v1274_v15 = vadd.f32 %v1273_v14, %v902_v12  ;;  %v1275_v16 = vpop.f32.mrb[5].mxu0  ;;  %v7289_v12 = vld [vmem:[#allocation4 + $0x320] ss:$16 sps:$4 sm:$0xff]   ;;  %v7297_v14 = vld [vmem:[#allocation4 + $0x344] ss:$16 sps:$4 sm:$0xff]  }
 0x221   :  { %v1276_v17 = vadd.f32 %v1275_v16, %v906_v13  ;;  %v1277_v18 = vpop.f32.mrb[6].mxu0  ;;  %v8590_v43 = vpop.f32.mrb[4].mxu1  ;;  %v7292_v13 = vld [vmem:[#allocation4 + $0x328] ss:$16 sps:$4 sm:$0xff]   ;;  %v7295_v16 = vld [vmem:[#allocation4 + $0x340] ss:$16 sps:$4 sm:$0xff]  }
 0x222   :  { %vm1321_vm0 = vcmp.ge.f32.partialorder %v1274_v15, 0.0  ;;  %v1325_v19 = vmul.f32 0.01, %v1274_v15  ;;  %v1278_v20 = vpop.f32.mrb[7].mxu0  ;;  %v1316_v46 = vpop.f32.mrb[5].mxu1 }
 0x223   :  { %vm1322_vm1 = vcmp.ge.f32.partialorder %v1276_v17, 0.0  ;;  %v1326_v22 = vmul.f32 0.01, %v1276_v17  ;;  %v1317_v49 = vadd.f32 %v1316_v46, %v914_v42  ;;  %v1318_v50 = vpop.f32.mrb[6].mxu1  ;;  %v7303_v18 = vld [vmem:[#allocation4 + $0x364] ss:$16 sps:$4 sm:$0xff]  }
 0x224   :  { %v1329_v23 = vsel %vm1321_vm0, %v1274_v15, %v1325_v19  ;;  %v1319_v51 = vpop.f32.mrb[7].mxu1  ;;  %v7300_v15 = vld [vmem:[#allocation4 + $0x34c] ss:$16 sps:$4 sm:$0xff]   ;;  %v7301_v20 = vld [vmem:[#allocation4 + $0x360] ss:$16 sps:$4 sm:$0xff]  }
 0x225   :  { %v1330_v26 = vsel %vm1322_vm1, %v1276_v17, %v1326_v22  ;;  %v1333_v30 = vpack.c.bf16 %v1329_v23, %v1329_v23  ;;  %vm1324_vm2 = vcmp.ge.f32.partialorder %v1317_v49, 0.0  ;;  %v1328_v52 = vmul.f32 0.01, %v1317_v49  ;;  %v7298_v17 = vld [vmem:[#allocation4 + $0x348] ss:$16 sps:$4 sm:$0xff]  }
 0x226   :  { %v1334_v29 = vpack.c.bf16 %v1330_v26, %v1330_v26  ;;  %v7306_v19 = vld [vmem:[#allocation4 + $0x36c] ss:$16 sps:$4 sm:$0xff]   ;;  %v7304_v22 = vld [vmem:[#allocation4 + $0x368] ss:$16 sps:$4 sm:$0xff]   ;;  %v7309_v23 = vld [vmem:[#allocation4 + $0x384] ss:$16 sps:$4 sm:$0xff]  }
 0x227   :  { %v1332_v57 = vsel %vm1324_vm2, %v1317_v49, %v1328_v52  ;;  %v7307_v26 = vld [vmem:[#allocation4 + $0x380] ss:$16 sps:$4 sm:$0xff]   ;;  %v7339_v46 = vld [vmem:[#allocation7 + $0x24] ss:$16 sps:$4 sm:$0xff]   ;;  %v7340_v49 = vld [vmem:[#allocation7 + $0x28] ss:$16 sps:$4 sm:$0xff]  }
 0x228   :  { %2030 = vmatprep.mubr.bf16.mxu0 %v1334_v29  ;;  %2112 = vmatprep.mubr.bf16.mxu1 %v1334_v29  ;;  %v1336_v59 = vpack.c.bf16 %v1332_v57, %v1332_v57  ;;  %v7318_v29 = vld [vmem:[#allocation4 + $0x3ac] ss:$16 sps:$4 sm:$0xff]   ;;  %v7345_v50 = vld [vmem:[#allocation7 + $0x44] ss:$16 sps:$4 sm:$0xff]   ;;  %v7343_v52 = vld [vmem:[#allocation7 + $0x40] ss:$16 sps:$4 sm:$0xff]  }
 0x229   :  { %2031 = vmatmul.mubr.bf16.vlgmr.msra.gmra.mrb[0].mxu0 %v1333_v30  ;;  %2113 = vmatmul.mubr.bf16.vlgmr.msra.gmra.mrb[0].mxu1 %v1333_v30  ;;  %v7348_v51 = vld [vmem:[#allocation7 + $0x4c] ss:$16 sps:$4 sm:$0xff]   ;;  %v7352_v57 = vld [vmem:[#allocation7 + $0x68] ss:$16 sps:$4 sm:$0xff]  }
 0x22a   :  { %2040 = vmatpush1.bf16.msra.mxu0 %v7235_v24  ;;  %2122 = vmatpush1.bf16.msra.mxu1 %v7238_v25  ;;  %v7312_v24 = vld [vmem:[#allocation4 + $0x38c] ss:$16 sps:$4 sm:$0xff]   ;;  %v8593_v25 = vsub.s32 2, %v8568_v8 }
 0x22b   :  { %2041 = vmatprep.subr.bf16.mxu0 %v7243_v27  ;;  %2123 = vmatprep.subr.bf16.mxu1 %v7246_v28  ;;  %v7310_v27 = vld [vmem:[#allocation4 + $0x388] ss:$16 sps:$4 sm:$0xff]   ;;  %v7315_v28 = vld [vmem:[#allocation4 + $0x3a4] ss:$16 sps:$4 sm:$0xff]   ;;  %v7324_v8 = vld [vmem:[#allocation4 + $0x3cc] ss:$16 sps:$4 sm:$0xff]  }
 0x22c   :  { %2071 = vmatprep.mubr.bf16.mxu0 %v1336_v59  ;;  %2153 = vmatprep.mubr.bf16.mxu1 %v1336_v59  ;;  %v910_v30 = vrot.slane %v8573_v9, %v8593_v25  ;;  %v7325_v9 = vld [vmem:[#allocation4 + $0x3e0] ss:$16 sps:$4 sm:$0xff]   ;;  %v7357_v59 = vld [vmem:[#allocation7 + $0x84] ss:$16 sps:$4 sm:$0xff]  }
 0x22e   :  { %2042 = vmatpush1.bf16.msra.mxu0 %v7241_v31  ;;  %2124 = vmatpush1.bf16.msra.mxu1 %v7244_v32  ;;  %v7313_v31 = vld [vmem:[#allocation4 + $0x3a0] ss:$16 sps:$4 sm:$0xff]   ;;  %v7316_v32 = vld [vmem:[#allocation4 + $0x3a8] ss:$16 sps:$4 sm:$0xff]  }
 0x22f   :  { %2043 = vmatprep.subr.bf16.mxu0 %v7249_v21  ;;  %2125 = vmatprep.subr.bf16.mxu1 %v7252_v58  ;;  %v7321_v21 = vld [vmem:[#allocation4 + $0x3c4] ss:$16 sps:$4 sm:$0xff]   ;;  %v1315_v58 = vadd.f32 %v8590_v43, %v910_v30  ;;  %v7331_v43 = vld [vmem:[#allocation7] ss:$16 sps:$4 sm:$0xff]   ;;  %v7402_v30 = vld [vmem:[#allocation7 + $0x16c] ss:$16 sps:$4 sm:$0xff]  }
 0x231   :  { %vm1323_vm3 = vcmp.ge.f32.partialorder %v1315_v58, 0.0 }
 0x232   :  { %2044 = vmatpush1.bf16.msra.mxu0 %v7247_v33  ;;  %2126 = vmatpush1.bf16.msra.mxu1 %v7250_v34  ;;  %v7319_v33 = vld [vmem:[#allocation4 + $0x3c0] ss:$16 sps:$4 sm:$0xff]   ;;  %v7322_v34 = vld [vmem:[#allocation4 + $0x3c8] ss:$16 sps:$4 sm:$0xff]  }
 0x233   :  { %2045 = vmatprep.subr.bf16.mxu0 %v7255_v35  ;;  %2127 = vmatprep.subr.bf16.mxu1 %v7258_v36  ;;  %v7327_v35 = vld [vmem:[#allocation4 + $0x3e4] ss:$16 sps:$4 sm:$0xff]   ;;  %v7330_v36 = vld [vmem:[#allocation4 + $0x3ec] ss:$16 sps:$4 sm:$0xff]  }
 0x236   :  { %2046 = vmatpush1.bf16.msra.mxu0 %v7253_v38  ;;  %2128 = vmatpush1.bf16.msra.mxu1 %v7256_v39  ;;  %v1327_v38 = vmul.f32 0.01, %v1315_v58  ;;  %v7328_v39 = vld [vmem:[#allocation4 + $0x3e8] ss:$16 sps:$4 sm:$0xff]  }
 0x237   :  { %2047 = vmatprep.subr.bf16.mxu0 %v7261_v40  ;;  %2129 = vmatprep.subr.bf16.mxu1 %v7264_v41  ;;  %v7333_v40 = vld [vmem:[#allocation7 + $0x4] ss:$16 sps:$4 sm:$0xff]   ;;  %v7336_v41 = vld [vmem:[#allocation7 + $0xc] ss:$16 sps:$4 sm:$0xff]  }
 0x238   :  { %v1331_v42 = vsel %vm1323_vm3, %v1315_v58, %v1327_v38  ;;  %v7403_v58 = vld [vmem:[#allocation7 + $0x180] ss:$16 sps:$4 sm:$0xff]   ;;  %v7412_v38 = vld [vmem:[#allocation7 + $0x1a8] ss:$16 sps:$4 sm:$0xff]  }
 0x23a   :  { %2048 = vmatpush1.bf16.msra.mxu0 %v7259_v44  ;;  %2130 = vmatpush1.bf16.msra.mxu1 %v7262_v45  ;;  %v7334_v44 = vld [vmem:[#allocation7 + $0x8] ss:$16 sps:$4 sm:$0xff]   ;;  %v1335_v45 = vpack.c.bf16 %v1331_v42, %v1331_v42  ;;  %v7423_v42 = vld [vmem:[#allocation7 + $0x1e4] ss:$16 sps:$4 sm:$0xff]  }
 0x23b   :  { %2049 = vmatprep.subr.bf16.mxu0 %v7267_v47  ;;  %2131 = vmatprep.subr.bf16.mxu1 %v7270_v48  ;;  %v7342_v47 = vld [vmem:[#allocation7 + $0x2c] ss:$16 sps:$4 sm:$0xff]   ;;  %v7337_v48 = vld [vmem:[#allocation7 + $0x20] ss:$16 sps:$4 sm:$0xff]  }
 0x23e   :  { %2050 = vmatpush1.bf16.msra.mxu0 %v7265_v53  ;;  %2132 = vmatpush1.bf16.msra.mxu1 %v7268_v54  ;;  %v7346_v53 = vld [vmem:[#allocation7 + $0x48] ss:$16 sps:$4 sm:$0xff]   ;;  %v7351_v54 = vld [vmem:[#allocation7 + $0x64] ss:$16 sps:$4 sm:$0xff]  }
 0x23f   :  { %2051 = vmatprep.subr.bf16.mxu0 %v7273_v55  ;;  %2133 = vmatprep.subr.bf16.mxu1 %v7276_v56  ;;  %v7354_v55 = vld [vmem:[#allocation7 + $0x6c] ss:$16 sps:$4 sm:$0xff]   ;;  %v7349_v56 = vld [vmem:[#allocation7 + $0x60] ss:$16 sps:$4 sm:$0xff]  }
 0x242   :  { %2052 = vmatpush1.bf16.msra.mxu0 %v7271_v60  ;;  %2134 = vmatpush1.bf16.msra.mxu1 %v7274_v61  ;;  %v7360_v60 = vld [vmem:[#allocation7 + $0x8c] ss:$16 sps:$4 sm:$0xff]   ;;  %v7355_v61 = vld [vmem:[#allocation7 + $0x80] ss:$16 sps:$4 sm:$0xff]  }
 0x243   :  { %2053 = vmatprep.subr.bf16.mxu0 %v7279_v62  ;;  %2135 = vmatprep.subr.bf16.mxu1 %v7282_v63  ;;  %v7358_v62 = vld [vmem:[#allocation7 + $0x88] ss:$16 sps:$4 sm:$0xff]   ;;  %v7363_v63 = vld [vmem:[#allocation7 + $0xa4] ss:$16 sps:$4 sm:$0xff]  }
 0x246   :  { %2054 = vmatpush1.bf16.msra.mxu0 %v7277_v0  ;;  %2136 = vmatpush1.bf16.msra.mxu1 %v7280_v1  ;;  %v7366_v0 = vld [vmem:[#allocation7 + $0xac] ss:$16 sps:$4 sm:$0xff]   ;;  %v7361_v1 = vld [vmem:[#allocation7 + $0xa0] ss:$16 sps:$4 sm:$0xff]  }
 0x247   :  { %2055 = vmatprep.subr.bf16.mxu0 %v7285_v2  ;;  %2137 = vmatprep.subr.bf16.mxu1 %v7288_v3  ;;  %v7364_v2 = vld [vmem:[#allocation7 + $0xa8] ss:$16 sps:$4 sm:$0xff]   ;;  %v7369_v3 = vld [vmem:[#allocation7 + $0xc4] ss:$16 sps:$4 sm:$0xff]  }
 0x24a   :  { %2056 = vmatpush1.bf16.msra.mxu0 %v7283_v4  ;;  %2138 = vmatpush1.bf16.msra.mxu1 %v7286_v5  ;;  %v7372_v4 = vld [vmem:[#allocation7 + $0xcc] ss:$16 sps:$4 sm:$0xff]   ;;  %v7367_v5 = vld [vmem:[#allocation7 + $0xc0] ss:$16 sps:$4 sm:$0xff]  }
 0x24b   :  { %2057 = vmatprep.subr.bf16.mxu0 %v7291_v6  ;;  %2139 = vmatprep.subr.bf16.mxu1 %v7294_v7  ;;  %v7370_v6 = vld [vmem:[#allocation7 + $0xc8] ss:$16 sps:$4 sm:$0xff]   ;;  %v7375_v7 = vld [vmem:[#allocation7 + $0xe4] ss:$16 sps:$4 sm:$0xff]  }
 0x24e   :  { %2058 = vmatpush1.bf16.msra.mxu0 %v7289_v12  ;;  %2140 = vmatpush1.bf16.msra.mxu1 %v7292_v13  ;;  %v7378_v12 = vld [vmem:[#allocation7 + $0xec] ss:$16 sps:$4 sm:$0xff]   ;;  %v7373_v13 = vld [vmem:[#allocation7 + $0xe0] ss:$16 sps:$4 sm:$0xff]  }
 0x24f   :  { %2059 = vmatprep.subr.bf16.mxu0 %v7297_v14  ;;  %2141 = vmatprep.subr.bf16.mxu1 %v7300_v15  ;;  %v7376_v14 = vld [vmem:[#allocation7 + $0xe8] ss:$16 sps:$4 sm:$0xff]   ;;  %v7381_v15 = vld [vmem:[#allocation7 + $0x104] ss:$16 sps:$4 sm:$0xff]  }
 0x252   :  { %2060 = vmatpush1.bf16.msra.mxu0 %v7295_v16  ;;  %2142 = vmatpush1.bf16.msra.mxu1 %v7298_v17  ;;  %v7384_v16 = vld [vmem:[#allocation7 + $0x10c] ss:$16 sps:$4 sm:$0xff]   ;;  %v7379_v17 = vld [vmem:[#allocation7 + $0x100] ss:$16 sps:$4 sm:$0xff]  }
 0x253   :  { %2061 = vmatprep.subr.bf16.mxu0 %v7303_v18  ;;  %2143 = vmatprep.subr.bf16.mxu1 %v7306_v19  ;;  %v7382_v18 = vld [vmem:[#allocation7 + $0x108] ss:$16 sps:$4 sm:$0xff]   ;;  %v7387_v19 = vld [vmem:[#allocation7 + $0x124] ss:$16 sps:$4 sm:$0xff]  }
 0x256   :  { %2062 = vmatpush1.bf16.msra.mxu0 %v7301_v20  ;;  %2144 = vmatpush1.bf16.msra.mxu1 %v7304_v22  ;;  %v7390_v20 = vld [vmem:[#allocation7 + $0x12c] ss:$16 sps:$4 sm:$0xff]   ;;  %v7385_v22 = vld [vmem:[#allocation7 + $0x120] ss:$16 sps:$4 sm:$0xff]  }
 0x257   :  { %2063 = vmatprep.subr.bf16.mxu0 %v7309_v23  ;;  %2145 = vmatprep.subr.bf16.mxu1 %v7312_v24  ;;  %v7388_v23 = vld [vmem:[#allocation7 + $0x128] ss:$16 sps:$4 sm:$0xff]   ;;  %v7393_v24 = vld [vmem:[#allocation7 + $0x144] ss:$16 sps:$4 sm:$0xff]  }
 0x25a   :  { %2064 = vmatpush1.bf16.msra.mxu0 %v7307_v26  ;;  %2146 = vmatpush1.bf16.msra.mxu1 %v7310_v27  ;;  %v7396_v26 = vld [vmem:[#allocation7 + $0x14c] ss:$16 sps:$4 sm:$0xff]   ;;  %v7391_v27 = vld [vmem:[#allocation7 + $0x140] ss:$16 sps:$4 sm:$0xff]  }
 0x25b   :  { %2065 = vmatprep.subr.bf16.mxu0 %v7315_v28  ;;  %2147 = vmatprep.subr.bf16.mxu1 %v7318_v29  ;;  %v7394_v28 = vld [vmem:[#allocation7 + $0x148] ss:$16 sps:$4 sm:$0xff]   ;;  %v7399_v29 = vld [vmem:[#allocation7 + $0x164] ss:$16 sps:$4 sm:$0xff]  }
 0x25e   :  { %2066 = vmatpush1.bf16.msra.mxu0 %v7313_v31  ;;  %2148 = vmatpush1.bf16.msra.mxu1 %v7316_v32  ;;  %v7397_v31 = vld [vmem:[#allocation7 + $0x160] ss:$16 sps:$4 sm:$0xff]   ;;  %v7400_v32 = vld [vmem:[#allocation7 + $0x168] ss:$16 sps:$4 sm:$0xff]  }
 0x25f   :  { %2067 = vmatprep.subr.bf16.mxu0 %v7321_v21  ;;  %2149 = vmatprep.subr.bf16.mxu1 %v7324_v8  ;;  %v7405_v21 = vld [vmem:[#allocation7 + $0x184] ss:$16 sps:$4 sm:$0xff]   ;;  %v7408_v8 = vld [vmem:[#allocation7 + $0x18c] ss:$16 sps:$4 sm:$0xff]  }
 0x262   :  { %2068 = vmatpush1.bf16.msra.mxu0 %v7319_v33  ;;  %2150 = vmatpush1.bf16.msra.mxu1 %v7322_v34  ;;  %v7406_v33 = vld [vmem:[#allocation7 + $0x188] ss:$16 sps:$4 sm:$0xff]   ;;  %v7411_v34 = vld [vmem:[#allocation7 + $0x1a4] ss:$16 sps:$4 sm:$0xff]  }
 0x263   :  { %2069 = vmatprep.subr.bf16.mxu0 %v7327_v35  ;;  %2151 = vmatprep.subr.bf16.mxu1 %v7330_v36  ;;  %v7414_v35 = vld [vmem:[#allocation7 + $0x1ac] ss:$16 sps:$4 sm:$0xff]   ;;  %v7409_v36 = vld [vmem:[#allocation7 + $0x1a0] ss:$16 sps:$4 sm:$0xff]  }
 0x266   :  { %2070 = vmatpush1.bf16.msra.mxu0 %v7325_v9  ;;  %2152 = vmatpush1.bf16.msra.mxu1 %v7328_v39  ;;  %v7417_v9 = vld [vmem:[#allocation7 + $0x1c4] ss:$16 sps:$4 sm:$0xff]   ;;  %v7420_v39 = vld [vmem:[#allocation7 + $0x1cc] ss:$16 sps:$4 sm:$0xff]  }
 0x267   :  { %3101 = vmatprep.subr.bf16.mxu0 %v7333_v40  ;;  %3183 = vmatprep.subr.bf16.mxu1 %v7336_v41  ;;  %v7415_v40 = vld [vmem:[#allocation7 + $0x1c0] ss:$16 sps:$4 sm:$0xff]   ;;  %v7418_v41 = vld [vmem:[#allocation7 + $0x1c8] ss:$16 sps:$4 sm:$0xff]  }
 0x269   :  { %2072 = vmatmul.mubr.bf16.vlgmr.msra.gmra.mrb[0].mxu0 %v1335_v45  ;;  %2154 = vmatmul.mubr.bf16.vlgmr.msra.gmra.mrb[0].mxu1 %v1335_v45  ;;  %v7424_v45 = vld [vmem:[#allocation7 + $0x1e8] ss:$16 sps:$4 sm:$0xff]  }
 0x26a   :  { %3102 = vmatpush1.bf16.msra.mxu0 %v7331_v43  ;;  %3184 = vmatpush1.bf16.msra.mxu1 %v7334_v44  ;;  %v7426_v43 = vld [vmem:[#allocation7 + $0x1ec] ss:$16 sps:$4 sm:$0xff]   ;;  %v7421_v44 = vld [vmem:[#allocation7 + $0x1e0] ss:$16 sps:$4 sm:$0xff]  }
 0x26b   :  { %3103 = vmatprep.subr.bf16.mxu0 %v7339_v46  ;;  %3185 = vmatprep.subr.bf16.mxu1 %v7342_v47  ;;  %v7429_v46 = vld [vmem:[#allocation7 + $0x204] ss:$16 sps:$4 sm:$0xff]   ;;  %v7432_v47 = vld [vmem:[#allocation7 + $0x20c] ss:$16 sps:$4 sm:$0xff]  }
 0x26e   :  { %3104 = vmatpush1.bf16.msra.mxu0 %v7337_v48  ;;  %3186 = vmatpush1.bf16.msra.mxu1 %v7340_v49  ;;  %v8601_v48 = vld [vmem:[%s8978_s1] sm:$0xf] }
 0x26f   :  { %3105 = vmatprep.subr.bf16.mxu0 %v7345_v50  ;;  %3187 = vmatprep.subr.bf16.mxu1 %v7348_v51  ;;  %v8606_v49 = vld [vmem:[%s8979_s27] sm:$0xf]  ;;  %v1341_v51 = vrot.slane %v8601_v48, %v8576_v10 }
 0x270   :  { %v479_v50 = vrot.slane %v8606_v49, %v8576_v10 }
 0x272   :  { %3106 = vmatpush1.bf16.msra.mxu0 %v7343_v52  ;;  %3188 = vmatpush1.bf16.msra.mxu1 %v7346_v53  ;;  %v483_v52 = vrot.slane %v8606_v49, %v8579_v11  ;;  %v1345_v53 = vrot.slane %v8601_v48, %v8579_v11 }
 0x273   :  { %3107 = vmatprep.subr.bf16.mxu0 %v7351_v54  ;;  %3189 = vmatprep.subr.bf16.mxu1 %v7354_v55  ;;  %v491_v54 = vrot.slane %v8606_v49, %v8586_v37  ;;  %v1353_v55 = vrot.slane %v8601_v48, %v8586_v37 }
 0x276   :  { %3108 = vmatpush1.bf16.msra.mxu0 %v7349_v56  ;;  %3190 = vmatpush1.bf16.msra.mxu1 %v7352_v57  ;;  %v6877_v56 = vadd.f32 %v1341_v51, %v479_v50  ;;  %v6879_v57 = vadd.f32 %v1345_v53, %v483_v52  ;;  %v7472_v50 = vld [vmem:[#allocation7 + $0x2e8] ss:$16 sps:$4 sm:$0xff]   ;;  %v7477_v51 = vld [vmem:[#allocation7 + $0x304] ss:$16 sps:$4 sm:$0xff]   ;;  %v7480_v52 = vld [vmem:[#allocation7 + $0x30c] ss:$16 sps:$4 sm:$0xff]  }
 0x277   :  { %3109 = vmatprep.subr.bf16.mxu0 %v7357_v59  ;;  %3191 = vmatprep.subr.bf16.mxu1 %v7360_v60  ;;  %v6883_v59 = vadd.f32 %v1353_v55, %v491_v54  ;;  %v7475_v53 = vld [vmem:[#allocation7 + $0x300] ss:$16 sps:$4 sm:$0xff]   ;;  %v7478_v54 = vld [vmem:[#allocation7 + $0x308] ss:$16 sps:$4 sm:$0xff]   ;;  %v7483_v55 = vld [vmem:[#allocation7 + $0x324] ss:$16 sps:$4 sm:$0xff]  }
 0x27a   :  { %3110 = vmatpush1.bf16.msra.mxu0 %v7355_v61  ;;  %3192 = vmatpush1.bf16.msra.mxu1 %v7358_v62 }
 0x27b   :  { %3111 = vmatprep.subr.bf16.mxu0 %v7363_v63  ;;  %3193 = vmatprep.subr.bf16.mxu1 %v7366_v0 }
 0x27e   :  { %3112 = vmatpush1.bf16.msra.mxu0 %v7361_v1  ;;  %3194 = vmatpush1.bf16.msra.mxu1 %v7364_v2 }
 0x27f   :  { %3113 = vmatprep.subr.bf16.mxu0 %v7369_v3  ;;  %3195 = vmatprep.subr.bf16.mxu1 %v7372_v4 }
 0x282   :  { %3114 = vmatpush1.bf16.msra.mxu0 %v7367_v5  ;;  %3196 = vmatpush1.bf16.msra.mxu1 %v7370_v6 }
 0x283   :  { %3115 = vmatprep.subr.bf16.mxu0 %v7375_v7  ;;  %3197 = vmatprep.subr.bf16.mxu1 %v7378_v12 }
 0x286   :  { %3116 = vmatpush1.bf16.msra.mxu0 %v7373_v13  ;;  %3198 = vmatpush1.bf16.msra.mxu1 %v7376_v14 }
 0x287   :  { %3117 = vmatprep.subr.bf16.mxu0 %v7381_v15  ;;  %3199 = vmatprep.subr.bf16.mxu1 %v7384_v16 }
 0x28a   :  { %3118 = vmatpush1.bf16.msra.mxu0 %v7379_v17  ;;  %3200 = vmatpush1.bf16.msra.mxu1 %v7382_v18  ;;  %v7427_v17 = vld [vmem:[#allocation7 + $0x200] ss:$16 sps:$4 sm:$0xff]   ;;  %v7430_v18 = vld [vmem:[#allocation7 + $0x208] ss:$16 sps:$4 sm:$0xff]  }
 0x28b   :  { %3119 = vmatprep.subr.bf16.mxu0 %v7387_v19  ;;  %3201 = vmatprep.subr.bf16.mxu1 %v7390_v20 }
 0x28e   :  { %3120 = vmatpush1.bf16.msra.mxu0 %v7385_v22  ;;  %3202 = vmatpush1.bf16.msra.mxu1 %v7388_v23  ;;  %v7435_v22 = vld [vmem:[#allocation7 + $0x224] ss:$16 sps:$4 sm:$0xff]   ;;  %v7438_v23 = vld [vmem:[#allocation7 + $0x22c] ss:$16 sps:$4 sm:$0xff]  }
 0x28f   :  { %3121 = vmatprep.subr.bf16.mxu0 %v7393_v24  ;;  %3203 = vmatprep.subr.bf16.mxu1 %v7396_v26  ;;  %v7433_v26 = vld [vmem:[#allocation7 + $0x220] ss:$16 sps:$4 sm:$0xff]  }
 0x292   :  { %3122 = vmatpush1.bf16.msra.mxu0 %v7391_v27  ;;  %3204 = vmatpush1.bf16.msra.mxu1 %v7394_v28  ;;  %v7436_v27 = vld [vmem:[#allocation7 + $0x228] ss:$16 sps:$4 sm:$0xff]   ;;  %v7441_v28 = vld [vmem:[#allocation7 + $0x244] ss:$16 sps:$4 sm:$0xff]  }
 0x293   :  { %3123 = vmatprep.subr.bf16.mxu0 %v7399_v29  ;;  %3205 = vmatprep.subr.bf16.mxu1 %v7402_v30  ;;  %v7444_v29 = vld [vmem:[#allocation7 + $0x24c] ss:$16 sps:$4 sm:$0xff]   ;;  %v7439_v30 = vld [vmem:[#allocation7 + $0x240] ss:$16 sps:$4 sm:$0xff]  }
 0x296   :  { %3124 = vmatpush1.bf16.msra.mxu0 %v7397_v31  ;;  %3206 = vmatpush1.bf16.msra.mxu1 %v7400_v32  ;;  %v7442_v31 = vld [vmem:[#allocation7 + $0x248] ss:$16 sps:$4 sm:$0xff]   ;;  %v7447_v32 = vld [vmem:[#allocation7 + $0x264] ss:$16 sps:$4 sm:$0xff]  }
 0x297   :  { %3125 = vmatprep.subr.bf16.mxu0 %v7405_v21  ;;  %3207 = vmatprep.subr.bf16.mxu1 %v7408_v8  ;;  %v7450_v21 = vld [vmem:[#allocation7 + $0x26c] ss:$16 sps:$4 sm:$0xff]   ;;  %v7445_v8 = vld [vmem:[#allocation7 + $0x260] ss:$16 sps:$4 sm:$0xff]  }
 0x29a   :  { %3126 = vmatpush1.bf16.msra.mxu0 %v7403_v58  ;;  %3208 = vmatpush1.bf16.msra.mxu1 %v7406_v33  ;;  %v7448_v58 = vld [vmem:[#allocation7 + $0x268] ss:$16 sps:$4 sm:$0xff]   ;;  %v7453_v33 = vld [vmem:[#allocation7 + $0x284] ss:$16 sps:$4 sm:$0xff]  }
 0x29b   :  { %3127 = vmatprep.subr.bf16.mxu0 %v7411_v34  ;;  %3209 = vmatprep.subr.bf16.mxu1 %v7414_v35  ;;  %v7456_v34 = vld [vmem:[#allocation7 + $0x28c] ss:$16 sps:$4 sm:$0xff]   ;;  %v7451_v35 = vld [vmem:[#allocation7 + $0x280] ss:$16 sps:$4 sm:$0xff]  }
 0x29e   :  { %3128 = vmatpush1.bf16.msra.mxu0 %v7409_v36  ;;  %3210 = vmatpush1.bf16.msra.mxu1 %v7412_v38  ;;  %v7454_v36 = vld [vmem:[#allocation7 + $0x288] ss:$16 sps:$4 sm:$0xff]   ;;  %v7459_v38 = vld [vmem:[#allocation7 + $0x2a4] ss:$16 sps:$4 sm:$0xff]  }
 0x29f   :  { %3129 = vmatprep.subr.bf16.mxu0 %v7417_v9  ;;  %3211 = vmatprep.subr.bf16.mxu1 %v7420_v39  ;;  %v7462_v9 = vld [vmem:[#allocation7 + $0x2ac] ss:$16 sps:$4 sm:$0xff]   ;;  %v7457_v39 = vld [vmem:[#allocation7 + $0x2a0] ss:$16 sps:$4 sm:$0xff]  }
 0x2a2   :  { %3130 = vmatpush1.bf16.msra.mxu0 %v7415_v40  ;;  %3212 = vmatpush1.bf16.msra.mxu1 %v7418_v41  ;;  %v7460_v40 = vld [vmem:[#allocation7 + $0x2a8] ss:$16 sps:$4 sm:$0xff]   ;;  %v7465_v41 = vld [vmem:[#allocation7 + $0x2c4] ss:$16 sps:$4 sm:$0xff]  }
 0x2a3   :  { %3131 = vmatprep.subr.bf16.mxu0 %v7423_v42  ;;  %3213 = vmatprep.subr.bf16.mxu1 %v7426_v43  ;;  %v7468_v42 = vld [vmem:[#allocation7 + $0x2cc] ss:$16 sps:$4 sm:$0xff]   ;;  %v7463_v43 = vld [vmem:[#allocation7 + $0x2c0] ss:$16 sps:$4 sm:$0xff]  }
 0x2a6   :  { %3132 = vmatpush1.bf16.msra.mxu0 %v7421_v44  ;;  %3214 = vmatpush1.bf16.msra.mxu1 %v7424_v45  ;;  %v7466_v44 = vld [vmem:[#allocation7 + $0x2c8] ss:$16 sps:$4 sm:$0xff]   ;;  %v7471_v45 = vld [vmem:[#allocation7 + $0x2e4] ss:$16 sps:$4 sm:$0xff]  }
 0x2a7   :  { %3142 = vmatprep.subr.bf16.mxu0 %v7429_v46  ;;  %3224 = vmatprep.subr.bf16.mxu1 %v7432_v47  ;;  %v7474_v46 = vld [vmem:[#allocation7 + $0x2ec] ss:$16 sps:$4 sm:$0xff]   ;;  %v7469_v47 = vld [vmem:[#allocation7 + $0x2e0] ss:$16 sps:$4 sm:$0xff]  }
 0x33c   :  { %v2073_v60 = vpop.f32.mrb[0].mxu0  ;;  %v8620_v61 = vpop.f32.mrb[0].mxu1 }
 0x33d   :  { %v6878_v62 = vadd.f32 %v6877_v56, %v2073_v60  ;;  %v2075_v63 = vpop.f32.mrb[1].mxu0  ;;  %v2157_v0 = vpop.f32.mrb[1].mxu1  ;;  %v7486_v56 = vld [vmem:[#allocation7 + $0x32c] ss:$16 sps:$4 sm:$0xff]   ;;  %v7489_v60 = vld [vmem:[#allocation7 + $0x344] ss:$16 sps:$4 sm:$0xff]  }
 0x33e   :  { %v6880_v1 = vadd.f32 %v6879_v57, %v2075_v63  ;;  %v6884_v2 = vadd.f32 %v6883_v59, %v2157_v0  ;;  %v2077_v3 = vpop.f32.mrb[2].mxu0  ;;  %v2159_v4 = vpop.f32.mrb[2].mxu1  ;;  %v7481_v57 = vld [vmem:[#allocation7 + $0x320] ss:$16 sps:$4 sm:$0xff]   ;;  %v7484_v59 = vld [vmem:[#allocation7 + $0x328] ss:$16 sps:$4 sm:$0xff]  }
 0x33f   :  { %vm2166_vm4 = vcmp.ge.f32.partialorder %v6878_v62, 0.0  ;;  %v2170_v5 = vmul.f32 0.01, %v6878_v62  ;;  %v2078_v13 = vpop.f32.mrb[3].mxu0  ;;  %v2160_v14 = vpop.f32.mrb[3].mxu1 }
 0x340   :  { %vm2167_vm5 = vcmp.ge.f32.partialorder %v6880_v1, 0.0  ;;  %v2171_v6 = vmul.f32 0.01, %v6880_v1  ;;  %vm2169_vm6 = vcmp.ge.f32.partialorder %v6884_v2, 0.0  ;;  %v2173_v7 = vmul.f32 0.01, %v6884_v2 }
 0x341   :  { %v8622_v12 = vsel %vm2166_vm4, %v6878_v62, %v2170_v5  ;;  %v7492_v62 = vld [vmem:[#allocation7 + $0x34c] ss:$16 sps:$4 sm:$0xff]   ;;  %v7487_v63 = vld [vmem:[#allocation7 + $0x340] ss:$16 sps:$4 sm:$0xff]   ;;  %v7490_v0 = vld [vmem:[#allocation7 + $0x348] ss:$16 sps:$4 sm:$0xff]   ;;  %v1349_v13 = vrot.slane %v8601_v48, %v8593_v25 }
 0x342   :  { %v8624_v15 = vsel %vm2167_vm5, %v6880_v1, %v2171_v6  ;;  %v8628_v19 = vsel %vm2169_vm6, %v6884_v2, %v2173_v7  ;;  %v2436_v20 = vpack.c.bf16 %v8622_v12, %v8622_v12  ;;  %v7495_v1 = vld [vmem:[#allocation7 + $0x364] ss:$16 sps:$4 sm:$0xff]   ;;  %v7498_v2 = vld [vmem:[#allocation7 + $0x36c] ss:$16 sps:$4 sm:$0xff]   ;;  %v7493_v3 = vld [vmem:[#allocation7 + $0x360] ss:$16 sps:$4 sm:$0xff]   ;;  %v487_v7 = vrot.slane %v8606_v49, %v8593_v25 }
 0x343   :  { %v2437_v16 = vpack.c.bf16 %v8624_v15, %v8624_v15  ;;  %v2439_v24 = vpack.c.bf16 %v8628_v19, %v8628_v19  ;;  %v7496_v4 = vld [vmem:[#allocation7 + $0x368] ss:$16 sps:$4 sm:$0xff]   ;;  %v7501_v5 = vld [vmem:[#allocation7 + $0x384] ss:$16 sps:$4 sm:$0xff]   ;;  %v7504_v6 = vld [vmem:[#allocation7 + $0x38c] ss:$16 sps:$4 sm:$0xff]  }
 0x344   :  { %v7499_v14 = vld [vmem:[#allocation7 + $0x380] ss:$16 sps:$4 sm:$0xff]   ;;  %v7516_v49 = vld [vmem:[#allocation7 + $0x3cc] ss:$16 sps:$4 sm:$0xff]  }
 0x345   :  { %3133 = vmatprep.mubr.bf16.mxu0 %v2437_v16  ;;  %3215 = vmatprep.mubr.bf16.mxu1 %v2437_v16  ;;  %v7502_v16 = vld [vmem:[#allocation7 + $0x388] ss:$16 sps:$4 sm:$0xff]   ;;  %v7511_v48 = vld [vmem:[#allocation7 + $0x3c0] ss:$16 sps:$4 sm:$0xff]  }
 0x346   :  { %3134 = vmatmul.mubr.bf16.vlgmr.msra.gmra.mrb[8].mxu0 %v2436_v20  ;;  %3216 = vmatmul.mubr.bf16.vlgmr.msra.gmra.mrb[8].mxu1 %v2436_v20  ;;  %v6881_v20 = vadd.f32 %v1349_v13, %v487_v7  ;;  %v7579_v7 = vld [vmem:[#allocation9 + $0x124] ss:$16 sps:$4 sm:$0xff]  }
 0x347   :  { %3143 = vmatpush1.bf16.msra.mxu0 %v7427_v17  ;;  %3225 = vmatpush1.bf16.msra.mxu1 %v7430_v18  ;;  %v7507_v17 = vld [vmem:[#allocation7 + $0x3a4] ss:$16 sps:$4 sm:$0xff]   ;;  %v7510_v18 = vld [vmem:[#allocation7 + $0x3ac] ss:$16 sps:$4 sm:$0xff]  }
 0x348   :  { %3174 = vmatprep.mubr.bf16.mxu0 %v2439_v24  ;;  %3256 = vmatprep.mubr.bf16.mxu1 %v2439_v24  ;;  %v7513_v24 = vld [vmem:[#allocation7 + $0x3c4] ss:$16 sps:$4 sm:$0xff]  }
 0x349   :  { %3144 = vmatprep.subr.bf16.mxu0 %v7435_v22  ;;  %3226 = vmatprep.subr.bf16.mxu1 %v7438_v23  ;;  %v7505_v22 = vld [vmem:[#allocation7 + $0x3a0] ss:$16 sps:$4 sm:$0xff]   ;;  %v7508_v23 = vld [vmem:[#allocation7 + $0x3a8] ss:$16 sps:$4 sm:$0xff]   ;;  %v7582_v13 = vld [vmem:[#allocation9 + $0x324] ss:$16 sps:$4 sm:$0xff]  }
 0x34b   :  { %3145 = vmatpush1.bf16.msra.mxu0 %v7433_v26  ;;  %3227 = vmatpush1.bf16.msra.mxu1 %v7436_v27  ;;  %v6882_v26 = vadd.f32 %v6881_v20, %v8620_v61  ;;  %v7514_v27 = vld [vmem:[#allocation7 + $0x3c8] ss:$16 sps:$4 sm:$0xff]   ;;  %v7523_v61 = vld [vmem:[#allocation9] ss:$16 sps:$4 sm:$0xff]  }
 0x34c   :  { %3146 = vmatprep.subr.bf16.mxu0 %v7441_v28  ;;  %3228 = vmatprep.subr.bf16.mxu1 %v7444_v29  ;;  %v7519_v28 = vld [vmem:[#allocation7 + $0x3e4] ss:$16 sps:$4 sm:$0xff]   ;;  %v7522_v29 = vld [vmem:[#allocation7 + $0x3ec] ss:$16 sps:$4 sm:$0xff]   ;;  %v7583_v20 = vld [vmem:[#allocation9 + $0x140] ss:$16 sps:$4 sm:$0xff]  }
 0x34d   :  { %vm2168_vm7 = vcmp.ge.f32.partialorder %v6882_v26, 0.0 }
 0x34f   :  { %3147 = vmatpush1.bf16.msra.mxu0 %v7439_v30  ;;  %3229 = vmatpush1.bf16.msra.mxu1 %v7442_v31  ;;  %v2172_v30 = vmul.f32 0.01, %v6882_v26  ;;  %v7517_v31 = vld [vmem:[#allocation7 + $0x3e0] ss:$16 sps:$4 sm:$0xff]  }
 0x350   :  { %3148 = vmatprep.subr.bf16.mxu0 %v7447_v32  ;;  %3230 = vmatprep.subr.bf16.mxu1 %v7450_v21  ;;  %v7520_v32 = vld [vmem:[#allocation7 + $0x3e8] ss:$16 sps:$4 sm:$0xff]   ;;  %v7525_v21 = vld [vmem:[#allocation9 + $0x4] ss:$16 sps:$4 sm:$0xff]  }
 0x353   :  { %3149 = vmatpush1.bf16.msra.mxu0 %v7445_v8  ;;  %3231 = vmatpush1.bf16.msra.mxu1 %v7448_v58  ;;  %v7528_v8 = vld [vmem:[#allocation9 + $0x204] ss:$16 sps:$4 sm:$0xff]   ;;  %v8639_v58 = vsel %vm2168_vm7, %v6882_v26, %v2172_v30  ;;  %v7592_v26 = vld [vmem:[#allocation9 + $0x360] ss:$16 sps:$4 sm:$0xff]  }
 0x354   :  { %3150 = vmatprep.subr.bf16.mxu0 %v7453_v33  ;;  %3232 = vmatprep.subr.bf16.mxu1 %v7456_v34  ;;  %v7526_v33 = vld [vmem:[#allocation9 + $0x200] ss:$16 sps:$4 sm:$0xff]   ;;  %v2438_v34 = vpack.c.bf16 %v8639_v58, %v8639_v58  ;;  %v7603_v30 = vld [vmem:[#allocation9 + $0x1a4] ss:$16 sps:$4 sm:$0xff]  }
 0x357   :  { %3151 = vmatpush1.bf16.msra.mxu0 %v7451_v35  ;;  %3233 = vmatpush1.bf16.msra.mxu1 %v7454_v36  ;;  %v7531_v35 = vld [vmem:[#allocation9 + $0x24] ss:$16 sps:$4 sm:$0xff]  }
 0x358   :  { %3152 = vmatprep.subr.bf16.mxu0 %v7459_v38  ;;  %3234 = vmatprep.subr.bf16.mxu1 %v7462_v9  ;;  %v7534_v36 = vld [vmem:[#allocation9 + $0x224] ss:$16 sps:$4 sm:$0xff]   ;;  %v7529_v38 = vld [vmem:[#allocation9 + $0x20] ss:$16 sps:$4 sm:$0xff]  }
 0x359   :  { %v7532_v9 = vld [vmem:[#allocation9 + $0x220] ss:$16 sps:$4 sm:$0xff]  }
 0x35b   :  { %3153 = vmatpush1.bf16.msra.mxu0 %v7457_v39  ;;  %3235 = vmatpush1.bf16.msra.mxu1 %v7460_v40  ;;  %v7537_v39 = vld [vmem:[#allocation9 + $0x44] ss:$16 sps:$4 sm:$0xff]  }
 0x35c   :  { %3154 = vmatprep.subr.bf16.mxu0 %v7465_v41  ;;  %3236 = vmatprep.subr.bf16.mxu1 %v7468_v42  ;;  %v7540_v40 = vld [vmem:[#allocation9 + $0x244] ss:$16 sps:$4 sm:$0xff]   ;;  %v7535_v41 = vld [vmem:[#allocation9 + $0x40] ss:$16 sps:$4 sm:$0xff]  }
 0x35d   :  { %v7538_v42 = vld [vmem:[#allocation9 + $0x240] ss:$16 sps:$4 sm:$0xff]  }
 0x35f   :  { %3155 = vmatpush1.bf16.msra.mxu0 %v7463_v43  ;;  %3237 = vmatpush1.bf16.msra.mxu1 %v7466_v44  ;;  %v7543_v43 = vld [vmem:[#allocation9 + $0x64] ss:$16 sps:$4 sm:$0xff]  }
 0x360   :  { %3156 = vmatprep.subr.bf16.mxu0 %v7471_v45  ;;  %3238 = vmatprep.subr.bf16.mxu1 %v7474_v46  ;;  %v7546_v44 = vld [vmem:[#allocation9 + $0x264] ss:$16 sps:$4 sm:$0xff]   ;;  %v7541_v45 = vld [vmem:[#allocation9 + $0x60] ss:$16 sps:$4 sm:$0xff]  }
 0x361   :  { %v7544_v46 = vld [vmem:[#allocation9 + $0x260] ss:$16 sps:$4 sm:$0xff]  }
 0x363   :  { %3157 = vmatpush1.bf16.msra.mxu0 %v7469_v47  ;;  %3239 = vmatpush1.bf16.msra.mxu1 %v7472_v50  ;;  %v7549_v47 = vld [vmem:[#allocation9 + $0x84] ss:$16 sps:$4 sm:$0xff]  }
 0x364   :  { %3158 = vmatprep.subr.bf16.mxu0 %v7477_v51  ;;  %3240 = vmatprep.subr.bf16.mxu1 %v7480_v52  ;;  %v7552_v50 = vld [vmem:[#allocation9 + $0x284] ss:$16 sps:$4 sm:$0xff]   ;;  %v7547_v51 = vld [vmem:[#allocation9 + $0x80] ss:$16 sps:$4 sm:$0xff]  }
 0x365   :  { %v7550_v52 = vld [vmem:[#allocation9 + $0x280] ss:$16 sps:$4 sm:$0xff]  }
 0x367   :  { %3159 = vmatpush1.bf16.msra.mxu0 %v7475_v53  ;;  %3241 = vmatpush1.bf16.msra.mxu1 %v7478_v54  ;;  %v7555_v53 = vld [vmem:[#allocation9 + $0xa4] ss:$16 sps:$4 sm:$0xff]  }
 0x368   :  { %3160 = vmatprep.subr.bf16.mxu0 %v7483_v55  ;;  %3242 = vmatprep.subr.bf16.mxu1 %v7486_v56  ;;  %v7558_v54 = vld [vmem:[#allocation9 + $0x2a4] ss:$16 sps:$4 sm:$0xff]   ;;  %v7553_v55 = vld [vmem:[#allocation9 + $0xa0] ss:$16 sps:$4 sm:$0xff]  }
 0x369   :  { %v7556_v56 = vld [vmem:[#allocation9 + $0x2a0] ss:$16 sps:$4 sm:$0xff]  }
 0x36b   :  { %3161 = vmatpush1.bf16.msra.mxu0 %v7481_v57  ;;  %3243 = vmatpush1.bf16.msra.mxu1 %v7484_v59  ;;  %v7561_v57 = vld [vmem:[#allocation9 + $0xc4] ss:$16 sps:$4 sm:$0xff]  }
 0x36c   :  { %3162 = vmatprep.subr.bf16.mxu0 %v7489_v60  ;;  %3244 = vmatprep.subr.bf16.mxu1 %v7492_v62  ;;  %v7564_v59 = vld [vmem:[#allocation9 + $0x2c4] ss:$16 sps:$4 sm:$0xff]   ;;  %v7559_v60 = vld [vmem:[#allocation9 + $0xc0] ss:$16 sps:$4 sm:$0xff]  }
 0x36d   :  { %v7562_v62 = vld [vmem:[#allocation9 + $0x2c0] ss:$16 sps:$4 sm:$0xff]  }
 0x36f   :  { %3163 = vmatpush1.bf16.msra.mxu0 %v7487_v63  ;;  %3245 = vmatpush1.bf16.msra.mxu1 %v7490_v0  ;;  %v7567_v63 = vld [vmem:[#allocation9 + $0xe4] ss:$16 sps:$4 sm:$0xff]  }
 0x370   :  { %3164 = vmatprep.subr.bf16.mxu0 %v7495_v1  ;;  %3246 = vmatprep.subr.bf16.mxu1 %v7498_v2  ;;  %v7570_v0 = vld [vmem:[#allocation9 + $0x2e4] ss:$16 sps:$4 sm:$0xff]   ;;  %v7565_v1 = vld [vmem:[#allocation9 + $0xe0] ss:$16 sps:$4 sm:$0xff]  }
 0x371   :  { %v7568_v2 = vld [vmem:[#allocation9 + $0x2e0] ss:$16 sps:$4 sm:$0xff]  }
 0x373   :  { %3165 = vmatpush1.bf16.msra.mxu0 %v7493_v3  ;;  %3247 = vmatpush1.bf16.msra.mxu1 %v7496_v4  ;;  %v7573_v3 = vld [vmem:[#allocation9 + $0x104] ss:$16 sps:$4 sm:$0xff]  }
 0x374   :  { %3166 = vmatprep.subr.bf16.mxu0 %v7501_v5  ;;  %3248 = vmatprep.subr.bf16.mxu1 %v7504_v6  ;;  %v7576_v4 = vld [vmem:[#allocation9 + $0x304] ss:$16 sps:$4 sm:$0xff]   ;;  %v7571_v5 = vld [vmem:[#allocation9 + $0x100] ss:$16 sps:$4 sm:$0xff]  }
 0x375   :  { %v7574_v6 = vld [vmem:[#allocation9 + $0x300] ss:$16 sps:$4 sm:$0xff]  }
 0x377   :  { %3167 = vmatpush1.bf16.msra.mxu0 %v7499_v14  ;;  %3249 = vmatpush1.bf16.msra.mxu1 %v7502_v16  ;;  %v7577_v14 = vld [vmem:[#allocation9 + $0x120] ss:$16 sps:$4 sm:$0xff]  }
 0x378   :  { %3168 = vmatprep.subr.bf16.mxu0 %v7507_v17  ;;  %3250 = vmatprep.subr.bf16.mxu1 %v7510_v18  ;;  %v7580_v16 = vld [vmem:[#allocation9 + $0x320] ss:$16 sps:$4 sm:$0xff]   ;;  %v7585_v17 = vld [vmem:[#allocation9 + $0x144] ss:$16 sps:$4 sm:$0xff]  }
 0x379   :  { %v7588_v18 = vld [vmem:[#allocation9 + $0x344] ss:$16 sps:$4 sm:$0xff]  }
 0x37b   :  { %3169 = vmatpush1.bf16.msra.mxu0 %v7505_v22  ;;  %3251 = vmatpush1.bf16.msra.mxu1 %v7508_v23  ;;  %v7586_v22 = vld [vmem:[#allocation9 + $0x340] ss:$16 sps:$4 sm:$0xff]   ;;  %v7591_v23 = vld [vmem:[#allocation9 + $0x164] ss:$16 sps:$4 sm:$0xff]  }
 0x37c   :  { %3170 = vmatprep.subr.bf16.mxu0 %v7513_v24  ;;  %3252 = vmatprep.subr.bf16.mxu1 %v7516_v49  ;;  %v7594_v24 = vld [vmem:[#allocation9 + $0x364] ss:$16 sps:$4 sm:$0xff]   ;;  %v7589_v49 = vld [vmem:[#allocation9 + $0x160] ss:$16 sps:$4 sm:$0xff]  }
 0x37f   :  { %3171 = vmatpush1.bf16.msra.mxu0 %v7511_v48  ;;  %3253 = vmatpush1.bf16.msra.mxu1 %v7514_v27  ;;  %v7597_v48 = vld [vmem:[#allocation9 + $0x184] ss:$16 sps:$4 sm:$0xff]  }
 0x380   :  { %3172 = vmatprep.subr.bf16.mxu0 %v7519_v28  ;;  %3254 = vmatprep.subr.bf16.mxu1 %v7522_v29  ;;  %v7600_v27 = vld [vmem:[#allocation9 + $0x384] ss:$16 sps:$4 sm:$0xff]   ;;  %v7595_v28 = vld [vmem:[#allocation9 + $0x180] ss:$16 sps:$4 sm:$0xff]  }
 0x381   :  { %v7598_v29 = vld [vmem:[#allocation9 + $0x380] ss:$16 sps:$4 sm:$0xff]  }
 0x383   :  { %3173 = vmatpush1.bf16.msra.mxu0 %v7517_v31  ;;  %3255 = vmatpush1.bf16.msra.mxu1 %v7520_v32  ;;  %v7606_v31 = vld [vmem:[#allocation9 + $0x3a4] ss:$16 sps:$4 sm:$0xff]   ;;  %v7601_v32 = vld [vmem:[#allocation9 + $0x1a0] ss:$16 sps:$4 sm:$0xff]  }
 0x384   :  { %3942 = vmatprep.subr.bf16.mxu0 %v7525_v21  ;;  %3983 = vmatprep.subr.bf16.mxu1 %v7528_v8  ;;  %v7604_v21 = vld [vmem:[#allocation9 + $0x3a0] ss:$16 sps:$4 sm:$0xff]   ;;  %v7609_v8 = vld [vmem:[#allocation9 + $0x1c4] ss:$16 sps:$4 sm:$0xff]  }
 0x386   :  { %3175 = vmatmul.mubr.bf16.vlgmr.msra.gmra.mrb[8].mxu0 %v2438_v34  ;;  %3257 = vmatmul.mubr.bf16.vlgmr.msra.gmra.mrb[8].mxu1 %v2438_v34  ;;  %v7610_v34 = vld [vmem:[#allocation9 + $0x3c0] ss:$16 sps:$4 sm:$0xff]  }
 0x387   :  { %3943 = vmatpush1.bf16.msra.mxu0 %v7523_v61  ;;  %3984 = vmatpush1.bf16.msra.mxu1 %v7526_v33  ;;  %v7612_v61 = vld [vmem:[#allocation9 + $0x3c4] ss:$16 sps:$4 sm:$0xff]   ;;  %v7607_v33 = vld [vmem:[#allocation9 + $0x1c0] ss:$16 sps:$4 sm:$0xff]  }
 0x388   :  { %3944 = vmatprep.subr.bf16.mxu0 %v7531_v35  ;;  %3985 = vmatprep.subr.bf16.mxu1 %v7534_v36  ;;  %v7615_v35 = vld [vmem:[#allocation9 + $0x1e4] ss:$16 sps:$4 sm:$0xff]  }
 0x389   :  { %v7618_v36 = vld [vmem:[#allocation9 + $0x3e4] ss:$16 sps:$4 sm:$0xff]  }
 0x38b   :  { %3945 = vmatpush1.bf16.msra.mxu0 %v7529_v38  ;;  %3986 = vmatpush1.bf16.msra.mxu1 %v7532_v9  ;;  %v7613_v38 = vld [vmem:[#allocation9 + $0x1e0] ss:$16 sps:$4 sm:$0xff]  }
 0x38c   :  { %3946 = vmatprep.subr.bf16.mxu0 %v7537_v39  ;;  %3987 = vmatprep.subr.bf16.mxu1 %v7540_v40  ;;  %v7616_v9 = vld [vmem:[#allocation9 + $0x3e0] ss:$16 sps:$4 sm:$0xff]   ;;  %v7621_v39 = vld [vmem:[#allocation9 + $0xc] ss:$16 sps:$4 sm:$0xff]  }
 0x38d   :  { %v7624_v40 = vld [vmem:[#allocation9 + $0x20c] ss:$16 sps:$4 sm:$0xff]  }
 0x38f   :  { %3947 = vmatpush1.bf16.msra.mxu0 %v7535_v41  ;;  %3988 = vmatpush1.bf16.msra.mxu1 %v7538_v42  ;;  %v2306_v41 = vld [vmem:[%s8980_s11] sm:$0xf] }
 0x390   :  { %3948 = vmatprep.subr.bf16.mxu0 %v7543_v43  ;;  %3989 = vmatprep.subr.bf16.mxu1 %v7546_v44  ;;  %v2444_v42 = vrot.slane %v2306_v41, %v8576_v10  ;;  %v2452_v43 = vrot.slane %v2306_v41, %v8593_v25  ;;  %v2448_v44 = vrot.slane %v2306_v41, %v8579_v11 }
 0x393   :  { %3949 = vmatpush1.bf16.msra.mxu0 %v7541_v45  ;;  %3990 = vmatpush1.bf16.msra.mxu1 %v7544_v46  ;;  %v2456_v45 = vrot.slane %v2306_v41, %v8586_v37  ;;  %v7666_v41 = vld [vmem:[#allocation9 + $0x2ec] ss:$16 sps:$4 sm:$0xff]  }
 0x394   :  { %3950 = vmatprep.subr.bf16.mxu0 %v7549_v47  ;;  %3991 = vmatprep.subr.bf16.mxu1 %v7552_v50 }
 0x397   :  { %3951 = vmatpush1.bf16.msra.mxu0 %v7547_v51  ;;  %3992 = vmatpush1.bf16.msra.mxu1 %v7550_v52 }
 0x398   :  { %3952 = vmatprep.subr.bf16.mxu0 %v7555_v53  ;;  %3993 = vmatprep.subr.bf16.mxu1 %v7558_v54 }
 0x39b   :  { %3953 = vmatpush1.bf16.msra.mxu0 %v7553_v55  ;;  %3994 = vmatpush1.bf16.msra.mxu1 %v7556_v56 }
 0x39c   :  { %3954 = vmatprep.subr.bf16.mxu0 %v7561_v57  ;;  %3995 = vmatprep.subr.bf16.mxu1 %v7564_v59 }
 0x39f   :  { %3955 = vmatpush1.bf16.msra.mxu0 %v7559_v60  ;;  %3996 = vmatpush1.bf16.msra.mxu1 %v7562_v62 }
 0x3a0   :  { %3956 = vmatprep.subr.bf16.mxu0 %v7567_v63  ;;  %3997 = vmatprep.subr.bf16.mxu1 %v7570_v0 }
 0x3a3   :  { %3957 = vmatpush1.bf16.msra.mxu0 %v7565_v1  ;;  %3998 = vmatpush1.bf16.msra.mxu1 %v7568_v2 }
 0x3a4   :  { %3958 = vmatprep.subr.bf16.mxu0 %v7573_v3  ;;  %3999 = vmatprep.subr.bf16.mxu1 %v7576_v4 }
 0x3a7   :  { %3959 = vmatpush1.bf16.msra.mxu0 %v7571_v5  ;;  %4000 = vmatpush1.bf16.msra.mxu1 %v7574_v6 }
 0x3a8   :  { %3960 = vmatprep.subr.bf16.mxu0 %v7579_v7  ;;  %4001 = vmatprep.subr.bf16.mxu1 %v7582_v13  ;;  %v7619_v13 = vld [vmem:[#allocation9 + $0x8] ss:$16 sps:$4 sm:$0xff]  }
 0x3ab   :  { %3961 = vmatpush1.bf16.msra.mxu0 %v7577_v14  ;;  %4002 = vmatpush1.bf16.msra.mxu1 %v7580_v16  ;;  %v7622_v14 = vld [vmem:[#allocation9 + $0x208] ss:$16 sps:$4 sm:$0xff]  }
 0x3ac   :  { %3962 = vmatprep.subr.bf16.mxu0 %v7585_v17  ;;  %4003 = vmatprep.subr.bf16.mxu1 %v7588_v18  ;;  %v7627_v18 = vld [vmem:[#allocation9 + $0x2c] ss:$16 sps:$4 sm:$0xff]  }
 0x3af   :  { %3963 = vmatpush1.bf16.msra.mxu0 %v7583_v20  ;;  %4004 = vmatpush1.bf16.msra.mxu1 %v7586_v22  ;;  %v7630_v20 = vld [vmem:[#allocation9 + $0x22c] ss:$16 sps:$4 sm:$0xff]   ;;  %v7625_v22 = vld [vmem:[#allocation9 + $0x28] ss:$16 sps:$4 sm:$0xff]  }
 0x3b0   :  { %3964 = vmatprep.subr.bf16.mxu0 %v7591_v23  ;;  %4005 = vmatprep.subr.bf16.mxu1 %v7594_v24  ;;  %v7628_v23 = vld [vmem:[#allocation9 + $0x228] ss:$16 sps:$4 sm:$0xff]   ;;  %v7633_v24 = vld [vmem:[#allocation9 + $0x4c] ss:$16 sps:$4 sm:$0xff]  }
 0x3b3   :  { %3965 = vmatpush1.bf16.msra.mxu0 %v7589_v49  ;;  %4006 = vmatpush1.bf16.msra.mxu1 %v7592_v26  ;;  %v7636_v49 = vld [vmem:[#allocation9 + $0x24c] ss:$16 sps:$4 sm:$0xff]   ;;  %v7631_v26 = vld [vmem:[#allocation9 + $0x48] ss:$16 sps:$4 sm:$0xff]  }
 0x3b4   :  { %3966 = vmatprep.subr.bf16.mxu0 %v7597_v48  ;;  %4007 = vmatprep.subr.bf16.mxu1 %v7600_v27  ;;  %v7634_v48 = vld [vmem:[#allocation9 + $0x248] ss:$16 sps:$4 sm:$0xff]   ;;  %v7639_v27 = vld [vmem:[#allocation9 + $0x6c] ss:$16 sps:$4 sm:$0xff]  }
 0x3b7   :  { %3967 = vmatpush1.bf16.msra.mxu0 %v7595_v28  ;;  %4008 = vmatpush1.bf16.msra.mxu1 %v7598_v29  ;;  %v7642_v28 = vld [vmem:[#allocation9 + $0x26c] ss:$16 sps:$4 sm:$0xff]   ;;  %v7637_v29 = vld [vmem:[#allocation9 + $0x68] ss:$16 sps:$4 sm:$0xff]  }
 0x3b8   :  { %3968 = vmatprep.subr.bf16.mxu0 %v7603_v30  ;;  %4009 = vmatprep.subr.bf16.mxu1 %v7606_v31  ;;  %v7640_v30 = vld [vmem:[#allocation9 + $0x268] ss:$16 sps:$4 sm:$0xff]   ;;  %v7645_v31 = vld [vmem:[#allocation9 + $0x8c] ss:$16 sps:$4 sm:$0xff]  }
 0x3bb   :  { %3969 = vmatpush1.bf16.msra.mxu0 %v7601_v32  ;;  %4010 = vmatpush1.bf16.msra.mxu1 %v7604_v21  ;;  %v7648_v32 = vld [vmem:[#allocation9 + $0x28c] ss:$16 sps:$4 sm:$0xff]   ;;  %v7643_v21 = vld [vmem:[#allocation9 + $0x88] ss:$16 sps:$4 sm:$0xff]  }
 0x3bc   :  { %3970 = vmatprep.subr.bf16.mxu0 %v7609_v8  ;;  %4011 = vmatprep.subr.bf16.mxu1 %v7612_v61  ;;  %v7646_v8 = vld [vmem:[#allocation9 + $0x288] ss:$16 sps:$4 sm:$0xff]   ;;  %v7651_v61 = vld [vmem:[#allocation9 + $0xac] ss:$16 sps:$4 sm:$0xff]  }
 0x3bf   :  { %3971 = vmatpush1.bf16.msra.mxu0 %v7607_v33  ;;  %4012 = vmatpush1.bf16.msra.mxu1 %v7610_v34  ;;  %v7654_v33 = vld [vmem:[#allocation9 + $0x2ac] ss:$16 sps:$4 sm:$0xff]   ;;  %v7649_v34 = vld [vmem:[#allocation9 + $0xa8] ss:$16 sps:$4 sm:$0xff]  }
 0x3c0   :  { %3972 = vmatprep.subr.bf16.mxu0 %v7615_v35  ;;  %4013 = vmatprep.subr.bf16.mxu1 %v7618_v36  ;;  %v7652_v35 = vld [vmem:[#allocation9 + $0x2a8] ss:$16 sps:$4 sm:$0xff]   ;;  %v7657_v36 = vld [vmem:[#allocation9 + $0xcc] ss:$16 sps:$4 sm:$0xff]  }
 0x3c3   :  { %3973 = vmatpush1.bf16.msra.mxu0 %v7613_v38  ;;  %4014 = vmatpush1.bf16.msra.mxu1 %v7616_v9  ;;  %v7660_v38 = vld [vmem:[#allocation9 + $0x2cc] ss:$16 sps:$4 sm:$0xff]   ;;  %v7655_v9 = vld [vmem:[#allocation9 + $0xc8] ss:$16 sps:$4 sm:$0xff]  }
 0x3c4   :  { %4024 = vmatprep.subr.bf16.mxu0 %v7621_v39  ;;  %4065 = vmatprep.subr.bf16.mxu1 %v7624_v40  ;;  %v7658_v39 = vld [vmem:[#allocation9 + $0x2c8] ss:$16 sps:$4 sm:$0xff]   ;;  %v7663_v40 = vld [vmem:[#allocation9 + $0xec] ss:$16 sps:$4 sm:$0xff]  }
 0x459   :  { %v3176_v46 = vpop.f32.mrb[8].mxu0  ;;  %v3258_v47 = vpop.f32.mrb[8].mxu1 }
 0x45a   :  { %v6885_v50 = vadd.f32 %v3176_v46, %v2444_v42  ;;  %v6887_v51 = vadd.f32 %v3258_v47, %v2452_v43  ;;  %v3178_v52 = vpop.f32.mrb[9].mxu0  ;;  %v3260_v53 = vpop.f32.mrb[9].mxu1  ;;  %v7661_v42 = vld [vmem:[#allocation9 + $0xe8] ss:$16 sps:$4 sm:$0xff]  }
 0x45b   :  { %v6886_v54 = vadd.f32 %v3178_v52, %v2448_v44  ;;  %v6888_v55 = vadd.f32 %v3260_v53, %v2456_v45  ;;  %v3180_v56 = vpop.f32.mrb[10].mxu0  ;;  %v3262_v57 = vpop.f32.mrb[10].mxu1  ;;  %v7664_v43 = vld [vmem:[#allocation9 + $0x2e8] ss:$16 sps:$4 sm:$0xff]   ;;  %v7669_v44 = vld [vmem:[#allocation9 + $0x10c] ss:$16 sps:$4 sm:$0xff]  }
 0x45c   :  { %vm3265_vm8 = vcmp.ge.f32.partialorder %v6885_v50, 0.0  ;;  %v3269_v59 = vmul.f32 0.01, %v6885_v50  ;;  %vm3267_vm9 = vcmp.ge.f32.partialorder %v6887_v51, 0.0  ;;  %v3271_v60 = vmul.f32 0.01, %v6887_v51 }
 0x45d   :  { %vm3266_vm10 = vcmp.ge.f32.partialorder %v6886_v54, 0.0  ;;  %v3270_v62 = vmul.f32 0.01, %v6886_v54  ;;  %vm3268_vm11 = vcmp.ge.f32.partialorder %v6888_v55, 0.0  ;;  %v3272_v63 = vmul.f32 0.01, %v6888_v55 }
 0x45e   :  { %v3273_v0 = vsel %vm3265_vm8, %v6885_v50, %v3269_v59  ;;  %v3275_v1 = vsel %vm3267_vm9, %v6887_v51, %v3271_v60  ;;  %v3181_v2 = vpop.f32.mrb[11].mxu0  ;;  %v3263_v3 = vpop.f32.mrb[11].mxu1  ;;  %v7672_v45 = vld [vmem:[#allocation9 + $0x30c] ss:$16 sps:$4 sm:$0xff]   ;;  %v7667_v46 = vld [vmem:[#allocation9 + $0x108] ss:$16 sps:$4 sm:$0xff]  }
 0x45f   :  { %v3274_v4 = vsel %vm3266_vm10, %v6886_v54, %v3270_v62  ;;  %v3276_v5 = vsel %vm3268_vm11, %v6888_v55, %v3272_v63  ;;  %v8650_v16 = vpack.c.bf16 %v3273_v0, %v3273_v0  ;;  %v8652_v17 = vpack.c.bf16 %v3275_v1, %v3275_v1  ;;  %v7670_v47 = vld [vmem:[#allocation9 + $0x308] ss:$16 sps:$4 sm:$0xff]   ;;  %v7675_v50 = vld [vmem:[#allocation9 + $0x12c] ss:$16 sps:$4 sm:$0xff]  }
 0x460   :  { %v3278_v6 = vpack.c.bf16 %v3274_v4, %v3274_v4  ;;  %v3280_v7 = vpack.c.bf16 %v3276_v5, %v3276_v5  ;;  %v7678_v51 = vld [vmem:[#allocation9 + $0x32c] ss:$16 sps:$4 sm:$0xff]   ;;  %v7673_v52 = vld [vmem:[#allocation9 + $0x128] ss:$16 sps:$4 sm:$0xff]   ;;  %vm8273_vm8 = vmmov 0   ;;  %vm5972_vm10 = vcmask 130048  }
 0x461   :  { %v7676_v53 = vld [vmem:[#allocation9 + $0x328] ss:$16 sps:$4 sm:$0xff]   ;;  %v7681_v54 = vld [vmem:[#allocation9 + $0x14c] ss:$16 sps:$4 sm:$0xff]   ;;  %vm6046_vm11 = vcmask 123904  }
 0x462   :  { %3974 = vmatprep.mubr.bf16.mxu0 %v3278_v6  ;;  %4015 = vmatprep.mubr.bf16.mxu1 %v3280_v7  ;;  %v7684_v55 = vld [vmem:[#allocation9 + $0x34c] ss:$16 sps:$4 sm:$0xff]   ;;  %v7679_v56 = vld [vmem:[#allocation9 + $0x148] ss:$16 sps:$4 sm:$0xff]  }
 0x463   :  { %3975 = vmatmul.mubr.bf16.vlgmr.msra.gmra.mrb[12].mxu0 %v8650_v16  ;;  %4016 = vmatmul.mubr.bf16.vlgmr.msra.gmra.mrb[12].mxu1 %v8652_v17  ;;  %v7682_v57 = vld [vmem:[#allocation9 + $0x348] ss:$16 sps:$4 sm:$0xff]   ;;  %v7687_v59 = vld [vmem:[#allocation9 + $0x16c] ss:$16 sps:$4 sm:$0xff]  }
 0x464   :  { %4025 = vmatpush1.bf16.msra.mxu0 %v7619_v13  ;;  %4066 = vmatpush1.bf16.msra.mxu1 %v7622_v14  ;;  %v7690_v60 = vld [vmem:[#allocation9 + $0x36c] ss:$16 sps:$4 sm:$0xff]   ;;  %v7685_v62 = vld [vmem:[#allocation9 + $0x168] ss:$16 sps:$4 sm:$0xff]  }
 0x465   :  { %4056 = vmatprep.mubr.bf16.mxu0 %v3278_v6  ;;  %4097 = vmatprep.mubr.bf16.mxu1 %v3280_v7  ;;  %v7688_v63 = vld [vmem:[#allocation9 + $0x368] ss:$16 sps:$4 sm:$0xff]   ;;  %v7693_v0 = vld [vmem:[#allocation9 + $0x18c] ss:$16 sps:$4 sm:$0xff]  }
 0x466   :  { %4026 = vmatprep.subr.bf16.mxu0 %v7627_v18  ;;  %4067 = vmatprep.subr.bf16.mxu1 %v7630_v20  ;;  %v7696_v1 = vld [vmem:[#allocation9 + $0x38c] ss:$16 sps:$4 sm:$0xff]   ;;  %v7691_v2 = vld [vmem:[#allocation9 + $0x188] ss:$16 sps:$4 sm:$0xff]  }
 0x467   :  { %v7694_v3 = vld [vmem:[#allocation9 + $0x388] ss:$16 sps:$4 sm:$0xff]   ;;  %v7699_v4 = vld [vmem:[#allocation9 + $0x1ac] ss:$16 sps:$4 sm:$0xff]  }
 0x468   :  { %4027 = vmatpush1.bf16.msra.mxu0 %v7625_v22  ;;  %4068 = vmatpush1.bf16.msra.mxu1 %v7628_v23  ;;  %v7702_v5 = vld [vmem:[#allocation9 + $0x3ac] ss:$16 sps:$4 sm:$0xff]   ;;  %v7697_v6 = vld [vmem:[#allocation9 + $0x1a8] ss:$16 sps:$4 sm:$0xff]  }
 0x469   :  { %4028 = vmatprep.subr.bf16.mxu0 %v7633_v24  ;;  %4069 = vmatprep.subr.bf16.mxu1 %v7636_v49  ;;  %v7700_v7 = vld [vmem:[#allocation9 + $0x3a8] ss:$16 sps:$4 sm:$0xff]   ;;  %v7705_v13 = vld [vmem:[#allocation9 + $0x1cc] ss:$16 sps:$4 sm:$0xff]  }
 0x46a   :  { %v7708_v14 = vld [vmem:[#allocation9 + $0x3cc] ss:$16 sps:$4 sm:$0xff]   ;;  %v7703_v18 = vld [vmem:[#allocation9 + $0x1c8] ss:$16 sps:$4 sm:$0xff]  }
 0x46b   :  { %v7706_v20 = vld [vmem:[#allocation9 + $0x3c8] ss:$16 sps:$4 sm:$0xff]   ;;  %v7711_v22 = vld [vmem:[#allocation9 + $0x1ec] ss:$16 sps:$4 sm:$0xff]  }
 0x46c   :  { %4029 = vmatpush1.bf16.msra.mxu0 %v7631_v26  ;;  %4070 = vmatpush1.bf16.msra.mxu1 %v7634_v48  ;;  %v7714_v23 = vld [vmem:[#allocation9 + $0x3ec] ss:$16 sps:$4 sm:$0xff]   ;;  %v7709_v24 = vld [vmem:[#allocation9 + $0x1e8] ss:$16 sps:$4 sm:$0xff]  }
 0x46d   :  { %4030 = vmatprep.subr.bf16.mxu0 %v7639_v27  ;;  %4071 = vmatprep.subr.bf16.mxu1 %v7642_v28  ;;  %v7712_v49 = vld [vmem:[#allocation9 + $0x3e8] ss:$16 sps:$4 sm:$0xff]   ;;  %v7717_v26 = vld [vmem:[#allocation12 + $0x4] ss:$8 sps:$4 sm:$0xff]  }
 0x46e   :  { %v7720_v48 = vld [vmem:[#allocation10 + $0x4] ss:$8 sps:$4 sm:$0xff]   ;;  %v7715_v27 = vld [vmem:[#allocation12] ss:$8 sps:$4 sm:$0xff]  }
 0x46f   :  { %v7718_v28 = vld [vmem:[#allocation10] ss:$8 sps:$4 sm:$0xff]  }
 0x470   :  { %4031 = vmatpush1.bf16.msra.mxu0 %v7637_v29  ;;  %4072 = vmatpush1.bf16.msra.mxu1 %v7640_v30  ;;  %v7723_v29 = vld [vmem:[#allocation12 + $0x14] ss:$8 sps:$4 sm:$0xff]  }
 0x471   :  { %4032 = vmatprep.subr.bf16.mxu0 %v7645_v31  ;;  %4073 = vmatprep.subr.bf16.mxu1 %v7648_v32  ;;  %v7726_v30 = vld [vmem:[#allocation10 + $0x14] ss:$8 sps:$4 sm:$0xff]   ;;  %v7721_v31 = vld [vmem:[#allocation12 + $0x10] ss:$8 sps:$4 sm:$0xff]  }
 0x472   :  { %v7724_v32 = vld [vmem:[#allocation10 + $0x10] ss:$8 sps:$4 sm:$0xff]  }
 0x474   :  { %4033 = vmatpush1.bf16.msra.mxu0 %v7643_v21  ;;  %4074 = vmatpush1.bf16.msra.mxu1 %v7646_v8  ;;  %v7729_v21 = vld [vmem:[#allocation12 + $0x24] ss:$8 sps:$4 sm:$0xff]  }
 0x475   :  { %4034 = vmatprep.subr.bf16.mxu0 %v7651_v61  ;;  %4075 = vmatprep.subr.bf16.mxu1 %v7654_v33  ;;  %v7732_v8 = vld [vmem:[#allocation10 + $0x24] ss:$8 sps:$4 sm:$0xff]   ;;  %v7727_v61 = vld [vmem:[#allocation12 + $0x20] ss:$8 sps:$4 sm:$0xff]  }
 0x476   :  { %v7730_v33 = vld [vmem:[#allocation10 + $0x20] ss:$8 sps:$4 sm:$0xff]  }
 0x478   :  { %4035 = vmatpush1.bf16.msra.mxu0 %v7649_v34  ;;  %4076 = vmatpush1.bf16.msra.mxu1 %v7652_v35  ;;  %v7735_v34 = vld [vmem:[#allocation12 + $0x34] ss:$8 sps:$4 sm:$0xff]  }
 0x479   :  { %4036 = vmatprep.subr.bf16.mxu0 %v7657_v36  ;;  %4077 = vmatprep.subr.bf16.mxu1 %v7660_v38  ;;  %v7738_v35 = vld [vmem:[#allocation10 + $0x34] ss:$8 sps:$4 sm:$0xff]   ;;  %v7741_v36 = vld [vmem:[#allocation12 + $0x44] ss:$8 sps:$4 sm:$0xff]  }
 0x47a   :  { %v7744_v38 = vld [vmem:[#allocation10 + $0x44] ss:$8 sps:$4 sm:$0xff]  }
 0x47c   :  { %4037 = vmatpush1.bf16.msra.mxu0 %v7655_v9  ;;  %4078 = vmatpush1.bf16.msra.mxu1 %v7658_v39  ;;  %v7739_v9 = vld [vmem:[#allocation12 + $0x40] ss:$8 sps:$4 sm:$0xff]  }
 0x47d   :  { %4038 = vmatprep.subr.bf16.mxu0 %v7663_v40  ;;  %4079 = vmatprep.subr.bf16.mxu1 %v7666_v41  ;;  %v7742_v39 = vld [vmem:[#allocation10 + $0x40] ss:$8 sps:$4 sm:$0xff]   ;;  %v7747_v40 = vld [vmem:[#allocation12 + $0x54] ss:$8 sps:$4 sm:$0xff]  }
 0x47e   :  { %v7750_v41 = vld [vmem:[#allocation10 + $0x54] ss:$8 sps:$4 sm:$0xff]  }
 0x480   :  { %4039 = vmatpush1.bf16.msra.mxu0 %v7661_v42  ;;  %4080 = vmatpush1.bf16.msra.mxu1 %v7664_v43  ;;  %v7745_v42 = vld [vmem:[#allocation12 + $0x50] ss:$8 sps:$4 sm:$0xff]  }
 0x481   :  { %4040 = vmatprep.subr.bf16.mxu0 %v7669_v44  ;;  %4081 = vmatprep.subr.bf16.mxu1 %v7672_v45  ;;  %v7748_v43 = vld [vmem:[#allocation10 + $0x50] ss:$8 sps:$4 sm:$0xff]   ;;  %v7753_v44 = vld [vmem:[#allocation12 + $0x64] ss:$8 sps:$4 sm:$0xff]  }
 0x482   :  { %v7756_v45 = vld [vmem:[#allocation10 + $0x64] ss:$8 sps:$4 sm:$0xff]  }
 0x484   :  { %4041 = vmatpush1.bf16.msra.mxu0 %v7667_v46  ;;  %4082 = vmatpush1.bf16.msra.mxu1 %v7670_v47  ;;  %v7751_v46 = vld [vmem:[#allocation12 + $0x60] ss:$8 sps:$4 sm:$0xff]  }
 0x485   :  { %4042 = vmatprep.subr.bf16.mxu0 %v7675_v50  ;;  %4083 = vmatprep.subr.bf16.mxu1 %v7678_v51  ;;  %v7754_v47 = vld [vmem:[#allocation10 + $0x60] ss:$8 sps:$4 sm:$0xff]   ;;  %v7759_v50 = vld [vmem:[#allocation12 + $0x74] ss:$8 sps:$4 sm:$0xff]  }
 0x486   :  { %v7762_v51 = vld [vmem:[#allocation10 + $0x74] ss:$8 sps:$4 sm:$0xff]  }
 0x488   :  { %4043 = vmatpush1.bf16.msra.mxu0 %v7673_v52  ;;  %4084 = vmatpush1.bf16.msra.mxu1 %v7676_v53  ;;  %v7757_v52 = vld [vmem:[#allocation12 + $0x70] ss:$8 sps:$4 sm:$0xff]  }
 0x489   :  { %4044 = vmatprep.subr.bf16.mxu0 %v7681_v54  ;;  %4085 = vmatprep.subr.bf16.mxu1 %v7684_v55  ;;  %v7760_v53 = vld [vmem:[#allocation10 + $0x70] ss:$8 sps:$4 sm:$0xff]   ;;  %v7765_v54 = vld [vmem:[#allocation12 + $0x84] ss:$8 sps:$4 sm:$0xff]  }
 0x48a   :  { %v7768_v55 = vld [vmem:[#allocation10 + $0x84] ss:$8 sps:$4 sm:$0xff]  }
 0x48c   :  { %4045 = vmatpush1.bf16.msra.mxu0 %v7679_v56  ;;  %4086 = vmatpush1.bf16.msra.mxu1 %v7682_v57  ;;  %v7763_v56 = vld [vmem:[#allocation12 + $0x80] ss:$8 sps:$4 sm:$0xff]  }
 0x48d   :  { %4046 = vmatprep.subr.bf16.mxu0 %v7687_v59  ;;  %4087 = vmatprep.subr.bf16.mxu1 %v7690_v60  ;;  %v7766_v57 = vld [vmem:[#allocation10 + $0x80] ss:$8 sps:$4 sm:$0xff]   ;;  %v7771_v59 = vld [vmem:[#allocation12 + $0x94] ss:$8 sps:$4 sm:$0xff]  }
 0x48e   :  { %v7774_v60 = vld [vmem:[#allocation10 + $0x94] ss:$8 sps:$4 sm:$0xff]  }
 0x490   :  { %4047 = vmatpush1.bf16.msra.mxu0 %v7685_v62  ;;  %4088 = vmatpush1.bf16.msra.mxu1 %v7688_v63  ;;  %v7769_v62 = vld [vmem:[#allocation12 + $0x90] ss:$8 sps:$4 sm:$0xff]  }
 0x491   :  { %4048 = vmatprep.subr.bf16.mxu0 %v7693_v0  ;;  %4089 = vmatprep.subr.bf16.mxu1 %v7696_v1  ;;  %v7772_v63 = vld [vmem:[#allocation10 + $0x90] ss:$8 sps:$4 sm:$0xff]   ;;  %v7777_v0 = vld [vmem:[#allocation12 + $0xa4] ss:$8 sps:$4 sm:$0xff]  }
 0x492   :  { %v7780_v1 = vld [vmem:[#allocation10 + $0xa4] ss:$8 sps:$4 sm:$0xff]  }
 0x494   :  { %4049 = vmatpush1.bf16.msra.mxu0 %v7691_v2  ;;  %4090 = vmatpush1.bf16.msra.mxu1 %v7694_v3  ;;  %v7775_v2 = vld [vmem:[#allocation12 + $0xa0] ss:$8 sps:$4 sm:$0xff]  }
 0x495   :  { %4050 = vmatprep.subr.bf16.mxu0 %v7699_v4  ;;  %4091 = vmatprep.subr.bf16.mxu1 %v7702_v5  ;;  %v7778_v3 = vld [vmem:[#allocation10 + $0xa0] ss:$8 sps:$4 sm:$0xff]   ;;  %v7783_v4 = vld [vmem:[#allocation12 + $0xb4] ss:$8 sps:$4 sm:$0xff]  }
 0x496   :  { %v7786_v5 = vld [vmem:[#allocation10 + $0xb4] ss:$8 sps:$4 sm:$0xff]  }
 0x498   :  { %4051 = vmatpush1.bf16.msra.mxu0 %v7697_v6  ;;  %4092 = vmatpush1.bf16.msra.mxu1 %v7700_v7  ;;  %v7781_v6 = vld [vmem:[#allocation12 + $0xb0] ss:$8 sps:$4 sm:$0xff]  }
 0x499   :  { %4052 = vmatprep.subr.bf16.mxu0 %v7705_v13  ;;  %4093 = vmatprep.subr.bf16.mxu1 %v7708_v14  ;;  %v7784_v7 = vld [vmem:[#allocation10 + $0xb0] ss:$8 sps:$4 sm:$0xff]   ;;  %v7789_v13 = vld [vmem:[#allocation12 + $0xc4] ss:$8 sps:$4 sm:$0xff]  }
 0x49a   :  { %v7792_v14 = vld [vmem:[#allocation10 + $0xc4] ss:$8 sps:$4 sm:$0xff]  }
 0x49c   :  { %4053 = vmatpush1.bf16.msra.mxu0 %v7703_v18  ;;  %4094 = vmatpush1.bf16.msra.mxu1 %v7706_v20  ;;  %v7787_v18 = vld [vmem:[#allocation12 + $0xc0] ss:$8 sps:$4 sm:$0xff]  }
 0x49d   :  { %4054 = vmatprep.subr.bf16.mxu0 %v7711_v22  ;;  %4095 = vmatprep.subr.bf16.mxu1 %v7714_v23  ;;  %v7790_v20 = vld [vmem:[#allocation10 + $0xc0] ss:$8 sps:$4 sm:$0xff]   ;;  %v7795_v22 = vld [vmem:[#allocation12 + $0xd4] ss:$8 sps:$4 sm:$0xff]  }
 0x49e   :  { %v7798_v23 = vld [vmem:[#allocation10 + $0xd4] ss:$8 sps:$4 sm:$0xff]  }
 0x4a0   :  { %4055 = vmatpush1.bf16.msra.mxu0 %v7709_v24  ;;  %4096 = vmatpush1.bf16.msra.mxu1 %v7712_v49  ;;  %v7793_v24 = vld [vmem:[#allocation12 + $0xd0] ss:$8 sps:$4 sm:$0xff]  }
 0x4a1   :  { %4620 = vmatprep.subr.bf16.mxu0 %v7717_v26  ;;  %5033 = vmatprep.subr.bf16.mxu1 %v7720_v48  ;;  %v7796_v49 = vld [vmem:[#allocation10 + $0xd0] ss:$8 sps:$4 sm:$0xff]   ;;  %v7801_v26 = vld [vmem:[#allocation12 + $0xe4] ss:$8 sps:$4 sm:$0xff]  }
 0x4a2   :  { %v7804_v48 = vld [vmem:[#allocation10 + $0xe4] ss:$8 sps:$4 sm:$0xff]  }
 0x4a3   :  { %4057 = vmatmul.mubr.bf16.vlgmr.msra.gmra.mrb[16].mxu0 %v8650_v16  ;;  %4098 = vmatmul.mubr.bf16.vlgmr.msra.gmra.mrb[16].mxu1 %v8652_v17  ;;  %v7733_v16 = vld [vmem:[#allocation12 + $0x30] ss:$8 sps:$4 sm:$0xff]  }
 0x4a4   :  { %4621 = vmatpush1.bf16.msra.mxu0 %v7715_v27  ;;  %5034 = vmatpush1.bf16.msra.mxu1 %v7718_v28  ;;  %v7736_v17 = vld [vmem:[#allocation10 + $0x30] ss:$8 sps:$4 sm:$0xff]   ;;  %v7799_v27 = vld [vmem:[#allocation12 + $0xe0] ss:$8 sps:$4 sm:$0xff]  }
 0x4a5   :  { %4622 = vmatprep.subr.bf16.mxu0 %v7723_v29  ;;  %5035 = vmatprep.subr.bf16.mxu1 %v7726_v30  ;;  %v7802_v28 = vld [vmem:[#allocation10 + $0xe0] ss:$8 sps:$4 sm:$0xff]   ;;  %v7807_v29 = vld [vmem:[#allocation12 + $0xf4] ss:$8 sps:$4 sm:$0xff]  }
 0x4a6   :  { %v7810_v30 = vld [vmem:[#allocation10 + $0xf4] ss:$8 sps:$4 sm:$0xff]  }
 0x4a8   :  { %4623 = vmatpush1.bf16.msra.mxu0 %v7721_v31  ;;  %5036 = vmatpush1.bf16.msra.mxu1 %v7724_v32  ;;  %v7805_v31 = vld [vmem:[#allocation12 + $0xf0] ss:$8 sps:$4 sm:$0xff]  }
 0x4a9   :  { %4624 = vmatprep.subr.bf16.mxu0 %v7729_v21  ;;  %5037 = vmatprep.subr.bf16.mxu1 %v7732_v8  ;;  %v7808_v32 = vld [vmem:[#allocation10 + $0xf0] ss:$8 sps:$4 sm:$0xff]   ;;  %v7813_v21 = vld [vmem:[#allocation12 + $0x104] ss:$8 sps:$4 sm:$0xff]  }
 0x4aa   :  { %v7816_v8 = vld [vmem:[#allocation10 + $0x104] ss:$8 sps:$4 sm:$0xff]  }
 0x4ac   :  { %4625 = vmatpush1.bf16.msra.mxu0 %v7727_v61  ;;  %5038 = vmatpush1.bf16.msra.mxu1 %v7730_v33  ;;  %v8661_v61 = vld [vmem:[%s8927_s10] sm:$0xf] }
 0x4ad   :  { %4626 = vmatprep.subr.bf16.mxu0 %v7735_v34  ;;  %5039 = vmatprep.subr.bf16.mxu1 %v7738_v35  ;;  %v3285_v33 = vrot.slane %v8661_v61, %v8576_v10  ;;  %v3289_v34 = vrot.slane %v8661_v61, %v8579_v11 }
 0x4b0   :  { %4627 = vmatpush1.bf16.msra.mxu0 %v7733_v16  ;;  %5040 = vmatpush1.bf16.msra.mxu1 %v7736_v17 }
 0x4b1   :  { %4628 = vmatprep.subr.bf16.mxu0 %v7741_v36  ;;  %5041 = vmatprep.subr.bf16.mxu1 %v7744_v38 }
 0x4b4   :  { %4629 = vmatpush1.bf16.msra.mxu0 %v7739_v9  ;;  %5042 = vmatpush1.bf16.msra.mxu1 %v7742_v39 }
 0x4b5   :  { %4630 = vmatprep.subr.bf16.mxu0 %v7747_v40  ;;  %5043 = vmatprep.subr.bf16.mxu1 %v7750_v41 }
 0x4b8   :  { %4631 = vmatpush1.bf16.msra.mxu0 %v7745_v42  ;;  %5044 = vmatpush1.bf16.msra.mxu1 %v7748_v43 }
 0x4b9   :  { %4632 = vmatprep.subr.bf16.mxu0 %v7753_v44  ;;  %5045 = vmatprep.subr.bf16.mxu1 %v7756_v45 }
 0x4bc   :  { %4633 = vmatpush1.bf16.msra.mxu0 %v7751_v46  ;;  %5046 = vmatpush1.bf16.msra.mxu1 %v7754_v47 }
 0x4bd   :  { %4634 = vmatprep.subr.bf16.mxu0 %v7759_v50  ;;  %5047 = vmatprep.subr.bf16.mxu1 %v7762_v51 }
 0x4c0   :  { %4635 = vmatpush1.bf16.msra.mxu0 %v7757_v52  ;;  %5048 = vmatpush1.bf16.msra.mxu1 %v7760_v53 }
 0x4c1   :  { %4636 = vmatprep.subr.bf16.mxu0 %v7765_v54  ;;  %5049 = vmatprep.subr.bf16.mxu1 %v7768_v55  ;;  %v7811_v54 = vld [vmem:[#allocation12 + $0x100] ss:$8 sps:$4 sm:$0xff]  }
 0x4c2   :  { %v7814_v55 = vld [vmem:[#allocation10 + $0x100] ss:$8 sps:$4 sm:$0xff]  }
 0x4c4   :  { %4637 = vmatpush1.bf16.msra.mxu0 %v7763_v56  ;;  %5050 = vmatpush1.bf16.msra.mxu1 %v7766_v57  ;;  %v7819_v57 = vld [vmem:[#allocation12 + $0x114] ss:$8 sps:$4 sm:$0xff]  }
 0x4c5   :  { %4638 = vmatprep.subr.bf16.mxu0 %v7771_v59  ;;  %5051 = vmatprep.subr.bf16.mxu1 %v7774_v60  ;;  %v7822_v59 = vld [vmem:[#allocation10 + $0x114] ss:$8 sps:$4 sm:$0xff]   ;;  %v7825_v60 = vld [vmem:[#allocation12 + $0x124] ss:$8 sps:$4 sm:$0xff]  }
 0x4c8   :  { %4639 = vmatpush1.bf16.msra.mxu0 %v7769_v62  ;;  %5052 = vmatpush1.bf16.msra.mxu1 %v7772_v63  ;;  %v7828_v62 = vld [vmem:[#allocation10 + $0x124] ss:$8 sps:$4 sm:$0xff]   ;;  %v7823_v63 = vld [vmem:[#allocation12 + $0x120] ss:$8 sps:$4 sm:$0xff]  }
 0x4c9   :  { %4640 = vmatprep.subr.bf16.mxu0 %v7777_v0  ;;  %5053 = vmatprep.subr.bf16.mxu1 %v7780_v1  ;;  %v7826_v0 = vld [vmem:[#allocation10 + $0x120] ss:$8 sps:$4 sm:$0xff]   ;;  %v7831_v1 = vld [vmem:[#allocation12 + $0x134] ss:$8 sps:$4 sm:$0xff]  }
 0x4cc   :  { %4641 = vmatpush1.bf16.msra.mxu0 %v7775_v2  ;;  %5054 = vmatpush1.bf16.msra.mxu1 %v7778_v3  ;;  %v7834_v2 = vld [vmem:[#allocation10 + $0x134] ss:$8 sps:$4 sm:$0xff]   ;;  %v7829_v3 = vld [vmem:[#allocation12 + $0x130] ss:$8 sps:$4 sm:$0xff]  }
 0x4cd   :  { %4642 = vmatprep.subr.bf16.mxu0 %v7783_v4  ;;  %5055 = vmatprep.subr.bf16.mxu1 %v7786_v5  ;;  %v7832_v4 = vld [vmem:[#allocation10 + $0x130] ss:$8 sps:$4 sm:$0xff]   ;;  %v7837_v5 = vld [vmem:[#allocation12 + $0x144] ss:$8 sps:$4 sm:$0xff]  }
 0x4d0   :  { %4643 = vmatpush1.bf16.msra.mxu0 %v7781_v6  ;;  %5056 = vmatpush1.bf16.msra.mxu1 %v7784_v7  ;;  %v7840_v6 = vld [vmem:[#allocation10 + $0x144] ss:$8 sps:$4 sm:$0xff]   ;;  %v7835_v7 = vld [vmem:[#allocation12 + $0x140] ss:$8 sps:$4 sm:$0xff]  }
 0x4d1   :  { %4644 = vmatprep.subr.bf16.mxu0 %v7789_v13  ;;  %5057 = vmatprep.subr.bf16.mxu1 %v7792_v14  ;;  %v7838_v13 = vld [vmem:[#allocation10 + $0x140] ss:$8 sps:$4 sm:$0xff]   ;;  %v7843_v14 = vld [vmem:[#allocation12 + $0x154] ss:$8 sps:$4 sm:$0xff]  }
 0x4d4   :  { %4645 = vmatpush1.bf16.msra.mxu0 %v7787_v18  ;;  %5058 = vmatpush1.bf16.msra.mxu1 %v7790_v20  ;;  %v7846_v18 = vld [vmem:[#allocation10 + $0x154] ss:$8 sps:$4 sm:$0xff]   ;;  %v7841_v20 = vld [vmem:[#allocation12 + $0x150] ss:$8 sps:$4 sm:$0xff]  }
 0x4d5   :  { %4646 = vmatprep.subr.bf16.mxu0 %v7795_v22  ;;  %5059 = vmatprep.subr.bf16.mxu1 %v7798_v23  ;;  %v7844_v22 = vld [vmem:[#allocation10 + $0x150] ss:$8 sps:$4 sm:$0xff]   ;;  %v7849_v23 = vld [vmem:[#allocation12 + $0x164] ss:$8 sps:$4 sm:$0xff]  }
 0x4d8   :  { %4647 = vmatpush1.bf16.msra.mxu0 %v7793_v24  ;;  %5060 = vmatpush1.bf16.msra.mxu1 %v7796_v49  ;;  %v7852_v24 = vld [vmem:[#allocation10 + $0x164] ss:$8 sps:$4 sm:$0xff]   ;;  %v7847_v49 = vld [vmem:[#allocation12 + $0x160] ss:$8 sps:$4 sm:$0xff]  }
 0x4d9   :  { %4648 = vmatprep.subr.bf16.mxu0 %v7801_v26  ;;  %5061 = vmatprep.subr.bf16.mxu1 %v7804_v48  ;;  %v7850_v26 = vld [vmem:[#allocation10 + $0x160] ss:$8 sps:$4 sm:$0xff]   ;;  %v7855_v48 = vld [vmem:[#allocation12 + $0x174] ss:$8 sps:$4 sm:$0xff]  }
 0x4dc   :  { %4649 = vmatpush1.bf16.msra.mxu0 %v7799_v27  ;;  %5062 = vmatpush1.bf16.msra.mxu1 %v7802_v28  ;;  %v7858_v27 = vld [vmem:[#allocation10 + $0x174] ss:$8 sps:$4 sm:$0xff]   ;;  %v7853_v28 = vld [vmem:[#allocation12 + $0x170] ss:$8 sps:$4 sm:$0xff]  }
 0x4dd   :  { %4650 = vmatprep.subr.bf16.mxu0 %v7807_v29  ;;  %5063 = vmatprep.subr.bf16.mxu1 %v7810_v30  ;;  %v7856_v29 = vld [vmem:[#allocation10 + $0x170] ss:$8 sps:$4 sm:$0xff]   ;;  %v7861_v30 = vld [vmem:[#allocation12 + $0x184] ss:$8 sps:$4 sm:$0xff]  }
 0x4e0   :  { %4651 = vmatpush1.bf16.msra.mxu0 %v7805_v31  ;;  %5064 = vmatpush1.bf16.msra.mxu1 %v7808_v32  ;;  %v7864_v31 = vld [vmem:[#allocation10 + $0x184] ss:$8 sps:$4 sm:$0xff]   ;;  %v7859_v32 = vld [vmem:[#allocation12 + $0x180] ss:$8 sps:$4 sm:$0xff]  }
 0x4e1   :  { %4661 = vmatprep.subr.bf16.mxu0 %v7813_v21  ;;  %5074 = vmatprep.subr.bf16.mxu1 %v7816_v8  ;;  %v7862_v21 = vld [vmem:[#allocation10 + $0x180] ss:$8 sps:$4 sm:$0xff]   ;;  %v7867_v8 = vld [vmem:[#allocation12 + $0x194] ss:$8 sps:$4 sm:$0xff]  }
 0x536   :  { %v3976_v35 = vpop.f32.mrb[12].mxu0  ;;  %v4017_v16 = vpop.f32.mrb[12].mxu1 }
 0x537   :  { %v3977_v17 = vadd.f32 %v3976_v35, %v3285_v33  ;;  %v3978_v36 = vpop.f32.mrb[13].mxu0  ;;  %v4019_v38 = vpop.f32.mrb[13].mxu1  ;;  %v7870_v33 = vld [vmem:[#allocation10 + $0x194] ss:$8 sps:$4 sm:$0xff]   ;;  %v7868_v35 = vld [vmem:[#allocation10 + $0x190] ss:$8 sps:$4 sm:$0xff]  }
 0x538   :  { %v3979_v9 = vadd.f32 %v3978_v36, %v3289_v34  ;;  %v3980_v39 = vpop.f32.mrb[14].mxu0  ;;  %v4021_v40 = vpop.f32.mrb[14].mxu1  ;;  %v7865_v34 = vld [vmem:[#allocation12 + $0x190] ss:$8 sps:$4 sm:$0xff]   ;;  %v7871_v36 = vld [vmem:[#allocation12 + $0x1a0] ss:$8 sps:$4 sm:$0xff]  }
 0x539   :  { %v4018_v41 = vadd.f32 %v4017_v16, %v3977_v17  ;;  %v3981_v42 = vpop.f32.mrb[15].mxu0  ;;  %v4022_v43 = vpop.f32.mrb[15].mxu1  ;;  %v7873_v16 = vld [vmem:[#allocation12 + $0x1a4] ss:$8 sps:$4 sm:$0xff]   ;;  %v7882_v39 = vld [vmem:[#allocation10 + $0x1b4] ss:$8 sps:$4 sm:$0xff]  }
 0x53a   :  { %v4020_v44 = vadd.f32 %v4019_v38, %v3979_v9  ;;  %v7876_v17 = vld [vmem:[#allocation10 + $0x1a4] ss:$8 sps:$4 sm:$0xff]   ;;  %v7874_v38 = vld [vmem:[#allocation10 + $0x1a0] ss:$8 sps:$4 sm:$0xff]   ;;  %v7879_v9 = vld [vmem:[#allocation12 + $0x1b4] ss:$8 sps:$4 sm:$0xff]  }
 0x53b   :  { %v4106_v45 = vadd.f32 %v4018_v41, %v8622_v12  ;;  %v7817_v12 = vld [vmem:[#allocation12 + $0x110] ss:$8 sps:$4 sm:$0xff]   ;;  %v7885_v42 = vld [vmem:[#allocation12 + $0x1c4] ss:$8 sps:$4 sm:$0xff]  }
 0x53c   :  { %v4107_v46 = vadd.f32 %v4020_v44, %v8624_v15  ;;  %v7820_v15 = vld [vmem:[#allocation10 + $0x110] ss:$8 sps:$4 sm:$0xff]   ;;  %v7888_v43 = vld [vmem:[#allocation10 + $0x1c4] ss:$8 sps:$4 sm:$0xff]   ;;  %v7883_v44 = vld [vmem:[#allocation12 + $0x1c0] ss:$8 sps:$4 sm:$0xff]  }
 0x53d   :  { %vm4110_vm12 = vcmp.ge.f32.partialorder %v4106_v45, 0.0  ;;  %v4114_v47 = vmul.f32 0.01, %v4106_v45  ;;  %v7877_v40 = vld [vmem:[#allocation12 + $0x1b0] ss:$8 sps:$4 sm:$0xff]  }
 0x53e   :  { %v4115_v50 = vmul.f32 0.01, %v4107_v46  ;;  %vm4111_vm13 = vcmp.ge.f32.partialorder %v4107_v46, 0.0  ;;  %v7880_v41 = vld [vmem:[#allocation10 + $0x1b0] ss:$8 sps:$4 sm:$0xff]  }
 0x53f   :  { %v4118_v51 = vsel %vm4110_vm12, %v4106_v45, %v4114_v47  ;;  %v7886_v45 = vld [vmem:[#allocation10 + $0x1c0] ss:$8 sps:$4 sm:$0xff]   ;;  %v7894_v47 = vld [vmem:[#allocation10 + $0x1d4] ss:$8 sps:$4 sm:$0xff]  }
 0x540   :  { %v4119_v52 = vsel %vm4111_vm13, %v4107_v46, %v4115_v50  ;;  %v4285_v56 = vpack.c.bf16 %v4118_v51, %v4118_v51  ;;  %v7891_v46 = vld [vmem:[#allocation12 + $0x1d4] ss:$8 sps:$4 sm:$0xff]   ;;  %v3293_v50 = vrot.slane %v8661_v61, %v8593_v25  ;;  %v3297_v51 = vrot.slane %v8661_v61, %v8586_v37  ;;  %v7895_v37 = vld [vmem:[#allocation12 + $0x1e0] ss:$8 sps:$4 sm:$0xff]  }
 0x541   :  { %v4286_v53 = vpack.c.bf16 %v4119_v52, %v4119_v52  ;;  %v7889_v52 = vld [vmem:[#allocation12 + $0x1d0] ss:$8 sps:$4 sm:$0xff]   ;;  %v7898_v61 = vld [vmem:[#allocation10 + $0x1e0] ss:$8 sps:$4 sm:$0xff]  }
 0x543   :  { %4652 = vmatprep.mubr.bf16.mxu0 %v4286_v53  ;;  %5065 = vmatprep.mubr.bf16.mxu1 %v4286_v53  ;;  %v7892_v53 = vld [vmem:[#allocation10 + $0x1d0] ss:$8 sps:$4 sm:$0xff]  }
 0x544   :  { %4653 = vmatmul.mubr.bf16.vlgmr.msra.gmra.mrb[20].mxu0 %v4285_v56  ;;  %5066 = vmatmul.mubr.bf16.vlgmr.msra.gmra.mrb[20].mxu1 %v4285_v56  ;;  %v7897_v56 = vld [vmem:[#allocation12 + $0x1e4] ss:$8 sps:$4 sm:$0xff]  }
 0x545   :  { %4662 = vmatpush1.bf16.msra.mxu0 %v7811_v54  ;;  %5075 = vmatpush1.bf16.msra.mxu1 %v7814_v55 }
 0x546   :  { %4663 = vmatprep.subr.bf16.mxu0 %v7819_v57  ;;  %5076 = vmatprep.subr.bf16.mxu1 %v7822_v59  ;;  %v7900_v57 = vld [vmem:[#allocation10 + $0x1e4] ss:$8 sps:$4 sm:$0xff]  }
 0x549   :  { %4664 = vmatpush1.bf16.msra.mxu0 %v7817_v12  ;;  %5077 = vmatpush1.bf16.msra.mxu1 %v7820_v15 }
 0x54a   :  { %4665 = vmatprep.subr.bf16.mxu0 %v7825_v60  ;;  %5078 = vmatprep.subr.bf16.mxu1 %v7828_v62 }
 0x54d   :  { %4666 = vmatpush1.bf16.msra.mxu0 %v7823_v63  ;;  %5079 = vmatpush1.bf16.msra.mxu1 %v7826_v0 }
 0x54e   :  { %4667 = vmatprep.subr.bf16.mxu0 %v7831_v1  ;;  %5080 = vmatprep.subr.bf16.mxu1 %v7834_v2 }
 0x551   :  { %4668 = vmatpush1.bf16.msra.mxu0 %v7829_v3  ;;  %5081 = vmatpush1.bf16.msra.mxu1 %v7832_v4  ;;  %v7903_v3 = vld [vmem:[#allocation12 + $0x1f4] ss:$8 sps:$4 sm:$0xff]  }
 0x552   :  { %4669 = vmatprep.subr.bf16.mxu0 %v7837_v5  ;;  %5082 = vmatprep.subr.bf16.mxu1 %v7840_v6  ;;  %v7906_v4 = vld [vmem:[#allocation10 + $0x1f4] ss:$8 sps:$4 sm:$0xff]  }
 0x555   :  { %4670 = vmatpush1.bf16.msra.mxu0 %v7835_v7  ;;  %5083 = vmatpush1.bf16.msra.mxu1 %v7838_v13  ;;  %v7901_v7 = vld [vmem:[#allocation12 + $0x1f0] ss:$8 sps:$4 sm:$0xff]  }
 0x556   :  { %4671 = vmatprep.subr.bf16.mxu0 %v7843_v14  ;;  %5084 = vmatprep.subr.bf16.mxu1 %v7846_v18  ;;  %v7904_v14 = vld [vmem:[#allocation10 + $0x1f0] ss:$8 sps:$4 sm:$0xff]  }
 0x559   :  { %4672 = vmatpush1.bf16.msra.mxu0 %v7841_v20  ;;  %5085 = vmatpush1.bf16.msra.mxu1 %v7844_v22  ;;  %v7909_v20 = vld [vmem:[%s8930_s13 + $0x4] ss:$8 sps:$4 sm:$0xff]  }
 0x55a   :  { %4673 = vmatprep.subr.bf16.mxu0 %v7849_v23  ;;  %5086 = vmatprep.subr.bf16.mxu1 %v7852_v24 }
 0x55d   :  { %4674 = vmatpush1.bf16.msra.mxu0 %v7847_v49  ;;  %5087 = vmatpush1.bf16.msra.mxu1 %v7850_v26  ;;  %v7912_v49 = vld [vmem:[%s8930_s13 + $0x14] ss:$8 sps:$4 sm:$0xff]   ;;  %v7910_v26 = vld [vmem:[%s8930_s13 + $0x10] ss:$8 sps:$4 sm:$0xff]  }
 0x55e   :  { %4675 = vmatprep.subr.bf16.mxu0 %v7855_v48  ;;  %5088 = vmatprep.subr.bf16.mxu1 %v7858_v27  ;;  %v7915_v48 = vld [vmem:[%s8930_s13 + $0x24] ss:$8 sps:$4 sm:$0xff]   ;;  %v7913_v27 = vld [vmem:[%s8930_s13 + $0x20] ss:$8 sps:$4 sm:$0xff]  }
 0x561   :  { %4676 = vmatpush1.bf16.msra.mxu0 %v7853_v28  ;;  %5089 = vmatpush1.bf16.msra.mxu1 %v7856_v29  ;;  %v7918_v28 = vld [vmem:[%s8930_s13 + $0x34] ss:$8 sps:$4 sm:$0xff]   ;;  %v7916_v29 = vld [vmem:[%s8930_s13 + $0x30] ss:$8 sps:$4 sm:$0xff]  }
 0x562   :  { %4677 = vmatprep.subr.bf16.mxu0 %v7861_v30  ;;  %5090 = vmatprep.subr.bf16.mxu1 %v7864_v31  ;;  %v7921_v30 = vld [vmem:[%s8930_s13 + $0x44] ss:$8 sps:$4 sm:$0xff]   ;;  %v7919_v31 = vld [vmem:[%s8930_s13 + $0x40] ss:$8 sps:$4 sm:$0xff]  }
 0x565   :  { %4678 = vmatpush1.bf16.msra.mxu0 %v7859_v32  ;;  %5091 = vmatpush1.bf16.msra.mxu1 %v7862_v21  ;;  %v7924_v32 = vld [vmem:[%s8930_s13 + $0x54] ss:$8 sps:$4 sm:$0xff]   ;;  %v7922_v21 = vld [vmem:[%s8930_s13 + $0x50] ss:$8 sps:$4 sm:$0xff]  }
 0x566   :  { %4679 = vmatprep.subr.bf16.mxu0 %v7867_v8  ;;  %5092 = vmatprep.subr.bf16.mxu1 %v7870_v33  ;;  %v7927_v8 = vld [vmem:[%s8930_s13 + $0x64] ss:$8 sps:$4 sm:$0xff]   ;;  %v7925_v33 = vld [vmem:[%s8930_s13 + $0x60] ss:$8 sps:$4 sm:$0xff]  }
 0x569   :  { %4680 = vmatpush1.bf16.msra.mxu0 %v7865_v34  ;;  %5093 = vmatpush1.bf16.msra.mxu1 %v7868_v35  ;;  %v7930_v34 = vld [vmem:[%s8930_s13 + $0x74] ss:$8 sps:$4 sm:$0xff]   ;;  %v7928_v35 = vld [vmem:[%s8930_s13 + $0x70] ss:$8 sps:$4 sm:$0xff]  }
 0x56a   :  { %4681 = vmatprep.subr.bf16.mxu0 %v7873_v16  ;;  %5094 = vmatprep.subr.bf16.mxu1 %v7876_v17  ;;  %v7933_v16 = vld [vmem:[%s8930_s13 + $0x84] ss:$8 sps:$4 sm:$0xff]   ;;  %v7931_v17 = vld [vmem:[%s8930_s13 + $0x80] ss:$8 sps:$4 sm:$0xff]  }
 0x56d   :  { %4682 = vmatpush1.bf16.msra.mxu0 %v7871_v36  ;;  %5095 = vmatpush1.bf16.msra.mxu1 %v7874_v38  ;;  %v7936_v36 = vld [vmem:[%s8930_s13 + $0x94] ss:$8 sps:$4 sm:$0xff]   ;;  %v7934_v38 = vld [vmem:[%s8930_s13 + $0x90] ss:$8 sps:$4 sm:$0xff]  }
 0x56e   :  { %4683 = vmatprep.subr.bf16.mxu0 %v7879_v9  ;;  %5096 = vmatprep.subr.bf16.mxu1 %v7882_v39  ;;  %v7939_v9 = vld [vmem:[%s8930_s13 + $0xa4] ss:$8 sps:$4 sm:$0xff]   ;;  %v7937_v39 = vld [vmem:[%s8930_s13 + $0xa0] ss:$8 sps:$4 sm:$0xff]  }
 0x571   :  { %4684 = vmatpush1.bf16.msra.mxu0 %v7877_v40  ;;  %5097 = vmatpush1.bf16.msra.mxu1 %v7880_v41  ;;  %v7942_v40 = vld [vmem:[%s8930_s13 + $0xb4] ss:$8 sps:$4 sm:$0xff]   ;;  %v7940_v41 = vld [vmem:[%s8930_s13 + $0xb0] ss:$8 sps:$4 sm:$0xff]  }
 0x572   :  { %4685 = vmatprep.subr.bf16.mxu0 %v7885_v42  ;;  %5098 = vmatprep.subr.bf16.mxu1 %v7888_v43  ;;  %v7945_v42 = vld [vmem:[%s8930_s13 + $0xc4] ss:$8 sps:$4 sm:$0xff]   ;;  %v7943_v43 = vld [vmem:[%s8930_s13 + $0xc0] ss:$8 sps:$4 sm:$0xff]  }
 0x575   :  { %4686 = vmatpush1.bf16.msra.mxu0 %v7883_v44  ;;  %5099 = vmatpush1.bf16.msra.mxu1 %v7886_v45  ;;  %v7948_v44 = vld [vmem:[%s8930_s13 + $0xd4] ss:$8 sps:$4 sm:$0xff]   ;;  %v7946_v45 = vld [vmem:[%s8930_s13 + $0xd0] ss:$8 sps:$4 sm:$0xff]  }
 0x576   :  { %v4058_v54 = vpop.f32.mrb[16].mxu0  ;;  %v4099_v55 = vpop.f32.mrb[16].mxu1  ;;  %4687 = vmatprep.subr.bf16.mxu0 %v7891_v46  ;;  %5100 = vmatprep.subr.bf16.mxu1 %v7894_v47  ;;  %v7951_v46 = vld [vmem:[%s8930_s13 + $0xe4] ss:$8 sps:$4 sm:$0xff]   ;;  %v7949_v47 = vld [vmem:[%s8930_s13 + $0xe0] ss:$8 sps:$4 sm:$0xff]  }
 0x577   :  { %v4059_v59 = vadd.f32 %v4058_v54, %v3293_v50  ;;  %v4060_v12 = vpop.f32.mrb[17].mxu0  ;;  %v4101_v15 = vpop.f32.mrb[17].mxu1  ;;  %v7954_v50 = vld [vmem:[%s8930_s13 + $0xf4] ss:$8 sps:$4 sm:$0xff]  }
 0x578   :  { %v4061_v60 = vadd.f32 %v4060_v12, %v3297_v51  ;;  %v4062_v62 = vpop.f32.mrb[18].mxu0  ;;  %v4103_v63 = vpop.f32.mrb[18].mxu1  ;;  %v7952_v51 = vld [vmem:[%s8930_s13 + $0xf0] ss:$8 sps:$4 sm:$0xff]   ;;  %v7960_v54 = vld [vmem:[#allocation13 + $0x14] ss:$8 sps:$4 sm:$0xff]  }
 0x579   :  { %v4100_v25 = vadd.f32 %v4099_v55, %v4059_v59  ;;  %v4063_v0 = vpop.f32.mrb[19].mxu0  ;;  %v4104_v1 = vpop.f32.mrb[19].mxu1  ;;  %4688 = vmatpush1.bf16.msra.mxu0 %v7889_v52  ;;  %5101 = vmatpush1.bf16.msra.mxu1 %v7892_v53  ;;  %v7955_v52 = vld [vmem:[#allocation13] ss:$8 sps:$4 sm:$0xff]   ;;  %v7957_v53 = vld [vmem:[#allocation13 + $0x4] ss:$8 sps:$4 sm:$0xff]  }
 0x57a   :  { %v4102_v2 = vadd.f32 %v4101_v15, %v4061_v60  ;;  %4689 = vmatprep.subr.bf16.mxu0 %v7897_v56  ;;  %5102 = vmatprep.subr.bf16.mxu1 %v7900_v57  ;;  %v7958_v55 = vld [vmem:[#allocation13 + $0x10] ss:$8 sps:$4 sm:$0xff]   ;;  %v7963_v56 = vld [vmem:[#allocation13 + $0x24] ss:$8 sps:$4 sm:$0xff]   ;;  %v7961_v57 = vld [vmem:[#allocation13 + $0x20] ss:$8 sps:$4 sm:$0xff]  }
 0x57b   :  { %v4108_v5 = vadd.f32 %v4100_v25, %v8639_v58  ;;  %v7966_v59 = vld [vmem:[#allocation13 + $0x34] ss:$8 sps:$4 sm:$0xff]   ;;  %v7964_v12 = vld [vmem:[#allocation13 + $0x30] ss:$8 sps:$4 sm:$0xff]   ;;  %v7969_v15 = vld [vmem:[#allocation13 + $0x44] ss:$8 sps:$4 sm:$0xff]  }
 0x57c   :  { %v4109_v6 = vadd.f32 %v4102_v2, %v8628_v19  ;;  %v7907_v19 = vld [vmem:[%s8930_s13] ss:$8 sps:$4 sm:$0xff]   ;;  %v7972_v62 = vld [vmem:[#allocation13 + $0x54] ss:$8 sps:$4 sm:$0xff]   ;;  %v7970_v63 = vld [vmem:[#allocation13 + $0x50] ss:$8 sps:$4 sm:$0xff]  }
 0x57d   :  { %vm4112_vm14 = vcmp.ge.f32.partialorder %v4108_v5, 0.0  ;;  %v4116_v13 = vmul.f32 0.01, %v4108_v5  ;;  %4690 = vmatpush1.bf16.msra.mxu0 %v7895_v37  ;;  %5103 = vmatpush1.bf16.msra.mxu1 %v7898_v61  ;;  %v7967_v60 = vld [vmem:[#allocation13 + $0x40] ss:$8 sps:$4 sm:$0xff]  }
 0x57e   :  { %v4117_v18 = vmul.f32 0.01, %v4109_v6  ;;  %4691 = vmatprep.subr.bf16.mxu0 %v7903_v3  ;;  %5104 = vmatprep.subr.bf16.mxu1 %v7906_v4  ;;  %vm4113_vm15 = vcmp.ge.f32.partialorder %v4109_v6, 0.0  ;;  %v7975_v25 = vld [vmem:[#allocation13 + $0x64] ss:$8 sps:$4 sm:$0xff]  }
 0x57f   :  { %v4120_v22 = vsel %vm4112_vm14, %v4108_v5, %v4116_v13  ;;  %v7973_v0 = vld [vmem:[#allocation13 + $0x60] ss:$8 sps:$4 sm:$0xff]   ;;  %v7978_v1 = vld [vmem:[#allocation13 + $0x74] ss:$8 sps:$4 sm:$0xff]   ;;  %v7976_v37 = vld [vmem:[#allocation13 + $0x70] ss:$8 sps:$4 sm:$0xff]  }
 0x580   :  { %v4121_v23 = vsel %vm4113_vm15, %v4109_v6, %v4117_v18  ;;  %v4287_v24 = vpack.c.bf16 %v4120_v22, %v4120_v22  ;;  %v7981_v61 = vld [vmem:[#allocation13 + $0x84] ss:$8 sps:$4 sm:$0xff]   ;;  %v7979_v2 = vld [vmem:[#allocation13 + $0x80] ss:$8 sps:$4 sm:$0xff]   ;;  %v7984_v3 = vld [vmem:[#allocation13 + $0x94] ss:$8 sps:$4 sm:$0xff]  }
 0x581   :  { %4692 = vmatpush1.bf16.msra.mxu0 %v7901_v7  ;;  %5105 = vmatpush1.bf16.msra.mxu1 %v7904_v14  ;;  %v4288_v58 = vpack.c.bf16 %v4121_v23, %v4121_v23  ;;  %v7982_v4 = vld [vmem:[#allocation13 + $0x90] ss:$8 sps:$4 sm:$0xff]   ;;  %v7987_v5 = vld [vmem:[#allocation13 + $0xa4] ss:$8 sps:$4 sm:$0xff]   ;;  %v7985_v6 = vld [vmem:[#allocation13 + $0xa0] ss:$8 sps:$4 sm:$0xff]  }
 0x582   :  { %5294 = vmatprep.subr.bf16.mxu0 %v7909_v20  ;;  %5582 = vmatprep.subr.bf16.mxu1 %v7957_v53  ;;  %v7990_v7 = vld [vmem:[#allocation13 + $0xb4] ss:$8 sps:$4 sm:$0xff]   ;;  %v7988_v13 = vld [vmem:[#allocation13 + $0xb0] ss:$8 sps:$4 sm:$0xff]   ;;  %v7993_v14 = vld [vmem:[#allocation13 + $0xc4] ss:$8 sps:$4 sm:$0xff]  }
 0x583   :  { %4693 = vmatprep.mubr.bf16.mxu0 %v4288_v58  ;;  %5106 = vmatprep.mubr.bf16.mxu1 %v4288_v58  ;;  %v7991_v18 = vld [vmem:[#allocation13 + $0xc0] ss:$8 sps:$4 sm:$0xff]   ;;  %v7996_v20 = vld [vmem:[#allocation13 + $0xd4] ss:$8 sps:$4 sm:$0xff]   ;;  %v7994_v22 = vld [vmem:[#allocation13 + $0xd0] ss:$8 sps:$4 sm:$0xff]  }
 0x584   :  { %4694 = vmatmul.mubr.bf16.vlgmr.msra.gmra.mrb[20].mxu0 %v4287_v24  ;;  %5107 = vmatmul.mubr.bf16.vlgmr.msra.gmra.mrb[20].mxu1 %v4287_v24  ;;  %v4186_v23 = vld [vmem:[%s8929_s12] sm:$0x3]  ;;  %v8029_v53 = vld [vmem:[#allocation15 + $0x84] ss:$8 sps:$4 sm:$0xff]  }
 0x585   :  { %5295 = vmatpush1.bf16.msra.mxu0 %v7907_v19  ;;  %5583 = vmatpush1.bf16.msra.mxu1 %v7955_v52  ;;  %v4706_v58 = vrot.slane %v4186_v23, %v8576_v10  ;;  %v4710_v19 = vrot.slane %v4186_v23, %v8579_v11  ;;  %v8024_v52 = vld [vmem:[#allocation15 + $0x70] ss:$8 sps:$4 sm:$0xff]  }
 0x586   :  { %5296 = vmatprep.subr.bf16.mxu0 %v7912_v49  ;;  %5584 = vmatprep.subr.bf16.mxu1 %v7960_v54  ;;  %v8027_v54 = vld [vmem:[#allocation15 + $0x80] ss:$8 sps:$4 sm:$0xff]  }
 0x589   :  { %5297 = vmatpush1.bf16.msra.mxu0 %v7910_v26  ;;  %5585 = vmatpush1.bf16.msra.mxu1 %v7958_v55  ;;  %v8032_v55 = vld [vmem:[#allocation15 + $0x94] ss:$8 sps:$4 sm:$0xff]  }
 0x58a   :  { %5298 = vmatprep.subr.bf16.mxu0 %v7915_v48  ;;  %5586 = vmatprep.subr.bf16.mxu1 %v7963_v56  ;;  %v8030_v56 = vld [vmem:[#allocation15 + $0x90] ss:$8 sps:$4 sm:$0xff]  }
 0x58d   :  { %5299 = vmatpush1.bf16.msra.mxu0 %v7913_v27  ;;  %5587 = vmatpush1.bf16.msra.mxu1 %v7961_v57  ;;  %v8035_v57 = vld [vmem:[#allocation15 + $0xa4] ss:$8 sps:$4 sm:$0xff]  }
 0x58e   :  { %5300 = vmatprep.subr.bf16.mxu0 %v7918_v28  ;;  %5588 = vmatprep.subr.bf16.mxu1 %v7966_v59  ;;  %v8033_v59 = vld [vmem:[#allocation15 + $0xa0] ss:$8 sps:$4 sm:$0xff]  }
 0x591   :  { %5301 = vmatpush1.bf16.msra.mxu0 %v7916_v29  ;;  %5589 = vmatpush1.bf16.msra.mxu1 %v7964_v12  ;;  %v8038_v12 = vld [vmem:[#allocation15 + $0xb4] ss:$8 sps:$4 sm:$0xff]  }
 0x592   :  { %5302 = vmatprep.subr.bf16.mxu0 %v7921_v30  ;;  %5590 = vmatprep.subr.bf16.mxu1 %v7969_v15  ;;  %v8036_v15 = vld [vmem:[#allocation15 + $0xb0] ss:$8 sps:$4 sm:$0xff]  }
 0x595   :  { %5303 = vmatpush1.bf16.msra.mxu0 %v7919_v31  ;;  %5591 = vmatpush1.bf16.msra.mxu1 %v7967_v60  ;;  %v8041_v60 = vld [vmem:[#allocation15 + $0xc4] ss:$8 sps:$4 sm:$0xff]  }
 0x596   :  { %5304 = vmatprep.subr.bf16.mxu0 %v7924_v32  ;;  %5592 = vmatprep.subr.bf16.mxu1 %v7972_v62  ;;  %v8039_v62 = vld [vmem:[#allocation15 + $0xc0] ss:$8 sps:$4 sm:$0xff]  }
 0x599   :  { %5305 = vmatpush1.bf16.msra.mxu0 %v7922_v21  ;;  %5593 = vmatpush1.bf16.msra.mxu1 %v7970_v63  ;;  %v8044_v63 = vld [vmem:[#allocation15 + $0xd4] ss:$8 sps:$4 sm:$0xff]  }
 0x59a   :  { %5306 = vmatprep.subr.bf16.mxu0 %v7927_v8  ;;  %5594 = vmatprep.subr.bf16.mxu1 %v7975_v25  ;;  %v8042_v25 = vld [vmem:[#allocation15 + $0xd0] ss:$8 sps:$4 sm:$0xff]  }
 0x59d   :  { %5307 = vmatpush1.bf16.msra.mxu0 %v7925_v33  ;;  %5595 = vmatpush1.bf16.msra.mxu1 %v7973_v0  ;;  %v7999_v33 = vld [vmem:[#allocation13 + $0xe4] ss:$8 sps:$4 sm:$0xff]   ;;  %v4219_v0 = vld [vmem:[%s8931_s14] sm:$0x3] }
 0x59e   :  { %5308 = vmatprep.subr.bf16.mxu0 %v7930_v34  ;;  %5596 = vmatprep.subr.bf16.mxu1 %v7978_v1  ;;  %v7997_v34 = vld [vmem:[#allocation13 + $0xe0] ss:$8 sps:$4 sm:$0xff]  }
 0x59f   :  { %v4284_v1 = vld [vmem:[%s8933_s16] sm:$0x3] }
 0x5a1   :  { %5309 = vmatpush1.bf16.msra.mxu0 %v7928_v35  ;;  %5597 = vmatpush1.bf16.msra.mxu1 %v7976_v37  ;;  %v8002_v35 = vld [vmem:[#allocation13 + $0xf4] ss:$8 sps:$4 sm:$0xff]   ;;  %v4293_v37 = vrot.slane %v4284_v1, %v8576_v10 }
 0x5a2   :  { %5310 = vmatprep.subr.bf16.mxu0 %v7933_v16  ;;  %5598 = vmatprep.subr.bf16.mxu1 %v7981_v61  ;;  %v8000_v16 = vld [vmem:[#allocation13 + $0xf0] ss:$8 sps:$4 sm:$0xff]   ;;  %v5127_v61 = vrot.slane %v4219_v0, %v8576_v10 }
 0x5a5   :  { %5311 = vmatpush1.bf16.msra.mxu0 %v7931_v17  ;;  %5599 = vmatpush1.bf16.msra.mxu1 %v7979_v2  ;;  %v8003_v17 = vld [vmem:[#allocation15] ss:$8 sps:$4 sm:$0xff]   ;;  %v4297_v2 = vrot.slane %v4284_v1, %v8579_v11 }
 0x5a6   :  { %5312 = vmatprep.subr.bf16.mxu0 %v7936_v36  ;;  %5600 = vmatprep.subr.bf16.mxu1 %v7984_v3  ;;  %v8005_v36 = vld [vmem:[#allocation15 + $0x4] ss:$8 sps:$4 sm:$0xff]   ;;  %v5131_v3 = vrot.slane %v4219_v0, %v8579_v11 }
 0x5a9   :  { %5313 = vmatpush1.bf16.msra.mxu0 %v7934_v38  ;;  %5601 = vmatpush1.bf16.msra.mxu1 %v7982_v4  ;;  %v8008_v38 = vld [vmem:[#allocation15 + $0x14] ss:$8 sps:$4 sm:$0xff]   ;;  %v6889_v4 = vadd.f32 %v5127_v61, %v4293_v37 }
 0x5aa   :  { %5314 = vmatprep.subr.bf16.mxu0 %v7939_v9  ;;  %5602 = vmatprep.subr.bf16.mxu1 %v7987_v5  ;;  %v8006_v9 = vld [vmem:[#allocation15 + $0x10] ss:$8 sps:$4 sm:$0xff]   ;;  %v6891_v5 = vadd.f32 %v5131_v3, %v4297_v2 }
 0x5ad   :  { %5315 = vmatpush1.bf16.msra.mxu0 %v7937_v39  ;;  %5603 = vmatpush1.bf16.msra.mxu1 %v7985_v6  ;;  %v8011_v39 = vld [vmem:[#allocation15 + $0x24] ss:$8 sps:$4 sm:$0xff]  }
 0x5ae   :  { %5316 = vmatprep.subr.bf16.mxu0 %v7942_v40  ;;  %5604 = vmatprep.subr.bf16.mxu1 %v7990_v7  ;;  %v8009_v40 = vld [vmem:[#allocation15 + $0x20] ss:$8 sps:$4 sm:$0xff]  }
 0x5b1   :  { %5317 = vmatpush1.bf16.msra.mxu0 %v7940_v41  ;;  %5605 = vmatpush1.bf16.msra.mxu1 %v7988_v13  ;;  %v8014_v41 = vld [vmem:[#allocation15 + $0x34] ss:$8 sps:$4 sm:$0xff]  }
 0x5b2   :  { %5318 = vmatprep.subr.bf16.mxu0 %v7945_v42  ;;  %5606 = vmatprep.subr.bf16.mxu1 %v7993_v14  ;;  %v8012_v42 = vld [vmem:[#allocation15 + $0x30] ss:$8 sps:$4 sm:$0xff]  }
 0x5b5   :  { %5319 = vmatpush1.bf16.msra.mxu0 %v7943_v43  ;;  %5607 = vmatpush1.bf16.msra.mxu1 %v7991_v18  ;;  %v8017_v43 = vld [vmem:[#allocation15 + $0x44] ss:$8 sps:$4 sm:$0xff]  }
 0x5b6   :  { %5320 = vmatprep.subr.bf16.mxu0 %v7948_v44  ;;  %5608 = vmatprep.subr.bf16.mxu1 %v7996_v20  ;;  %v8015_v44 = vld [vmem:[#allocation15 + $0x40] ss:$8 sps:$4 sm:$0xff]  }
 0x5b9   :  { %5321 = vmatpush1.bf16.msra.mxu0 %v7946_v45  ;;  %5609 = vmatpush1.bf16.msra.mxu1 %v7994_v22  ;;  %v8020_v45 = vld [vmem:[#allocation15 + $0x54] ss:$8 sps:$4 sm:$0xff]  }
 0x5ba   :  { %5322 = vmatprep.subr.bf16.mxu0 %v7951_v46  ;;  %5610 = vmatprep.subr.bf16.mxu1 %v7999_v33  ;;  %v8018_v46 = vld [vmem:[#allocation15 + $0x50] ss:$8 sps:$4 sm:$0xff]  }
 0x5bb   :  { %v5870_v33 = vld [vmem:[%s8938_s21 + $0x98] sm:$0xff] }
 0x5bd   :  { %5323 = vmatpush1.bf16.msra.mxu0 %v7949_v47  ;;  %5611 = vmatpush1.bf16.msra.mxu1 %v7997_v34  ;;  %v8023_v47 = vld [vmem:[#allocation15 + $0x64] ss:$8 sps:$4 sm:$0xff]  }
 0x5be   :  { %5324 = vmatprep.subr.bf16.mxu0 %v7954_v50  ;;  %5612 = vmatprep.subr.bf16.mxu1 %v8002_v35  ;;  %v8021_v50 = vld [vmem:[#allocation15 + $0x60] ss:$8 sps:$4 sm:$0xff]  }
 0x5c1   :  { %5325 = vmatpush1.bf16.msra.mxu0 %v7952_v51  ;;  %5613 = vmatpush1.bf16.msra.mxu1 %v8000_v16  ;;  %v8026_v51 = vld [vmem:[#allocation15 + $0x74] ss:$8 sps:$4 sm:$0xff]  }
 0x5c2   :  { %5802 = vmatprep.subr.bf16.mxu0 %v8005_v36  ;;  %v5853_v16 = vld [vmem:[%s8938_s21 + $0x10] sm:$0xff]  ;;  %v5871_v36 = vld [vmem:[%s8938_s21 + $0xa0] sm:$0xff] }
 0x657   :  { %v5108_v24 = vpop.f32.mrb[20].mxu1 }
 0x658   :  { %v6893_v49 = vadd.f32 %v5108_v24, %v4706_v58  ;;  %v5110_v26 = vpop.f32.mrb[21].mxu1 }
 0x659   :  { %v6894_v48 = vadd.f32 %v5110_v26, %v4710_v19  ;;  %v5112_v27 = vpop.f32.mrb[22].mxu1  ;;  %v8047_v26 = vld [vmem:[#allocation15 + $0xe4] ss:$8 sps:$4 sm:$0xff]  }
 0x65a   :  { %vm5115_vm0 = vcmp.ge.f32.partialorder %v6893_v49, 0.0  ;;  %v5117_v28 = vmul.f32 0.01, %v6893_v49  ;;  %v5113_v29 = vpop.f32.mrb[23].mxu1  ;;  %v8050_v27 = vld [vmem:[#allocation15 + $0xf4] ss:$8 sps:$4 sm:$0xff]  }
 0x65b   :  { %vm5116_vm1 = vcmp.ge.f32.partialorder %v6894_v48, 0.0  ;;  %v5118_v30 = vmul.f32 0.01, %v6894_v48  ;;  %v5867_v29 = vld [vmem:[%s8938_s21 + $0x80] sm:$0xff] }
 0x65c   :  { %v5119_v31 = vsel %vm5115_vm0, %v6893_v49, %v5117_v28  ;;  %v8048_v28 = vld [vmem:[#allocation15 + $0xf0] ss:$8 sps:$4 sm:$0xff]  }
 0x65d   :  { %v5120_v32 = vsel %vm5116_vm1, %v6894_v48, %v5118_v30  ;;  %v5121_v8 = vpack.c.bf16 %v5119_v31, %v5119_v31  ;;  %v8045_v48 = vld [vmem:[#allocation15 + $0xe0] ss:$8 sps:$4 sm:$0xff]  }
 0x65e   :  { %v5122_v21 = vpack.c.bf16 %v5120_v32, %v5120_v32  ;;  %v5868_v30 = vld [vmem:[%s8938_s21 + $0x88] sm:$0xff]  ;;  %v5851_v31 = vld [vmem:[%s8938_s21] sm:$0xff] }
 0x65f   :  { %v6842_v32 = vpack.c.bf16 %v5868_v30, %v5867_v29  ;;  %v5865_v29 = vld [vmem:[%s8938_s21 + $0x70] sm:$0xff]  ;;  %v5866_v30 = vld [vmem:[%s8938_s21 + $0x78] sm:$0xff] }
 0x660   :  { %5326 = vmatprep.mubr.bf16.mxu0 %v5122_v21  ;;  %v5852_v21 = vld [vmem:[%s8938_s21 + $0x8] sm:$0xff] }
 0x661   :  { %5327 = vmatmul.mubr.bf16.vlgmr.msra.gmra.mrb[20].mxu0 %v5121_v8  ;;  %v5869_v8 = vld [vmem:[%s8938_s21 + $0x90] sm:$0xff]  ;;  %v6844_v34 = vpack.c.bf16 %v5852_v21, %v5851_v31  ;;  %6843 = vmatprep.subr.bf16.mxu1 %v6842_v32  ;;  %v6872_v31 = vpack.c.bf16 %v5866_v30, %v5865_v29  ;;  %v5408_v32 = vld [vmem:[%s8937_s20] sm:$0x3] }
 0x662   :  { %5803 = vmatpush1.bf16.msra.mxu0 %v8003_v17  ;;  %v6846_v35 = vpack.c.bf16 %v5870_v33, %v5869_v8  ;;  %v5854_v17 = vld [vmem:[%s8938_s21 + $0x18] sm:$0xff]  ;;  %v5635_v21 = vrot.slane %v5408_v32, %v8576_v10  ;;  %v5639_v8 = vrot.slane %v5408_v32, %v8579_v11 }
 0x663   :  { %5804 = vmatprep.subr.bf16.mxu0 %v8008_v38  ;;  %v5872_v38 = vld [vmem:[%s8938_s21 + $0xa8] sm:$0xff] }
 0x666   :  { %5805 = vmatpush1.bf16.msra.mxu0 %v8006_v9  ;;  %v6848_v9 = vpack.c.bf16 %v5854_v17, %v5853_v16 }
 0x667   :  { %5806 = vmatprep.subr.bf16.mxu0 %v8011_v39  ;;  %v6850_v39 = vpack.c.bf16 %v5872_v38, %v5871_v36 }
 0x66a   :  { %5807 = vmatpush1.bf16.msra.mxu0 %v8009_v40  ;;  %v5855_v40 = vld [vmem:[%s8938_s21 + $0x20] sm:$0xff] }
 0x66b   :  { %5808 = vmatprep.subr.bf16.mxu0 %v8014_v41  ;;  %v5856_v41 = vld [vmem:[%s8938_s21 + $0x28] sm:$0xff] }
 0x66e   :  { %5809 = vmatpush1.bf16.msra.mxu0 %v8012_v42  ;;  %v5873_v42 = vld [vmem:[%s8938_s21 + $0xb0] sm:$0xff] }
 0x66f   :  { %5810 = vmatprep.subr.bf16.mxu0 %v8017_v43  ;;  %v5874_v43 = vld [vmem:[%s8938_s21 + $0xb8] sm:$0xff] }
 0x672   :  { %5811 = vmatpush1.bf16.msra.mxu0 %v8015_v44  ;;  %v6852_v44 = vpack.c.bf16 %v5856_v41, %v5855_v40 }
 0x673   :  { %5812 = vmatprep.subr.bf16.mxu0 %v8020_v45  ;;  %v6854_v45 = vpack.c.bf16 %v5874_v43, %v5873_v42  ;;  %v8272_v43 = vmov 0.0|0.0  }
 0x676   :  { %5813 = vmatpush1.bf16.msra.mxu0 %v8018_v46  ;;  %v5857_v46 = vld [vmem:[%s8938_s21 + $0x30] sm:$0xff] }
 0x677   :  { %5814 = vmatprep.subr.bf16.mxu0 %v8023_v47  ;;  %v5858_v47 = vld [vmem:[%s8938_s21 + $0x38] sm:$0xff] }
 0x67a   :  { %5815 = vmatpush1.bf16.msra.mxu0 %v8021_v50  ;;  %v5875_v50 = vld [vmem:[%s8938_s21 + $0xc0] sm:$0xff] }
 0x67b   :  { %5816 = vmatprep.subr.bf16.mxu0 %v8026_v51  ;;  %v5876_v51 = vld [vmem:[%s8938_s21 + $0xc8] sm:$0xff] }
 0x67e   :  { %5817 = vmatpush1.bf16.msra.mxu0 %v8024_v52  ;;  %v6856_v52 = vpack.c.bf16 %v5858_v47, %v5857_v46 }
 0x67f   :  { %5818 = vmatprep.subr.bf16.mxu0 %v8029_v53  ;;  %v6858_v53 = vpack.c.bf16 %v5876_v51, %v5875_v50 }
 0x682   :  { %5819 = vmatpush1.bf16.msra.mxu0 %v8027_v54  ;;  %v5859_v54 = vld [vmem:[%s8938_s21 + $0x40] sm:$0xff] }
 0x683   :  { %5820 = vmatprep.subr.bf16.mxu0 %v8032_v55  ;;  %v5860_v55 = vld [vmem:[%s8938_s21 + $0x48] sm:$0xff] }
 0x686   :  { %5821 = vmatpush1.bf16.msra.mxu0 %v8030_v56  ;;  %v5877_v56 = vld [vmem:[%s8938_s21 + $0xd0] sm:$0xff] }
 0x687   :  { %5822 = vmatprep.subr.bf16.mxu0 %v8035_v57  ;;  %v5878_v57 = vld [vmem:[%s8938_s21 + $0xd8] sm:$0xff] }
 0x68a   :  { %5823 = vmatpush1.bf16.msra.mxu0 %v8033_v59  ;;  %v6860_v59 = vpack.c.bf16 %v5860_v55, %v5859_v54 }
 0x68b   :  { %5824 = vmatprep.subr.bf16.mxu0 %v8038_v12  ;;  %v6862_v12 = vpack.c.bf16 %v5878_v57, %v5877_v56 }
 0x68e   :  { %5825 = vmatpush1.bf16.msra.mxu0 %v8036_v15  ;;  %v5861_v15 = vld [vmem:[%s8938_s21 + $0x50] sm:$0xff] }
 0x68f   :  { %5826 = vmatprep.subr.bf16.mxu0 %v8041_v60  ;;  %v5862_v60 = vld [vmem:[%s8938_s21 + $0x58] sm:$0xff] }
 0x692   :  { %5827 = vmatpush1.bf16.msra.mxu0 %v8039_v62  ;;  %v6864_v62 = vpack.c.bf16 %v5862_v60, %v5861_v15 }
 0x693   :  { %5828 = vmatprep.subr.bf16.mxu0 %v8044_v63  ;;  %v5375_v63 = vld [vmem:[%s8935_s18] sm:$0x3] }
 0x694   :  { %v5419_v0 = vrot.slane %v5375_v63, %v8579_v11  ;;  %v5885_v11 = vld [vmem:[%s8940_s23 + $0x8] sm:$0xff] }
 0x696   :  { %5829 = vmatpush1.bf16.msra.mxu0 %v8042_v25  ;;  %v5415_v25 = vrot.slane %v5375_v63, %v8576_v10  ;;  %v5884_v10 = vld [vmem:[%s8940_s23] sm:$0xff] }
 0x697   :  { %5830 = vmatprep.subr.bf16.mxu0 %v8047_v26 }
 0x69a   :  { %5831 = vmatpush1.bf16.msra.mxu0 %v8045_v48  ;;  %v5881_v48 = vld [vmem:[%s8938_s21 + $0xf0] sm:$0xff] }
 0x69b   :  { %5832 = vmatprep.subr.bf16.mxu0 %v8050_v27  ;;  %v5882_v27 = vld [vmem:[%s8938_s21 + $0xf8] sm:$0xff] }
 0x69e   :  { %5833 = vmatpush1.bf16.msra.mxu0 %v8048_v28  ;;  %v6870_v28 = vpack.c.bf16 %v5882_v27, %v5881_v48 }
 0x734   :  { %v5328_v6 = vpop.f32.mrb[20].mxu0 }
 0x735   :  { %v6890_v7 = vadd.f32 %v6889_v4, %v5328_v6  ;;  %v5330_v13 = vpop.f32.mrb[21].mxu0 }
 0x736   :  { %v6892_v14 = vadd.f32 %v6891_v5, %v5330_v13  ;;  %v5332_v18 = vpop.f32.mrb[22].mxu0 }
 0x737   :  { %vm5337_vm2 = vcmp.ge.f32.partialorder %v6890_v7, 0.0  ;;  %v5339_v20 = vmul.f32 0.01, %v6890_v7  ;;  %v5333_v22 = vpop.f32.mrb[23].mxu0 }
 0x738   :  { %vm5338_vm3 = vcmp.ge.f32.partialorder %v6892_v14, 0.0  ;;  %v5340_v23 = vmul.f32 0.01, %v6892_v14  ;;  %v5880_v22 = vld [vmem:[%s8938_s21 + $0xe8] sm:$0xff] }
 0x739   :  { %v8786_v58 = vsel %vm5337_vm2, %v6890_v7, %v5339_v20  ;;  %v5879_v20 = vld [vmem:[%s8938_s21 + $0xe0] sm:$0xff] }
 0x73a   :  { %v8788_v19 = vsel %vm5338_vm3, %v6892_v14, %v5340_v23  ;;  %v5409_v49 = vpack.c.bf16 %v8786_v58, %v8786_v58  ;;  %v6866_v23 = vpack.c.bf16 %v5880_v22, %v5879_v20 }
 0x73b   :  { %v5410_v24 = vpack.c.bf16 %v8788_v19, %v8788_v19 }
 0x73d   :  { %5614 = vmatprep.mubr.bf16.mxu1 %v5410_v24  ;;  %v5863_v24 = vld [vmem:[%s8938_s21 + $0x60] sm:$0xff] }
 0x73e   :  { %5615 = vmatmul.mubr.bf16.vlgmr.msra.gmra.mrb[24].mxu1 %v5409_v49  ;;  %v5864_v49 = vld [vmem:[%s8938_s21 + $0x68] sm:$0xff] }
 0x73f   :  { %6845 = vmatpush3.bf16.msra.mxu1 %v6844_v34  ;;  %v6868_v26 = vpack.c.bf16 %v5864_v49, %v5863_v24 }
 0x740   :  { %6847 = vmatprep.subr.bf16.mxu1 %v6846_v35 }
 0x743   :  { %6849 = vmatpush3.bf16.msra.mxu1 %v6848_v9 }
 0x744   :  { %6851 = vmatprep.subr.bf16.mxu1 %v6850_v39 }
 0x747   :  { %6853 = vmatpush3.bf16.msra.mxu1 %v6852_v44 }
 0x748   :  { %6855 = vmatprep.subr.bf16.mxu1 %v6854_v45  ;;  %v6794_v45 = vld [vmem:[%s8939_s22] ss:$0 sm:$0xff] }
 0x74b   :  { %6857 = vmatpush3.bf16.msra.mxu1 %v6856_v52 }
 0x74c   :  { %6859 = vmatprep.subr.bf16.mxu1 %v6858_v53  ;;  %v6795_v53 = vld [vmem:[%s8941_s24] ss:$0 sm:$0xff] }
 0x74f   :  { %6861 = vmatpush3.bf16.msra.mxu1 %v6860_v59 }
 0x750   :  { %6863 = vmatprep.subr.bf16.mxu1 %v6862_v12 }
 0x753   :  { %6865 = vmatpush3.bf16.msra.mxu1 %v6864_v62 }
 0x754   :  { %6867 = vmatprep.subr.bf16.mxu1 %v6866_v23 }
 0x757   :  { %6869 = vmatpush3.bf16.msra.mxu1 %v6868_v26 }
 0x758   :  { %6871 = vmatprep.subr.bf16.mxu1 %v6870_v28 }
 0x75b   :  { %6873 = vmatpush3.bf16.msra.mxu1 %v6872_v31 }
 0x75c   :  { %6874 = vmatprep.subr.bf16.mxu1 %v8272_v43 }
 0x811   :  { %v5616_v1 = vpop.f32.mrb[24].mxu1 }
 0x812   :  { %v5617_v37 = vadd.f32 %v5616_v1, %v5415_v25  ;;  %v5618_v61 = vpop.f32.mrb[25].mxu1 }
 0x813   :  { %v5619_v2 = vadd.f32 %v5618_v61, %v5419_v0  ;;  %v5620_v3 = vpop.f32.mrb[26].mxu1 }
 0x814   :  { %vm5623_vm4 = vcmp.ge.f32.partialorder %v5617_v37, 0.0  ;;  %v5625_v4 = vmul.f32 0.01, %v5617_v37  ;;  %v5621_v5 = vpop.f32.mrb[27].mxu1 }
 0x815   :  { %vm5624_vm5 = vcmp.ge.f32.partialorder %v5619_v2, 0.0  ;;  %v5626_v6 = vmul.f32 0.01, %v5619_v2 }
 0x816   :  { %v5627_v7 = vsel %vm5623_vm4, %v5617_v37, %v5625_v4 }
 0x817   :  { %v5628_v13 = vsel %vm5624_vm5, %v5619_v2, %v5626_v6  ;;  %v5629_v18 = vpack.c.bf16 %v5627_v7, %v5627_v7 }
 0x818   :  { %v5630_v14 = vpack.c.bf16 %v5628_v13, %v5628_v13 }
 0x81a   :  { %5834 = vmatprep.mubr.bf16.mxu0 %v5630_v14 }
 0x81b   :  { %5835 = vmatmul.mubr.bf16.vlgmr.msra.gmra.mrb[24].mxu0 %v5629_v18 }
 0x8ee   :  { %v5836_v33 = vpop.f32.mrb[24].mxu0 }
 0x8ef   :  { %v5837_v34 = vadd.f32 %v5836_v33, %v5635_v21  ;;  %v5838_v35 = vpop.f32.mrb[25].mxu0 }
 0x8f0   :  { %v5839_v16 = vadd.f32 %v5838_v35, %v5639_v8  ;;  %v5840_v17 = vpop.f32.mrb[26].mxu0 }
 0x8f1   :  { %v5843_v36 = vadd.f32 %v5837_v34, %v8786_v58  ;;  %v5841_v38 = vpop.f32.mrb[27].mxu0  ;;  %v6875_v58 = vpack.c.bf16 %v5885_v11, %v5884_v10 }
 0x8f2   :  { %v5844_v9 = vadd.f32 %v5839_v16, %v8788_v19  ;;  %v8274_v19 = vmov 0.0  }
 0x8f3   :  { %v5847_v39 = vmul.f32 0.01, %v5843_v36  ;;  %vm5845_vm7 = vcmp.ge.f32.partialorder %v5843_v36, 0.0 }
 0x8f4   :  { %vm5846_vm6 = vcmp.ge.f32.partialorder %v5844_v9, 0.0  ;;  %v5848_v40 = vmul.f32 0.01, %v5844_v9 }
 0x8f5   :  { %v5849_v42 = vsel %vm5845_vm7, %v5843_v36, %v5847_v39 }
 0x8f6   :  { %v5850_v41 = vsel %vm5846_vm6, %v5844_v9, %v5848_v40 }
 0x8f7   :  { %5957 = vmatprep.mubr.f32.mxu1 %v5850_v41 }
 0x8f8   :  { %5958 = vmatmul.mubr.f32.vlgmr.msra.gmra.mrb[28].mxu1 %v5849_v42 }
 0x8f9   :  { %6876 = vmatpush3.bf16.msra.mxu1 %v6875_v58  ;;  %6839 = vmatprep.mubr.msk.f32.mxu1 %vm8273_vm8, %v8274_v19 }
 0x9cb   :  { %v6829_v44 = vpop.f32.mrb[28].mxu1 }
 0x9cc   :  { %v6830_v46 = vpop.f32.mrb[29].mxu1 }
 0x9cd   :  { %v6831_v47 = vadd.f32 %v6830_v46, %v6829_v44 }
 0x9cf   :  { %v5960_v50 = vadd.f32 %v6831_v47, %v6794_v45 }
 0x9d1   :  { %vm5963_vm9 = vcmp.ge.f32.partialorder %v5960_v50, 0.0  ;;  %v5964_v51 = vmul.f32 0.01, %v5960_v50 }
 0x9d3   :  { %v5965_v52 = vsel %vm5963_vm9, %v5960_v50, %v5964_v51 }
 0x9d4   :  { %6840 = vmatmul.mubr.msk.f32.vlgmr.msra.gmra.mrb[30].mxu1 %vm5972_vm10, %v5965_v52 }
 0xaa7   :  { %v6042_v54 = vpop.f32.mrb[30].mxu1 }
 0xaa8   :  { %v6043_v55 = vadd.f32 %v6795_v53, %v6042_v54  ;;  %v6841_v56 = vpop.f32.mrb[31].mxu1 }
 0xaaa   :  { %6047 = vst.msk [vmem:[%s8981_s19] sm:$0x3] %vm6046_vm11, %v6043_v55 }
 0xaab   :  { %6052 = vsyncpa [#allocation3], 1 }
 0xaac   :  { %6053 = vsyncpa [#allocation5], 1 }
 0xaad   :  { %6054 = vsyncpa [#allocation8], 1 }
 0xaae   :  { %6055 = vsyncpa [#allocation11], 1 }
 0xaaf   :  { %6056 = vsyncpa [#allocation14], 1 }

</bundles_post_ra>
